<compile_context>
chip_gen: v6e
topology: v6e:2x2x1
jax: 0.10.0
libtpu: 0.0.40
codegen_flags: <defaults>
</compile_context>

<pallas_src>
import functools

import jax
import jax.numpy as jnp
from jax import lax
from jax.experimental import pallas as pl
from jax.experimental.pallas import tpu as pltpu


# ---------------------------------------------------------------------------
# Per-chip budgets & tiling helpers
# ---------------------------------------------------------------------------
def _vmem_budget_bytes():
    """Scoped VMEM budget: 64 MiB on v5e/v6e (128 MiB physical), 40 MiB on v7x."""
    try:
        cap = int(pltpu.get_tpu_info().vmem_capacity_bytes)
    except Exception:
        cap = 64 << 20                      # unknown -> assume small (v7x-like)
    if cap >= (100 << 20):                  # v5e / v6e
        return 64 << 20
    return 40 << 20                         # v7x


def _pick_units(total, cap):
    """Largest divisor of `total` that is <= min(cap, total // 2) (>= 2 steps)."""
    cap = max(1, min(cap, total // 2))
    best = 1
    for d in range(1, cap + 1):
        if total % d == 0:
            best = d
    return best


def _pick_batch_tile(b_pad, cap):
    """Largest multiple of 16 dividing b_pad, <= min(cap, b_pad // 2)."""
    cap = max(16, min(cap, b_pad // 2))
    best = 16
    for t in range(16, cap + 1, 16):
        if b_pad % t == 0:
            best = t
    return best


# ---------------------------------------------------------------------------
# Kernel 1: conv1 (5x5, 1->10) + maxpool2x2 + ReLU, lane-dense.
#
# a_ref: (4, 25, Mt) bf16   phase-major im2col, M = b*144 + ho*12 + wo in lanes
# w_ref: (10, 25) bf16      conv1 weights, f = ki*5 + kj
# b_ref: (10, 1)  f32
# o_ref: (10, Mt) bf16      pooled+ReLU'd conv1 output, lane-dense store
# ---------------------------------------------------------------------------
def _conv1_pool_kernel(a_ref, w_ref, b_ref, o_ref):
    w = w_ref[...]
    m = None
    for p in range(4):                                   # 4 wide MXU calls
        c = jnp.dot(w, a_ref[p], preferred_element_type=jnp.float32)  # (10, Mt)
        m = c if m is None else jnp.maximum(m, c)
    o_ref[...] = jnp.maximum(m + b_ref[...], 0.0).astype(o_ref.dtype)


def conv1_pool_relu(a1t, w1t, b1, *, row_tile, vmem_limit):
    P, K, M = a1t.shape                                  # (4, 25, M)
    C = w1t.shape[0]                                     # 10
    flops = 2 * P * M * K * C
    bytes_accessed = int(a1t.size * a1t.dtype.itemsize
                         + w1t.size * w1t.dtype.itemsize + C * M * 2)
    return pl.pallas_call(
        _conv1_pool_kernel,
        out_shape=jax.ShapeDtypeStruct((C, M), jnp.bfloat16),
        grid=(M // row_tile,),
        in_specs=[
            pl.BlockSpec((P, K, row_tile), lambda i: (0, 0, i)),
            pl.BlockSpec((C, K), lambda i: (0, 0)),
            pl.BlockSpec((C, 1), lambda i: (0, 0)),
        ],
        out_specs=pl.BlockSpec((C, row_tile), lambda i: (0, i)),
        compiler_params=pltpu.CompilerParams(
            dimension_semantics=("parallel",),
            vmem_limit_bytes=vmem_limit),
        cost_estimate=pl.CostEstimate(
            flops=flops, transcendentals=0, bytes_accessed=bytes_accessed),
    )(a1t, w1t, b1)


# ---------------------------------------------------------------------------
# Kernel 2: conv2 (5x5, 10->20) + maxpool2x2 + ReLU + fc1 + ReLU + fc2 +
# log_softmax, fully fused.
#
# a_ref : (64*tb, 250) bf16  rows ordered [phase, q, batch-within-tile],
#                            f = (ki*5+kj)*10 + ci  (built host-side per tile)
# w2_ref: (250, 20) bf16     b2_ref: (1, 20) f32
# w1_ref: (16, 20, 50) bf16  fc1 repacked per pooled position:
#                            w1_ref[q, c, o] = fc1_w[o, c*16 + q]
# b1_ref: (1, 50) f32        wf_ref: (50, 10) bf16      bf_ref: (1, 10) f32
# o_ref : (tb, 10) f32       pooled_ref/h_ref: VMEM scratch
# ---------------------------------------------------------------------------
def _conv2_fc_kernel(a_ref, w2_ref, b2_ref, w1_ref, b1_ref, wf_ref, bf_ref,
                     o_ref, pooled_ref, h_ref, *, tb):
    n = 16 * tb
    w2 = w2_ref[...]
    # conv2 over all 16 pooled positions: one wide MXU call per pool phase,
    # running elementwise max over phases = maxpool fused into the epilogue.
    cm = None
    for p in range(4):
        cp = jnp.dot(a_ref[p * n:(p + 1) * n, :], w2,
                     preferred_element_type=jnp.float32)            # (16*tb, 20)
        cm = cp if cm is None else jnp.maximum(cm, cp)
    # bias + ReLU commute with the phase-max (bias is phase-invariant).
    pooled_ref[...] = jnp.maximum(cm + b2_ref[...], 0.0).astype(pooled_ref.dtype)

    # fc1 decomposed per pooled position (no in-kernel NCHW relayout);
    # accumulate into VMEM scratch to bound live ranges.
    h_ref[...] = jnp.zeros_like(h_ref)
    for q in range(16):
        h_ref[...] += jnp.dot(pooled_ref[q * tb:(q + 1) * tb, :], w1_ref[q],
                              preferred_element_type=jnp.float32)
    h = jnp.maximum(h_ref[...] + b1_ref[...], 0.0)                   # (tb, 50)

    logits = jnp.dot(h.astype(jnp.bfloat16), wf_ref[...],
                     preferred_element_type=jnp.float32) + bf_ref[...]
    mx = jnp.max(logits, axis=-1, keepdims=True)
    s = logits - mx
    o_ref[...] = s - jnp.log(jnp.sum(jnp.exp(s), axis=-1, keepdims=True))


def conv2_fc_head(a2_rows, w2, b2, w1p, b1f, wf2, bf2, *,
                  batch_tile, b_pad, vmem_limit):
    K = a2_rows.shape[1]                                 # 250
    C2 = w2.shape[1]                                     # 20
    H = w1p.shape[2]                                     # 50
    N = wf2.shape[1]                                     # 10
    n_rows_blk = 64 * batch_tile
    flops = 2 * (a2_rows.shape[0] * K * C2 + 16 * b_pad * C2 * H + b_pad * H * N)
    bytes_accessed = int(a2_rows.size * a2_rows.dtype.itemsize
                         + (w2.size + w1p.size + wf2.size) * 2 + b_pad * N * 4)
    kern = functools.partial(_conv2_fc_kernel, tb=batch_tile)
    return pl.pallas_call(
        kern,
        out_shape=jax.ShapeDtypeStruct((b_pad, N), jnp.float32),
        grid=(b_pad // batch_tile,),
        in_specs=[
            pl.BlockSpec((n_rows_blk, K), lambda i: (i, 0)),
            pl.BlockSpec((K, C2), lambda i: (0, 0)),
            pl.BlockSpec((1, C2), lambda i: (0, 0)),
            pl.BlockSpec((16, C2, H), lambda i: (0, 0, 0)),
            pl.BlockSpec((1, H), lambda i: (0, 0)),
            pl.BlockSpec((H, N), lambda i: (0, 0)),
            pl.BlockSpec((1, N), lambda i: (0, 0)),
        ],
        out_specs=pl.BlockSpec((batch_tile, N), lambda i: (i, 0)),
        scratch_shapes=[
            pltpu.VMEM((16 * batch_tile, C2), jnp.bfloat16),   # pooled conv2
            pltpu.VMEM((batch_tile, H), jnp.float32),          # fc1 accumulator
        ],
        compiler_params=pltpu.CompilerParams(
            dimension_semantics=("parallel",),
            vmem_limit_bytes=vmem_limit),
        cost_estimate=pl.CostEstimate(
            flops=flops, transcendentals=b_pad * N,
            bytes_accessed=bytes_accessed),
    )(a2_rows, w2, b2, w1p, b1f, wf2, bf2)


# ---------------------------------------------------------------------------
# Host-side pool-phase-major im2col construction (XLA slicing; fused under jit)
# ---------------------------------------------------------------------------
def _build_a1t(x):
    """x: (B, 28, 28) -> (4, 25, B*144), feature f = ki*5+kj, lane m = b*144+ho*12+wo."""
    B = x.shape[0]
    phases = []
    for dh in (0, 1):
        for dw in (0, 1):
            feats = [x[:, dh + ki: dh + ki + 24: 2, dw + kj: dw + kj + 24: 2]
                     for ki in range(5) for kj in range(5)]          # each (B,12,12)
            phases.append(jnp.stack(feats, axis=0).reshape(25, B * 144))
    return jnp.stack(phases, axis=0)                                 # (4, 25, B*144)


def _build_a2_rows(p1_nhwc, batch_tile):
    """p1_nhwc: (B, 12, 12, 10) -> (64*B, 250) rows ordered
       [grid step, phase, q, batch-within-tile]; f = (ki*5+kj)*10 + ci."""
    B = p1_nhwc.shape[0]
    phases = []
    for dh in (0, 1):
        for dw in (0, 1):
            feats = [p1_nhwc[:, dh + ki: dh + ki + 8: 2, dw + kj: dw + kj + 8: 2, :]
                     for ki in range(5) for kj in range(5)]          # each (B,4,4,10)
            ph = jnp.concatenate(feats, axis=-1)                     # (B,4,4,250)
            phases.append(ph.reshape(B, 16, 250))                    # q = ho2*4 + wo2
    a = jnp.stack(phases, axis=0)                                    # (4, B, 16, 250)
    n_steps = B // batch_tile
    a = a.reshape(4, n_steps, batch_tile, 16, 250)
    a = a.transpose(1, 0, 3, 2, 4)                                   # (steps,4,16,tb,250)
    return a.reshape(n_steps * 64 * batch_tile, 250)


# ---------------------------------------------------------------------------
# Forward pass (eval mode: dropout layers are identity)
# ---------------------------------------------------------------------------
def my_network_forward(x_nchw, params):
    B = x_nchw.shape[0]
    vmem_limit = _vmem_budget_bytes()
    big_vmem = vmem_limit >= (56 << 20)          # v5e/v6e vs v7x budgets
    row_cap_units = 8 if big_vmem else 4         # 9216 / 4608 row tiles
    batch_cap = 256 if big_vmem else 128

    # Pad batch so tiles are 8/16-aligned and every parallel grid has >= 2 steps.
    b_pad = max(32, ((B + 15) // 16) * 16)
    x = x_nchw[:, 0, :, :].astype(jnp.float32)                        # (B, 28, 28)
    if b_pad != B:
        x = jnp.pad(x, ((0, b_pad - B), (0, 0), (0, 0)))

    # Weight preprocessing (layout only; constant-folded under jit).
    w1t = params["conv1_w"].reshape(10, 25).astype(jnp.bfloat16)      # (10, 25)
    b1c = params["conv1_b"].reshape(10, 1).astype(jnp.float32)
    w2 = params["conv2_w"].transpose(2, 3, 1, 0).reshape(250, 20)
    w2 = w2.astype(jnp.bfloat16)                                      # rows (ki,kj,ci)
    b2 = params["conv2_b"].reshape(1, 20).astype(jnp.float32)
    w1p = params["fc1_w"].reshape(50, 20, 16).transpose(2, 1, 0)
    w1p = w1p.astype(jnp.bfloat16)                                    # (16, 20, 50)
    b1f = params["fc1_b"].reshape(1, 50).astype(jnp.float32)
    wf2 = params["fc2_w"].T.astype(jnp.bfloat16)                      # (50, 10)
    bf2 = params["fc2_b"].reshape(1, 10).astype(jnp.float32)

    # Stage 1: conv1 + maxpool2x2 + ReLU (lane-dense, row-tiled).
    a1t = _build_a1t(x).astype(jnp.bfloat16)                          # (4, 25, M)
    M = b_pad * 144
    row_tile = 1152 * _pick_units(M // 1152, row_cap_units)           # lane-aligned
    p1t = conv1_pool_relu(a1t, w1t, b1c, row_tile=row_tile,
                          vmem_limit=vmem_limit)                      # (10, M) bf16
    p1 = p1t.reshape(10, b_pad, 12, 12).transpose(1, 2, 3, 0)         # (B,12,12,10)

    # Stage 2: conv2 + maxpool2x2 + ReLU + fc1 + ReLU + fc2 + log_softmax.
    batch_tile = _pick_batch_tile(b_pad, batch_cap)
    a2_rows = _build_a2_rows(p1, batch_tile)                          # (64*B, 250)
    out = conv2_fc_head(a2_rows, w2, b2, w1p, b1f, wf2, bf2,
                        batch_tile=batch_tile, b_pad=b_pad,
                        vmem_limit=vmem_limit)                        # (B_pad, 10)
    return out[:B]


# ---------------------------------------------------------------------------
# Pure-JAX reference (f32) for a correctness sanity check
# ---------------------------------------------------------------------------
def reference_forward(x_nchw, params):
    dn = ("NCHW", "OIHW", "NCHW")
    B = x_nchw.shape[0]
    c1 = lax.conv_general_dilated(x_nchw, params["conv1_w"], (1, 1), "VALID",
                                  dimension_numbers=dn)
    c1 = c1 + params["conv1_b"][None, :, None, None]
    p1 = jnp.maximum(jnp.max(c1.reshape(B, 10, 12, 2, 12, 2), axis=(3, 5)), 0.0)
    c2 = lax.conv_general_dilated(p1, params["conv2_w"], (1, 1), "VALID",
                                  dimension_numbers=dn)
    c2 = c2 + params["conv2_b"][None, :, None, None]
    p2 = jnp.maximum(jnp.max(c2.reshape(B, 20, 4, 2, 4, 2), axis=(3, 5)), 0.0)
    flat = p2.reshape(B, 320)
    h = jnp.maximum(flat @ params["fc1_w"].T + params["fc1_b"], 0.0)
    logits = h @ params["fc2_w"].T + params["fc2_b"]
    return jax.nn.log_softmax(logits, axis=-1)


# ---------------------------------------------------------------------------
# Deterministic parameter init (PyTorch-layout shapes, uniform +/- 1/sqrt(fan_in))
# ---------------------------------------------------------------------------
def init_params(key):
    def u(k, shape, fan_in):
        bound = 1.0 / (fan_in ** 0.5)
        return jax.random.uniform(k, shape, jnp.float32, -bound, bound)

    ks = jax.random.split(key, 8)
    return {
        "conv1_w": u(ks[0], (10, 1, 5, 5), 25),
        "conv1_b": u(ks[1], (10,), 25),
        "conv2_w": u(ks[2], (20, 10, 5, 5), 250),
        "conv2_b": u(ks[3], (20,), 250),
        "fc1_w":   u(ks[4], (50, 320), 320),
        "fc1_b":   u(ks[5], (50,), 320),
        "fc2_w":   u(ks[6], (10, 50), 50),
        "fc2_b":   u(ks[7], (10,), 50),
    }


if __name__ == "__main__":
    key = jax.random.PRNGKey(0)
    pkey, xkey = jax.random.split(key)
    params = init_params(pkey)

    # Input implied by fc1(in_features=320): (B, 1, 28, 28) MNIST-sized images.
    x = jax.random.normal(xkey, (2, 1, 28, 28), jnp.float32)

    fwd = jax.jit(lambda xx: my_network_forward(xx, params))
    out = fwd(x)
    jax.block_until_ready(out)

    assert out.shape == (2, 10)
    assert out.dtype == jnp.float32
    # log_softmax rows should exponentiate-sum to ~1
    assert bool(jnp.all(jnp.abs(jnp.sum(jnp.exp(out), axis=1) - 1.0) < 1e-4))
    # match the f32 pure-JAX reference (bf16 matmul operands -> loose atol)
    ref = reference_forward(x, params)
    assert bool(jnp.allclose(out, ref, atol=5e-2)), "mismatch vs reference"
    print("KERNEL_OK")
</pallas_src>

<mosaic_0001>
module attributes {stable_mosaic.version = 11 : i64} {
  func.func @_conv1_pool_kernel(%arg0: i32, %arg1: memref<4x25x2304xbf16, #tpu.memory_space<vmem>>, %arg2: memref<10x25xbf16, #tpu.memory_space<vmem>>, %arg3: memref<10x1xf32, #tpu.memory_space<vmem>>, %arg4: memref<10x2304xbf16, #tpu.memory_space<vmem>>) attributes {dimension_semantics = [#tpu.dimension_semantics<parallel>], iteration_bounds = array<i64: 2>, scalar_prefetch = 0 : i64, scratch_operands = 0 : i64, tpu.core_type = #tpu.core_type<tc>, window_params = [{transform_indices = @transform_0, window_bounds = array<i64: 4, 25, 2304>}, {pipeline_mode = #tpu.pipeline_mode<synchronous>, transform_indices = @transform_1, window_bounds = array<i64: 10, 25>}, {pipeline_mode = #tpu.pipeline_mode<synchronous>, transform_indices = @transform_2, window_bounds = array<i64: 10, 1>}, {transform_indices = @transform_3, window_bounds = array<i64: 10, 2304>}]} {
    %c0 = arith.constant 0 : index
    %c0_0 = arith.constant 0 : index
    %0 = vector.load %arg2[%c0, %c0_0] : memref<10x25xbf16, #tpu.memory_space<vmem>>, vector<10x25xbf16>
    %c0_1 = arith.constant 0 : index
    %c0_2 = arith.constant 0 : index
    %c0_3 = arith.constant 0 : index
    %1 = vector.load %arg1[%c0_1, %c0_2, %c0_3] : memref<4x25x2304xbf16, #tpu.memory_space<vmem>>, vector<1x25x2304xbf16>
    %2 = vector.shape_cast %1 : vector<1x25x2304xbf16> to vector<25x2304xbf16>
    %cst = arith.constant dense<0.000000e+00> : vector<10x2304xf32>
    %3 = tpu.matmul %0, %2, %cst {dimension_numbers = #tpu.dot_dimension_numbers<[1], [0], [0], [1], [0, 0, 1, 1], [], []>} : vector<10x25xbf16>, vector<25x2304xbf16>, vector<10x2304xf32> -> vector<10x2304xf32>
    %c1 = arith.constant 1 : index
    %c0_4 = arith.constant 0 : index
    %c0_5 = arith.constant 0 : index
    %4 = vector.load %arg1[%c1, %c0_4, %c0_5] : memref<4x25x2304xbf16, #tpu.memory_space<vmem>>, vector<1x25x2304xbf16>
    %5 = vector.shape_cast %4 : vector<1x25x2304xbf16> to vector<25x2304xbf16>
    %cst_6 = arith.constant dense<0.000000e+00> : vector<10x2304xf32>
    %6 = tpu.matmul %0, %5, %cst_6 {dimension_numbers = #tpu.dot_dimension_numbers<[1], [0], [0], [1], [0, 0, 1, 1], [], []>} : vector<10x25xbf16>, vector<25x2304xbf16>, vector<10x2304xf32> -> vector<10x2304xf32>
    %7 = arith.maximumf %3, %6 : vector<10x2304xf32>
    %c2 = arith.constant 2 : index
    %c0_7 = arith.constant 0 : index
    %c0_8 = arith.constant 0 : index
    %8 = vector.load %arg1[%c2, %c0_7, %c0_8] : memref<4x25x2304xbf16, #tpu.memory_space<vmem>>, vector<1x25x2304xbf16>
    %9 = vector.shape_cast %8 : vector<1x25x2304xbf16> to vector<25x2304xbf16>
    %cst_9 = arith.constant dense<0.000000e+00> : vector<10x2304xf32>
    %10 = tpu.matmul %0, %9, %cst_9 {dimension_numbers = #tpu.dot_dimension_numbers<[1], [0], [0], [1], [0, 0, 1, 1], [], []>} : vector<10x25xbf16>, vector<25x2304xbf16>, vector<10x2304xf32> -> vector<10x2304xf32>
    %11 = arith.maximumf %7, %10 : vector<10x2304xf32>
    %c3 = arith.constant 3 : index
    %c0_10 = arith.constant 0 : index
    %c0_11 = arith.constant 0 : index
    %12 = vector.load %arg1[%c3, %c0_10, %c0_11] : memref<4x25x2304xbf16, #tpu.memory_space<vmem>>, vector<1x25x2304xbf16>
    %13 = vector.shape_cast %12 : vector<1x25x2304xbf16> to vector<25x2304xbf16>
    %cst_12 = arith.constant dense<0.000000e+00> : vector<10x2304xf32>
    %14 = tpu.matmul %0, %13, %cst_12 {dimension_numbers = #tpu.dot_dimension_numbers<[1], [0], [0], [1], [0, 0, 1, 1], [], []>} : vector<10x25xbf16>, vector<25x2304xbf16>, vector<10x2304xf32> -> vector<10x2304xf32>
    %15 = arith.maximumf %11, %14 : vector<10x2304xf32>
    %c0_13 = arith.constant 0 : index
    %c0_14 = arith.constant 0 : index
    %16 = vector.load %arg3[%c0_13, %c0_14] : memref<10x1xf32, #tpu.memory_space<vmem>>, vector<10x1xf32>
    %17 = vector.broadcast %16 : vector<10x1xf32> to vector<10x2304xf32>
    %18 = arith.addf %15, %17 : vector<10x2304xf32>
    %cst_15 = arith.constant 0.000000e+00 : f32
    %19 = vector.broadcast %cst_15 : f32 to vector<10x2304xf32>
    %20 = arith.maximumf %18, %19 : vector<10x2304xf32>
    %21 = arith.truncf %20 : vector<10x2304xf32> to vector<10x2304xbf16>
    %c0_16 = arith.constant 0 : index
    %c0_17 = arith.constant 0 : index
    %22 = vector.load %arg4[%c0_16, %c0_17] : memref<10x2304xbf16, #tpu.memory_space<vmem>>, vector<10x2304xbf16>
    tpu.vector_store %arg4[%c0_16, %c0_17], %21 {strides = array<i32>} : memref<10x2304xbf16, #tpu.memory_space<vmem>>, vector<10x2304xbf16>,
    return
  }
  func.func @transform_0(%arg0: i32) -> (i32, i32, i32) {
    %c0_i32 = arith.constant 0 : i32
    %c0_i32_0 = arith.constant 0 : i32
    %c0_i32_1 = arith.constant 0 : i32
    return %c0_i32, %c0_i32_0, %arg0 : i32, i32, i32
  }
  func.func @transform_1(%arg0: i32) -> (i32, i32) {
    %c0_i32 = arith.constant 0 : i32
    %c0_i32_0 = arith.constant 0 : i32
    %c0_i32_1 = arith.constant 0 : i32
    return %c0_i32, %c0_i32_0 : i32, i32
  }
  func.func @transform_2(%arg0: i32) -> (i32, i32) {
    %c0_i32 = arith.constant 0 : i32
    %c0_i32_0 = arith.constant 0 : i32
    %c0_i32_1 = arith.constant 0 : i32
    return %c0_i32, %c0_i32_0 : i32, i32
  }
  func.func @transform_3(%arg0: i32) -> (i32, i32) {
    %c0_i32 = arith.constant 0 : i32
    %c0_i32_0 = arith.constant 0 : i32
    return %c0_i32, %arg0 : i32, i32
  }
}

module attributes {stable_mosaic.version = 11 : i64} {
  func.func @_conv2_fc_kernel(%arg0: i32, %arg1: memref<1024x250xbf16, #tpu.memory_space<vmem>>, %arg2: memref<250x20xbf16, #tpu.memory_space<vmem>>, %arg3: memref<1x20xf32, #tpu.memory_space<vmem>>, %arg4: memref<16x20x50xbf16, #tpu.memory_space<vmem>>, %arg5: memref<1x50xf32, #tpu.memory_space<vmem>>, %arg6: memref<50x10xbf16, #tpu.memory_space<vmem>>, %arg7: memref<1x10xf32, #tpu.memory_space<vmem>>, %arg8: memref<16x10xf32, #tpu.memory_space<vmem>>, %arg9: memref<256x20xbf16, #tpu.memory_space<vmem>>, %arg10: memref<16x50xf32, #tpu.memory_space<vmem>>) attributes {dimension_semantics = [#tpu.dimension_semantics<parallel>], iteration_bounds = array<i64: 2>, scalar_prefetch = 0 : i64, scratch_operands = 2 : i64, tpu.core_type = #tpu.core_type<tc>, window_params = [{transform_indices = @transform_0, window_bounds = array<i64: 1024, 250>}, {pipeline_mode = #tpu.pipeline_mode<synchronous>, transform_indices = @transform_1, window_bounds = array<i64: 250, 20>}, {pipeline_mode = #tpu.pipeline_mode<synchronous>, transform_indices = @transform_2, window_bounds = array<i64: 1, 20>}, {pipeline_mode = #tpu.pipeline_mode<synchronous>, transform_indices = @transform_3, window_bounds = array<i64: 16, 20, 50>}, {pipeline_mode = #tpu.pipeline_mode<synchronous>, transform_indices = @transform_4, window_bounds = array<i64: 1, 50>}, {pipeline_mode = #tpu.pipeline_mode<synchronous>, transform_indices = @transform_5, window_bounds = array<i64: 50, 10>}, {pipeline_mode = #tpu.pipeline_mode<synchronous>, transform_indices = @transform_6, window_bounds = array<i64: 1, 10>}, {transform_indices = @transform_7, window_bounds = array<i64: 16, 10>}]} {
    %c0 = arith.constant 0 : index
    %c0_0 = arith.constant 0 : index
    %0 = vector.load %arg2[%c0, %c0_0] : memref<250x20xbf16, #tpu.memory_space<vmem>>, vector<250x20xbf16>
    %c0_1 = arith.constant 0 : index
    %c0_2 = arith.constant 0 : index
    %1 = vector.load %arg1[%c0_1, %c0_2] : memref<1024x250xbf16, #tpu.memory_space<vmem>>, vector<256x250xbf16>
    %cst = arith.constant dense<0.000000e+00> : vector<256x20xf32>
    %2 = tpu.matmul %1, %0, %cst {dimension_numbers = #tpu.dot_dimension_numbers<[1], [0], [0], [1], [0, 0, 1, 1], [], []>} : vector<256x250xbf16>, vector<250x20xbf16>, vector<256x20xf32> -> vector<256x20xf32>
    %c256 = arith.constant 256 : index
    %c0_3 = arith.constant 0 : index
    %3 = vector.load %arg1[%c256, %c0_3] : memref<1024x250xbf16, #tpu.memory_space<vmem>>, vector<256x250xbf16>
    %cst_4 = arith.constant dense<0.000000e+00> : vector<256x20xf32>
    %4 = tpu.matmul %3, %0, %cst_4 {dimension_numbers = #tpu.dot_dimension_numbers<[1], [0], [0], [1], [0, 0, 1, 1], [], []>} : vector<256x250xbf16>, vector<250x20xbf16>, vector<256x20xf32> -> vector<256x20xf32>
    %5 = arith.maximumf %2, %4 : vector<256x20xf32>
    %c512 = arith.constant 512 : index
    %c0_5 = arith.constant 0 : index
    %6 = vector.load %arg1[%c512, %c0_5] : memref<1024x250xbf16, #tpu.memory_space<vmem>>, vector<256x250xbf16>
    %cst_6 = arith.constant dense<0.000000e+00> : vector<256x20xf32>
    %7 = tpu.matmul %6, %0, %cst_6 {dimension_numbers = #tpu.dot_dimension_numbers<[1], [0], [0], [1], [0, 0, 1, 1], [], []>} : vector<256x250xbf16>, vector<250x20xbf16>, vector<256x20xf32> -> vector<256x20xf32>
    %8 = arith.maximumf %5, %7 : vector<256x20xf32>
    %c768 = arith.constant 768 : index
    %c0_7 = arith.constant 0 : index
    %9 = vector.load %arg1[%c768, %c0_7] : memref<1024x250xbf16, #tpu.memory_space<vmem>>, vector<256x250xbf16>
    %cst_8 = arith.constant dense<0.000000e+00> : vector<256x20xf32>
    %10 = tpu.matmul %9, %0, %cst_8 {dimension_numbers = #tpu.dot_dimension_numbers<[1], [0], [0], [1], [0, 0, 1, 1], [], []>} : vector<256x250xbf16>, vector<250x20xbf16>, vector<256x20xf32> -> vector<256x20xf32>
    %11 = arith.maximumf %8, %10 : vector<256x20xf32>
    %c0_9 = arith.constant 0 : index
    %c0_10 = arith.constant 0 : index
    %12 = vector.load %arg3[%c0_9, %c0_10] : memref<1x20xf32, #tpu.memory_space<vmem>>, vector<1x20xf32>
    %13 = vector.broadcast %12 : vector<1x20xf32> to vector<256x20xf32>
    %14 = arith.addf %11, %13 : vector<256x20xf32>
    %cst_11 = arith.constant 0.000000e+00 : f32
    %15 = vector.broadcast %cst_11 : f32 to vector<256x20xf32>
    %16 = arith.maximumf %14, %15 : vector<256x20xf32>
    %17 = arith.truncf %16 : vector<256x20xf32> to vector<256x20xbf16>
    %c0_12 = arith.constant 0 : index
    %c0_13 = arith.constant 0 : index
    %18 = vector.load %arg9[%c0_12, %c0_13] : memref<256x20xbf16, #tpu.memory_space<vmem>>, vector<256x20xbf16>
    tpu.vector_store %arg9[%c0_12, %c0_13], %17 {strides = array<i32>} : memref<256x20xbf16, #tpu.memory_space<vmem>>, vector<256x20xbf16>,
    %cst_14 = arith.constant 0.000000e+00 : f32
    %19 = vector.broadcast %cst_14 : f32 to vector<16x50xf32>
    %c0_15 = arith.constant 0 : index
    %c0_16 = arith.constant 0 : index
    %20 = vector.load %arg10[%c0_15, %c0_16] : memref<16x50xf32, #tpu.memory_space<vmem>>, vector<16x50xf32>
    tpu.vector_store %arg10[%c0_15, %c0_16], %19 {strides = array<i32>} : memref<16x50xf32, #tpu.memory_space<vmem>>, vector<16x50xf32>,
    %c0_17 = arith.constant 0 : index
    %c0_18 = arith.constant 0 : index
    %21 = vector.load %arg10[%c0_17, %c0_18] : memref<16x50xf32, #tpu.memory_space<vmem>>, vector<16x50xf32>
    %c0_19 = arith.constant 0 : index
    %c0_20 = arith.constant 0 : index
    %22 = vector.load %arg9[%c0_19, %c0_20] : memref<256x20xbf16, #tpu.memory_space<vmem>>, vector<16x20xbf16>
    %c0_21 = arith.constant 0 : index
    %c0_22 = arith.constant 0 : index
    %c0_23 = arith.constant 0 : index
    %23 = vector.load %arg4[%c0_21, %c0_22, %c0_23] : memref<16x20x50xbf16, #tpu.memory_space<vmem>>, vector<1x20x50xbf16>
    %24 = vector.shape_cast %23 : vector<1x20x50xbf16> to vector<20x50xbf16>
    %cst_24 = arith.constant dense<0.000000e+00> : vector<16x50xf32>
    %25 = tpu.matmul %22, %24, %cst_24 {dimension_numbers = #tpu.dot_dimension_numbers<[1], [0], [0], [1], [0, 0, 1, 1], [], []>} : vector<16x20xbf16>, vector<20x50xbf16>, vector<16x50xf32> -> vector<16x50xf32>
    %26 = arith.addf %21, %25 : vector<16x50xf32>
    %c0_25 = arith.constant 0 : index
    %c0_26 = arith.constant 0 : index
    %27 = vector.load %arg10[%c0_25, %c0_26] : memref<16x50xf32, #tpu.memory_space<vmem>>, vector<16x50xf32>
    tpu.vector_store %arg10[%c0_25, %c0_26], %26 {strides = array<i32>} : memref<16x50xf32, #tpu.memory_space<vmem>>, vector<16x50xf32>,
    %c0_27 = arith.constant 0 : index
    %c0_28 = arith.constant 0 : index
    %28 = vector.load %arg10[%c0_27, %c0_28] : memref<16x50xf32, #tpu.memory_space<vmem>>, vector<16x50xf32>
    %c16 = arith.constant 16 : index
    %c0_29 = arith.constant 0 : index
    %29 = vector.load %arg9[%c16, %c0_29] : memref<256x20xbf16, #tpu.memory_space<vmem>>, vector<16x20xbf16>
    %c1 = arith.constant 1 : index
    %c0_30 = arith.constant 0 : index
    %c0_31 = arith.constant 0 : index
    %30 = vector.load %arg4[%c1, %c0_30, %c0_31] : memref<16x20x50xbf16, #tpu.memory_space<vmem>>, vector<1x20x50xbf16>
    %31 = vector.shape_cast %30 : vector<1x20x50xbf16> to vector<20x50xbf16>
    %cst_32 = arith.constant dense<0.000000e+00> : vector<16x50xf32>
    %32 = tpu.matmul %29, %31, %cst_32 {dimension_numbers = #tpu.dot_dimension_numbers<[1], [0], [0], [1], [0, 0, 1, 1], [], []>} : vector<16x20xbf16>, vector<20x50xbf16>, vector<16x50xf32> -> vector<16x50xf32>
    %33 = arith.addf %28, %32 : vector<16x50xf32>
    %c0_33 = arith.constant 0 : index
    %c0_34 = arith.constant 0 : index
    %34 = vector.load %arg10[%c0_33, %c0_34] : memref<16x50xf32, #tpu.memory_space<vmem>>, vector<16x50xf32>
    tpu.vector_store %arg10[%c0_33, %c0_34], %33 {strides = array<i32>} : memref<16x50xf32, #tpu.memory_space<vmem>>, vector<16x50xf32>,
    %c0_35 = arith.constant 0 : index
    %c0_36 = arith.constant 0 : index
    %35 = vector.load %arg10[%c0_35, %c0_36] : memref<16x50xf32, #tpu.memory_space<vmem>>, vector<16x50xf32>
    %c32 = arith.constant 32 : index
    %c0_37 = arith.constant 0 : index
    %36 = vector.load %arg9[%c32, %c0_37] : memref<256x20xbf16, #tpu.memory_space<vmem>>, vector<16x20xbf16>
    %c2 = arith.constant 2 : index
    %c0_38 = arith.constant 0 : index
    %c0_39 = arith.constant 0 : index
    %37 = vector.load %arg4[%c2, %c0_38, %c0_39] : memref<16x20x50xbf16, #tpu.memory_space<vmem>>, vector<1x20x50xbf16>
    %38 = vector.shape_cast %37 : vector<1x20x50xbf16> to vector<20x50xbf16>
    %cst_40 = arith.constant dense<0.000000e+00> : vector<16x50xf32>
    %39 = tpu.matmul %36, %38, %cst_40 {dimension_numbers = #tpu.dot_dimension_numbers<[1], [0], [0], [1], [0, 0, 1, 1], [], []>} : vector<16x20xbf16>, vector<20x50xbf16>, vector<16x50xf32> -> vector<16x50xf32>
    %40 = arith.addf %35, %39 : vector<16x50xf32>
    %c0_41 = arith.constant 0 : index
    %c0_42 = arith.constant 0 : index
    %41 = vector.load %arg10[%c0_41, %c0_42] : memref<16x50xf32, #tpu.memory_space<vmem>>, vector<16x50xf32>
    tpu.vector_store %arg10[%c0_41, %c0_42], %40 {strides = array<i32>} : memref<16x50xf32, #tpu.memory_space<vmem>>, vector<16x50xf32>,
    %c0_43 = arith.constant 0 : index
    %c0_44 = arith.constant 0 : index
    %42 = vector.load %arg10[%c0_43, %c0_44] : memref<16x50xf32, #tpu.memory_space<vmem>>, vector<16x50xf32>
    %c48 = arith.constant 48 : index
    %c0_45 = arith.constant 0 : index
    %43 = vector.load %arg9[%c48, %c0_45] : memref<256x20xbf16, #tpu.memory_space<vmem>>, vector<16x20xbf16>
    %c3 = arith.constant 3 : index
    %c0_46 = arith.constant 0 : index
    %c0_47 = arith.constant 0 : index
    %44 = vector.load %arg4[%c3, %c0_46, %c0_47] : memref<16x20x50xbf16, #tpu.memory_space<vmem>>, vector<1x20x50xbf16>
    %45 = vector.shape_cast %44 : vector<1x20x50xbf16> to vector<20x50xbf16>
    %cst_48 = arith.constant dense<0.000000e+00> : vector<16x50xf32>
    %46 = tpu.matmul %43, %45, %cst_48 {dimension_numbers = #tpu.dot_dimension_numbers<[1], [0], [0], [1], [0, 0, 1, 1], [], []>} : vector<16x20xbf16>, vector<20x50xbf16>, vector<16x50xf32> -> vector<16x50xf32>
    %47 = arith.addf %42, %46 : vector<16x50xf32>
    %c0_49 = arith.constant 0 : index
    %c0_50 = arith.constant 0 : index
    %48 = vector.load %arg10[%c0_49, %c0_50] : memref<16x50xf32, #tpu.memory_space<vmem>>, vector<16x50xf32>
    tpu.vector_store %arg10[%c0_49, %c0_50], %47 {strides = array<i32>} : memref<16x50xf32, #tpu.memory_space<vmem>>, vector<16x50xf32>,
    %c0_51 = arith.constant 0 : index
    %c0_52 = arith.constant 0 : index
    %49 = vector.load %arg10[%c0_51, %c0_52] : memref<16x50xf32, #tpu.memory_space<vmem>>, vector<16x50xf32>
    %c64 = arith.constant 64 : index
    %c0_53 = arith.constant 0 : index
    %50 = vector.load %arg9[%c64, %c0_53] : memref<256x20xbf16, #tpu.memory_space<vmem>>, vector<16x20xbf16>
    %c4 = arith.constant 4 : index
    %c0_54 = arith.constant 0 : index
    %c0_55 = arith.constant 0 : index
    %51 = vector.load %arg4[%c4, %c0_54, %c0_55] : memref<16x20x50xbf16, #tpu.memory_space<vmem>>, vector<1x20x50xbf16>
    %52 = vector.shape_cast %51 : vector<1x20x50xbf16> to vector<20x50xbf16>
    %cst_56 = arith.constant dense<0.000000e+00> : vector<16x50xf32>
    %53 = tpu.matmul %50, %52, %cst_56 {dimension_numbers = #tpu.dot_dimension_numbers<[1], [0], [0], [1], [0, 0, 1, 1], [], []>} : vector<16x20xbf16>, vector<20x50xbf16>, vector<16x50xf32> -> vector<16x50xf32>
    %54 = arith.addf %49, %53 : vector<16x50xf32>
    %c0_57 = arith.constant 0 : index
    %c0_58 = arith.constant 0 : index
    %55 = vector.load %arg10[%c0_57, %c0_58] : memref<16x50xf32, #tpu.memory_space<vmem>>, vector<16x50xf32>
    tpu.vector_store %arg10[%c0_57, %c0_58], %54 {strides = array<i32>} : memref<16x50xf32, #tpu.memory_space<vmem>>, vector<16x50xf32>,
    %c0_59 = arith.constant 0 : index
    %c0_60 = arith.constant 0 : index
    %56 = vector.load %arg10[%c0_59, %c0_60] : memref<16x50xf32, #tpu.memory_space<vmem>>, vector<16x50xf32>
    %c80 = arith.constant 80 : index
    %c0_61 = arith.constant 0 : index
    %57 = vector.load %arg9[%c80, %c0_61] : memref<256x20xbf16, #tpu.memory_space<vmem>>, vector<16x20xbf16>
    %c5 = arith.constant 5 : index
    %c0_62 = arith.constant 0 : index
    %c0_63 = arith.constant 0 : index
    %58 = vector.load %arg4[%c5, %c0_62, %c0_63] : memref<16x20x50xbf16, #tpu.memory_space<vmem>>, vector<1x20x50xbf16>
    %59 = vector.shape_cast %58 : vector<1x20x50xbf16> to vector<20x50xbf16>
    %cst_64 = arith.constant dense<0.000000e+00> : vector<16x50xf32>
    %60 = tpu.matmul %57, %59, %cst_64 {dimension_numbers = #tpu.dot_dimension_numbers<[1], [0], [0], [1], [0, 0, 1, 1], [], []>} : vector<16x20xbf16>, vector<20x50xbf16>, vector<16x50xf32> -> vector<16x50xf32>
    %61 = arith.addf %56, %60 : vector<16x50xf32>
    %c0_65 = arith.constant 0 : index
    %c0_66 = arith.constant 0 : index
    %62 = vector.load %arg10[%c0_65, %c0_66] : memref<16x50xf32, #tpu.memory_space<vmem>>, vector<16x50xf32>
    tpu.vector_store %arg10[%c0_65, %c0_66], %61 {strides = array<i32>} : memref<16x50xf32, #tpu.memory_space<vmem>>, vector<16x50xf32>,
    %c0_67 = arith.constant 0 : index
    %c0_68 = arith.constant 0 : index
    %63 = vector.load %arg10[%c0_67, %c0_68] : memref<16x50xf32, #tpu.memory_space<vmem>>, vector<16x50xf32>
    %c96 = arith.constant 96 : index
    %c0_69 = arith.constant 0 : index
    %64 = vector.load %arg9[%c96, %c0_69] : memref<256x20xbf16, #tpu.memory_space<vmem>>, vector<16x20xbf16>
    %c6 = arith.constant 6 : index
    %c0_70 = arith.constant 0 : index
    %c0_71 = arith.constant 0 : index
    %65 = vector.load %arg4[%c6, %c0_70, %c0_71] : memref<16x20x50xbf16, #tpu.memory_space<vmem>>, vector<1x20x50xbf16>
    %66 = vector.shape_cast %65 : vector<1x20x50xbf16> to vector<20x50xbf16>
    %cst_72 = arith.constant dense<0.000000e+00> : vector<16x50xf32>
    %67 = tpu.matmul %64, %66, %cst_72 {dimension_numbers = #tpu.dot_dimension_numbers<[1], [0], [0], [1], [0, 0, 1, 1], [], []>} : vector<16x20xbf16>, vector<20x50xbf16>, vector<16x50xf32> -> vector<16x50xf32>
    %68 = arith.addf %63, %67 : vector<16x50xf32>
    %c0_73 = arith.constant 0 : index
    %c0_74 = arith.constant 0 : index
    %69 = vector.load %arg10[%c0_73, %c0_74] : memref<16x50xf32, #tpu.memory_space<vmem>>, vector<16x50xf32>
    tpu.vector_store %arg10[%c0_73, %c0_74], %68 {strides = array<i32>} : memref<16x50xf32, #tpu.memory_space<vmem>>, vector<16x50xf32>,
    %c0_75 = arith.constant 0 : index
    %c0_76 = arith.constant 0 : index
    %70 = vector.load %arg10[%c0_75, %c0_76] : memref<16x50xf32, #tpu.memory_space<vmem>>, vector<16x50xf32>
    %c112 = arith.constant 112 : index
    %c0_77 = arith.constant 0 : index
    %71 = vector.load %arg9[%c112, %c0_77] : memref<256x20xbf16, #tpu.memory_space<vmem>>, vector<16x20xbf16>
    %c7 = arith.constant 7 : index
    %c0_78 = arith.constant 0 : index
    %c0_79 = arith.constant 0 : index
    %72 = vector.load %arg4[%c7, %c0_78, %c0_79] : memref<16x20x50xbf16, #tpu.memory_space<vmem>>, vector<1x20x50xbf16>
    %73 = vector.shape_cast %72 : vector<1x20x50xbf16> to vector<20x50xbf16>
    %cst_80 = arith.constant dense<0.000000e+00> : vector<16x50xf32>
    %74 = tpu.matmul %71, %73, %cst_80 {dimension_numbers = #tpu.dot_dimension_numbers<[1], [0], [0], [1], [0, 0, 1, 1], [], []>} : vector<16x20xbf16>, vector<20x50xbf16>, vector<16x50xf32> -> vector<16x50xf32>
    %75 = arith.addf %70, %74 : vector<16x50xf32>
    %c0_81 = arith.constant 0 : index
    %c0_82 = arith.constant 0 : index
    %76 = vector.load %arg10[%c0_81, %c0_82] : memref<16x50xf32, #tpu.memory_space<vmem>>, vector<16x50xf32>
    tpu.vector_store %arg10[%c0_81, %c0_82], %75 {strides = array<i32>} : memref<16x50xf32, #tpu.memory_space<vmem>>, vector<16x50xf32>,
    %c0_83 = arith.constant 0 : index
    %c0_84 = arith.constant 0 : index
    %77 = vector.load %arg10[%c0_83, %c0_84] : memref<16x50xf32, #tpu.memory_space<vmem>>, vector<16x50xf32>
    %c128 = arith.constant 128 : index
    %c0_85 = arith.constant 0 : index
    %78 = vector.load %arg9[%c128, %c0_85] : memref<256x20xbf16, #tpu.memory_space<vmem>>, vector<16x20xbf16>
    %c8 = arith.constant 8 : index
    %c0_86 = arith.constant 0 : index
    %c0_87 = arith.constant 0 : index
    %79 = vector.load %arg4[%c8, %c0_86, %c0_87] : memref<16x20x50xbf16, #tpu.memory_space<vmem>>, vector<1x20x50xbf16>
    %80 = vector.shape_cast %79 : vector<1x20x50xbf16> to vector<20x50xbf16>
    %cst_88 = arith.constant dense<0.000000e+00> : vector<16x50xf32>
    %81 = tpu.matmul %78, %80, %cst_88 {dimension_numbers = #tpu.dot_dimension_numbers<[1], [0], [0], [1], [0, 0, 1, 1], [], []>} : vector<16x20xbf16>, vector<20x50xbf16>, vector<16x50xf32> -> vector<16x50xf32>
    %82 = arith.addf %77, %81 : vector<16x50xf32>
    %c0_89 = arith.constant 0 : index
    %c0_90 = arith.constant 0 : index
    %83 = vector.load %arg10[%c0_89, %c0_90] : memref<16x50xf32, #tpu.memory_space<vmem>>, vector<16x50xf32>
    tpu.vector_store %arg10[%c0_89, %c0_90], %82 {strides = array<i32>} : memref<16x50xf32, #tpu.memory_space<vmem>>, vector<16x50xf32>,
    %c0_91 = arith.constant 0 : index
    %c0_92 = arith.constant 0 : index
    %84 = vector.load %arg10[%c0_91, %c0_92] : memref<16x50xf32, #tpu.memory_space<vmem>>, vector<16x50xf32>
    %c144 = arith.constant 144 : index
    %c0_93 = arith.constant 0 : index
    %85 = vector.load %arg9[%c144, %c0_93] : memref<256x20xbf16, #tpu.memory_space<vmem>>, vector<16x20xbf16>
    %c9 = arith.constant 9 : index
    %c0_94 = arith.constant 0 : index
    %c0_95 = arith.constant 0 : index
    %86 = vector.load %arg4[%c9, %c0_94, %c0_95] : memref<16x20x50xbf16, #tpu.memory_space<vmem>>, vector<1x20x50xbf16>
    %87 = vector.shape_cast %86 : vector<1x20x50xbf16> to vector<20x50xbf16>
    %cst_96 = arith.constant dense<0.000000e+00> : vector<16x50xf32>
    %88 = tpu.matmul %85, %87, %cst_96 {dimension_numbers = #tpu.dot_dimension_numbers<[1], [0], [0], [1], [0, 0, 1, 1], [], []>} : vector<16x20xbf16>, vector<20x50xbf16>, vector<16x50xf32> -> vector<16x50xf32>
    %89 = arith.addf %84, %88 : vector<16x50xf32>
    %c0_97 = arith.constant 0 : index
    %c0_98 = arith.constant 0 : index
    %90 = vector.load %arg10[%c0_97, %c0_98] : memref<16x50xf32, #tpu.memory_space<vmem>>, vector<16x50xf32>
    tpu.vector_store %arg10[%c0_97, %c0_98], %89 {strides = array<i32>} : memref<16x50xf32, #tpu.memory_space<vmem>>, vector<16x50xf32>,
    %c0_99 = arith.constant 0 : index
    %c0_100 = arith.constant 0 : index
    %91 = vector.load %arg10[%c0_99, %c0_100] : memref<16x50xf32, #tpu.memory_space<vmem>>, vector<16x50xf32>
    %c160 = arith.constant 160 : index
    %c0_101 = arith.constant 0 : index
    %92 = vector.load %arg9[%c160, %c0_101] : memref<256x20xbf16, #tpu.memory_space<vmem>>, vector<16x20xbf16>
    %c10 = arith.constant 10 : index
    %c0_102 = arith.constant 0 : index
    %c0_103 = arith.constant 0 : index
    %93 = vector.load %arg4[%c10, %c0_102, %c0_103] : memref<16x20x50xbf16, #tpu.memory_space<vmem>>, vector<1x20x50xbf16>
    %94 = vector.shape_cast %93 : vector<1x20x50xbf16> to vector<20x50xbf16>
    %cst_104 = arith.constant dense<0.000000e+00> : vector<16x50xf32>
    %95 = tpu.matmul %92, %94, %cst_104 {dimension_numbers = #tpu.dot_dimension_numbers<[1], [0], [0], [1], [0, 0, 1, 1], [], []>} : vector<16x20xbf16>, vector<20x50xbf16>, vector<16x50xf32> -> vector<16x50xf32>
    %96 = arith.addf %91, %95 : vector<16x50xf32>
    %c0_105 = arith.constant 0 : index
    %c0_106 = arith.constant 0 : index
    %97 = vector.load %arg10[%c0_105, %c0_106] : memref<16x50xf32, #tpu.memory_space<vmem>>, vector<16x50xf32>
    tpu.vector_store %arg10[%c0_105, %c0_106], %96 {strides = array<i32>} : memref<16x50xf32, #tpu.memory_space<vmem>>, vector<16x50xf32>,
    %c0_107 = arith.constant 0 : index
    %c0_108 = arith.constant 0 : index
    %98 = vector.load %arg10[%c0_107, %c0_108] : memref<16x50xf32, #tpu.memory_space<vmem>>, vector<16x50xf32>
    %c176 = arith.constant 176 : index
    %c0_109 = arith.constant 0 : index
    %99 = vector.load %arg9[%c176, %c0_109] : memref<256x20xbf16, #tpu.memory_space<vmem>>, vector<16x20xbf16>
    %c11 = arith.constant 11 : index
    %c0_110 = arith.constant 0 : index
    %c0_111 = arith.constant 0 : index
    %100 = vector.load %arg4[%c11, %c0_110, %c0_111] : memref<16x20x50xbf16, #tpu.memory_space<vmem>>, vector<1x20x50xbf16>
    %101 = vector.shape_cast %100 : vector<1x20x50xbf16> to vector<20x50xbf16>
    %cst_112 = arith.constant dense<0.000000e+00> : vector<16x50xf32>
    %102 = tpu.matmul %99, %101, %cst_112 {dimension_numbers = #tpu.dot_dimension_numbers<[1], [0], [0], [1], [0, 0, 1, 1], [], []>} : vector<16x20xbf16>, vector<20x50xbf16>, vector<16x50xf32> -> vector<16x50xf32>
    %103 = arith.addf %98, %102 : vector<16x50xf32>
    %c0_113 = arith.constant 0 : index
    %c0_114 = arith.constant 0 : index
    %104 = vector.load %arg10[%c0_113, %c0_114] : memref<16x50xf32, #tpu.memory_space<vmem>>, vector<16x50xf32>
    tpu.vector_store %arg10[%c0_113, %c0_114], %103 {strides = array<i32>} : memref<16x50xf32, #tpu.memory_space<vmem>>, vector<16x50xf32>,
    %c0_115 = arith.constant 0 : index
    %c0_116 = arith.constant 0 : index
    %105 = vector.load %arg10[%c0_115, %c0_116] : memref<16x50xf32, #tpu.memory_space<vmem>>, vector<16x50xf32>
    %c192 = arith.constant 192 : index
    %c0_117 = arith.constant 0 : index
    %106 = vector.load %arg9[%c192, %c0_117] : memref<256x20xbf16, #tpu.memory_space<vmem>>, vector<16x20xbf16>
    %c12 = arith.constant 12 : index
    %c0_118 = arith.constant 0 : index
    %c0_119 = arith.constant 0 : index
    %107 = vector.load %arg4[%c12, %c0_118, %c0_119] : memref<16x20x50xbf16, #tpu.memory_space<vmem>>, vector<1x20x50xbf16>
    %108 = vector.shape_cast %107 : vector<1x20x50xbf16> to vector<20x50xbf16>
    %cst_120 = arith.constant dense<0.000000e+00> : vector<16x50xf32>
    %109 = tpu.matmul %106, %108, %cst_120 {dimension_numbers = #tpu.dot_dimension_numbers<[1], [0], [0], [1], [0, 0, 1, 1], [], []>} : vector<16x20xbf16>, vector<20x50xbf16>, vector<16x50xf32> -> vector<16x50xf32>
    %110 = arith.addf %105, %109 : vector<16x50xf32>
    %c0_121 = arith.constant 0 : index
    %c0_122 = arith.constant 0 : index
    %111 = vector.load %arg10[%c0_121, %c0_122] : memref<16x50xf32, #tpu.memory_space<vmem>>, vector<16x50xf32>
    tpu.vector_store %arg10[%c0_121, %c0_122], %110 {strides = array<i32>} : memref<16x50xf32, #tpu.memory_space<vmem>>, vector<16x50xf32>,
    %c0_123 = arith.constant 0 : index
    %c0_124 = arith.constant 0 : index
    %112 = vector.load %arg10[%c0_123, %c0_124] : memref<16x50xf32, #tpu.memory_space<vmem>>, vector<16x50xf32>
    %c208 = arith.constant 208 : index
    %c0_125 = arith.constant 0 : index
    %113 = vector.load %arg9[%c208, %c0_125] : memref<256x20xbf16, #tpu.memory_space<vmem>>, vector<16x20xbf16>
    %c13 = arith.constant 13 : index
    %c0_126 = arith.constant 0 : index
    %c0_127 = arith.constant 0 : index
    %114 = vector.load %arg4[%c13, %c0_126, %c0_127] : memref<16x20x50xbf16, #tpu.memory_space<vmem>>, vector<1x20x50xbf16>
    %115 = vector.shape_cast %114 : vector<1x20x50xbf16> to vector<20x50xbf16>
    %cst_128 = arith.constant dense<0.000000e+00> : vector<16x50xf32>
    %116 = tpu.matmul %113, %115, %cst_128 {dimension_numbers = #tpu.dot_dimension_numbers<[1], [0], [0], [1], [0, 0, 1, 1], [], []>} : vector<16x20xbf16>, vector<20x50xbf16>, vector<16x50xf32> -> vector<16x50xf32>
    %117 = arith.addf %112, %116 : vector<16x50xf32>
    %c0_129 = arith.constant 0 : index
    %c0_130 = arith.constant 0 : index
    %118 = vector.load %arg10[%c0_129, %c0_130] : memref<16x50xf32, #tpu.memory_space<vmem>>, vector<16x50xf32>
    tpu.vector_store %arg10[%c0_129, %c0_130], %117 {strides = array<i32>} : memref<16x50xf32, #tpu.memory_space<vmem>>, vector<16x50xf32>,
    %c0_131 = arith.constant 0 : index
    %c0_132 = arith.constant 0 : index
    %119 = vector.load %arg10[%c0_131, %c0_132] : memref<16x50xf32, #tpu.memory_space<vmem>>, vector<16x50xf32>
    %c224 = arith.constant 224 : index
    %c0_133 = arith.constant 0 : index
    %120 = vector.load %arg9[%c224, %c0_133] : memref<256x20xbf16, #tpu.memory_space<vmem>>, vector<16x20xbf16>
    %c14 = arith.constant 14 : index
    %c0_134 = arith.constant 0 : index
    %c0_135 = arith.constant 0 : index
    %121 = vector.load %arg4[%c14, %c0_134, %c0_135] : memref<16x20x50xbf16, #tpu.memory_space<vmem>>, vector<1x20x50xbf16>
    %122 = vector.shape_cast %121 : vector<1x20x50xbf16> to vector<20x50xbf16>
    %cst_136 = arith.constant dense<0.000000e+00> : vector<16x50xf32>
    %123 = tpu.matmul %120, %122, %cst_136 {dimension_numbers = #tpu.dot_dimension_numbers<[1], [0], [0], [1], [0, 0, 1, 1], [], []>} : vector<16x20xbf16>, vector<20x50xbf16>, vector<16x50xf32> -> vector<16x50xf32>
    %124 = arith.addf %119, %123 : vector<16x50xf32>
    %c0_137 = arith.constant 0 : index
    %c0_138 = arith.constant 0 : index
    %125 = vector.load %arg10[%c0_137, %c0_138] : memref<16x50xf32, #tpu.memory_space<vmem>>, vector<16x50xf32>
    tpu.vector_store %arg10[%c0_137, %c0_138], %124 {strides = array<i32>} : memref<16x50xf32, #tpu.memory_space<vmem>>, vector<16x50xf32>,
    %c0_139 = arith.constant 0 : index
    %c0_140 = arith.constant 0 : index
    %126 = vector.load %arg10[%c0_139, %c0_140] : memref<16x50xf32, #tpu.memory_space<vmem>>, vector<16x50xf32>
    %c240 = arith.constant 240 : index
    %c0_141 = arith.constant 0 : index
    %127 = vector.load %arg9[%c240, %c0_141] : memref<256x20xbf16, #tpu.memory_space<vmem>>, vector<16x20xbf16>
    %c15 = arith.constant 15 : index
    %c0_142 = arith.constant 0 : index
    %c0_143 = arith.constant 0 : index
    %128 = vector.load %arg4[%c15, %c0_142, %c0_143] : memref<16x20x50xbf16, #tpu.memory_space<vmem>>, vector<1x20x50xbf16>
    %129 = vector.shape_cast %128 : vector<1x20x50xbf16> to vector<20x50xbf16>
    %cst_144 = arith.constant dense<0.000000e+00> : vector<16x50xf32>
    %130 = tpu.matmul %127, %129, %cst_144 {dimension_numbers = #tpu.dot_dimension_numbers<[1], [0], [0], [1], [0, 0, 1, 1], [], []>} : vector<16x20xbf16>, vector<20x50xbf16>, vector<16x50xf32> -> vector<16x50xf32>
    %131 = arith.addf %126, %130 : vector<16x50xf32>
    %c0_145 = arith.constant 0 : index
    %c0_146 = arith.constant 0 : index
    %132 = vector.load %arg10[%c0_145, %c0_146] : memref<16x50xf32, #tpu.memory_space<vmem>>, vector<16x50xf32>
    tpu.vector_store %arg10[%c0_145, %c0_146], %131 {strides = array<i32>} : memref<16x50xf32, #tpu.memory_space<vmem>>, vector<16x50xf32>,
    %c0_147 = arith.constant 0 : index
    %c0_148 = arith.constant 0 : index
    %133 = vector.load %arg10[%c0_147, %c0_148] : memref<16x50xf32, #tpu.memory_space<vmem>>, vector<16x50xf32>
    %c0_149 = arith.constant 0 : index
    %c0_150 = arith.constant 0 : index
    %134 = vector.load %arg5[%c0_149, %c0_150] : memref<1x50xf32, #tpu.memory_space<vmem>>, vector<1x50xf32>
    %135 = vector.broadcast %134 : vector<1x50xf32> to vector<16x50xf32>
    %136 = arith.addf %133, %135 : vector<16x50xf32>
    %cst_151 = arith.constant 0.000000e+00 : f32
    %137 = vector.broadcast %cst_151 : f32 to vector<16x50xf32>
    %138 = arith.maximumf %136, %137 : vector<16x50xf32>
    %139 = arith.truncf %138 : vector<16x50xf32> to vector<16x50xbf16>
    %c0_152 = arith.constant 0 : index
    %c0_153 = arith.constant 0 : index
    %140 = vector.load %arg6[%c0_152, %c0_153] : memref<50x10xbf16, #tpu.memory_space<vmem>>, vector<50x10xbf16>
    %cst_154 = arith.constant dense<0.000000e+00> : vector<16x10xf32>
    %141 = tpu.matmul %139, %140, %cst_154 {dimension_numbers = #tpu.dot_dimension_numbers<[1], [0], [0], [1], [0, 0, 1, 1], [], []>} : vector<16x50xbf16>, vector<50x10xbf16>, vector<16x10xf32> -> vector<16x10xf32>
    %c0_155 = arith.constant 0 : index
    %c0_156 = arith.constant 0 : index
    %142 = vector.load %arg7[%c0_155, %c0_156] : memref<1x10xf32, #tpu.memory_space<vmem>>, vector<1x10xf32>
    %143 = vector.broadcast %142 : vector<1x10xf32> to vector<16x10xf32>
    %144 = arith.addf %141, %143 : vector<16x10xf32>
    %cst_157 = arith.constant dense<0xFF800000> : vector<16xf32>
    %145 = vector.multi_reduction <maximumf>, %144, %cst_157 [1] : vector<16x10xf32> to vector<16xf32>
    %146 = vector.shape_cast %145 : vector<16xf32> to vector<16x1xf32>
    %147 = vector.broadcast %146 : vector<16x1xf32> to vector<16x10xf32>
    %148 = arith.subf %144, %147 : vector<16x10xf32>
    %149 = math.exp %148 : vector<16x10xf32>
    %cst_158 = arith.constant dense<0.000000e+00> : vector<16xf32>
    %150 = vector.multi_reduction <add>, %149, %cst_158 [1] : vector<16x10xf32> to vector<16xf32>
    %151 = vector.shape_cast %150 : vector<16xf32> to vector<16x1xf32>
    %152 = math.log %151 : vector<16x1xf32>
    %153 = vector.broadcast %152 : vector<16x1xf32> to vector<16x10xf32>
    %154 = arith.subf %148, %153 : vector<16x10xf32>
    %c0_159 = arith.constant 0 : index
    %c0_160 = arith.constant 0 : index
    %155 = vector.load %arg8[%c0_159, %c0_160] : memref<16x10xf32, #tpu.memory_space<vmem>>, vector<16x10xf32>
    tpu.vector_store %arg8[%c0_159, %c0_160], %154 {strides = array<i32>} : memref<16x10xf32, #tpu.memory_space<vmem>>, vector<16x10xf32>,
    return
  }
  func.func @transform_0(%arg0: i32) -> (i32, i32) {
    %c0_i32 = arith.constant 0 : i32
    %c0_i32_0 = arith.constant 0 : i32
    return %arg0, %c0_i32 : i32, i32
  }
  func.func @transform_1(%arg0: i32) -> (i32, i32) {
    %c0_i32 = arith.constant 0 : i32
    %c0_i32_0 = arith.constant 0 : i32
    %c0_i32_1 = arith.constant 0 : i32
    return %c0_i32, %c0_i32_0 : i32, i32
  }
  func.func @transform_2(%arg0: i32) -> (i32, i32) {
    %c0_i32 = arith.constant 0 : i32
    %c0_i32_0 = arith.constant 0 : i32
    %c0_i32_1 = arith.constant 0 : i32
    return %c0_i32, %c0_i32_0 : i32, i32
  }
  func.func @transform_3(%arg0: i32) -> (i32, i32, i32) {
    %c0_i32 = arith.constant 0 : i32
    %c0_i32_0 = arith.constant 0 : i32
    %c0_i32_1 = arith.constant 0 : i32
    %c0_i32_2 = arith.constant 0 : i32
    return %c0_i32, %c0_i32_0, %c0_i32_1 : i32, i32, i32
  }
  func.func @transform_4(%arg0: i32) -> (i32, i32) {
    %c0_i32 = arith.constant 0 : i32
    %c0_i32_0 = arith.constant 0 : i32
    %c0_i32_1 = arith.constant 0 : i32
    return %c0_i32, %c0_i32_0 : i32, i32
  }
  func.func @transform_5(%arg0: i32) -> (i32, i32) {
    %c0_i32 = arith.constant 0 : i32
    %c0_i32_0 = arith.constant 0 : i32
    %c0_i32_1 = arith.constant 0 : i32
    return %c0_i32, %c0_i32_0 : i32, i32
  }
  func.func @transform_6(%arg0: i32) -> (i32, i32) {
    %c0_i32 = arith.constant 0 : i32
    %c0_i32_0 = arith.constant 0 : i32
    %c0_i32_1 = arith.constant 0 : i32
    return %c0_i32, %c0_i32_0 : i32, i32
  }
  func.func @transform_7(%arg0: i32) -> (i32, i32) {
    %c0_i32 = arith.constant 0 : i32
    %c0_i32_0 = arith.constant 0 : i32
    return %arg0, %c0_i32 : i32, i32
  }
}

</mosaic_0001>

<bundles_post_ra>
// kernel: _lambda_.2
= control target key start
LH: loop header
LB: loop body
LE: loop exit
PB: predicated region body
PF: predicated region fallthrough
CT: control target
= control target key end

     0   :  { %s4113_s12 = smov 0   ;;  %s4115_s13 = smov 0   ;;  %s5318_s0 = inlined_call_operand.vmem [shape: bf16[4,25,4608], index: 0, kind: input, shape index: {}]   ;;  %s5319_s1 = inlined_call_operand.vmem [shape: bf16[10,25], index: 1, kind: input, shape index: {}]   ;;  %s5320_s2 = inlined_call_operand.vmem [shape: f32[10,1], index: 2, kind: input, shape index: {}]   ;;  %s5321_s3 = inlined_call_operand.vmem [shape: bf16[10,4608], index: 3, kind: output, shape index: {}]  }
   0x1   :  { %s4117_s14 = smov 0  }
   0x2 LB: > { %s3483_s15 = sadd.s32 4294967295, %s4089_s14   ;;  %s4130_s16 = sadd.s32 1, %s4089_s14   ;;  %s4089_s14 = sphi %s4117_s14, %s5508_s14   ;;  %s4085_s13 = sphi %s4115_s13, %s5507_s13   ;;  %s4081_s12 = sphi %s4113_s12, %s5506_s12  }
   0x3   : > { %s17_s17 = ssub.s32 %s4089_s14, %s4130_s16  ;;  %s20_s18 = sadd.s32 1, %s4085_s13 }
   0x4   : > { %p18_p0 = scmp.eq.s32.totalorder %s17_s17, 0  ;;  %p27_p1 = scmp.ne.s32.totalorder %s4085_s13, %s4081_s12 }
   0x5   : > { %p28_p2 = scmp.eq.s32.totalorder %s4089_s14, 0  ;;  %p99_p3 = scmp.eq.s32.totalorder %s3483_s15, 1 }
   0x6   : > { %s4141_s19 = scalar_select %p18_p0, %s4085_s13, %s20_s18  }
   0x7   : > { %p29_p4 = por %p28_p2, %p27_p1  ;;  %p4143_p5 = por %p99_p3, %p27_p1 }
   0x8   : > { %p3486_p6 = scmp.ge.s32.totalorder %s4089_s14, 2 }
   0xa   : > { %127 = sbr.rel (%p3486_p6) target bundleno = 92 (0x5c), region = 24 }
   0xf   : > { %130 = sbr.rel (!%p29_p4) target bundleno = 92 (0x5c), region = 28  ;;  %s132_s21 = sand.u32 (%p29_p4), 1, %s4085_s13  }
  0x10   : > { %s3799_s22 = smul.u32 (%p29_p4), 72, %s4089_s14 }
  0x11   : > { %s3819_s23 = smul.u32 (%p29_p4), 1152, %s132_s21 }
  0x12   : > { %s4153_s26 = scalar_lea.vmem (%p29_p4), %s5318_s0, %s3799_s22 }
  0x13   : > { %v150_v0 = vld [vmem:[%s4153_s26] sm:$0xff] (%p29_p4)  ;;  %v152_v1 = vld [vmem:[%s4153_s26 + $0x8] sm:$0xff] (%p29_p4)  ;;  %v154_v2 = vld [vmem:[%s4153_s26 + $0x10] sm:$0xff] (%p29_p4)  ;;  %s4158_s27 = scalar_lea.vmem (%p29_p4), [#allocation2], %s3819_s23 }
  0x14   : > { %151 = vst [vmem:[%s4158_s27] sm:$0xff] %v150_v0  ;;  %153 = vst [vmem:[%s4158_s27 + $0x8] sm:$0xff] %v152_v1  ;;  %v156_v3 = vld [vmem:[%s4153_s26 + $0x18] sm:$0xff]  ;;  %v158_v4 = vld [vmem:[%s4153_s26 + $0x20] sm:$0xff] }
  0x15   : > { %155 = vst [vmem:[%s4158_s27 + $0x10] sm:$0xff] %v154_v2  ;;  %v160_v5 = vld [vmem:[%s4153_s26 + $0x28] sm:$0xff]  ;;  %157 = vst [vmem:[%s4158_s27 + $0x18] sm:$0xff] %v156_v3  ;;  %v162_v6 = vld [vmem:[%s4153_s26 + $0x30] sm:$0xff] }
  0x16   : > { %159 = vst [vmem:[%s4158_s27 + $0x20] sm:$0xff] %v158_v4  ;;  %161 = vst [vmem:[%s4158_s27 + $0x28] sm:$0xff] %v160_v5  ;;  %v164_v7 = vld [vmem:[%s4153_s26 + $0x38] sm:$0xff]  ;;  %v166_v8 = vld [vmem:[%s4153_s26 + $0x40] sm:$0xff] }
  0x17   : > { %163 = vst [vmem:[%s4158_s27 + $0x30] sm:$0xff] %v162_v6  ;;  %165 = vst [vmem:[%s4158_s27 + $0x38] sm:$0xff] %v164_v7  ;;  %v168_v9 = vld [vmem:[%s4153_s26 + $0x90] sm:$0xff]  ;;  %v170_v10 = vld [vmem:[%s4153_s26 + $0x98] sm:$0xff] }
  0x18   : > { %167 = vst [vmem:[%s4158_s27 + $0x40] sm:$0xff] %v166_v8  ;;  %v172_v11 = vld [vmem:[%s4153_s26 + $0xa0] sm:$0xff]  ;;  %169 = vst [vmem:[%s4158_s27 + $0x48] sm:$0xff] %v168_v9  ;;  %v174_v12 = vld [vmem:[%s4153_s26 + $0xa8] sm:$0xff] }
  0x19   : > { %171 = vst [vmem:[%s4158_s27 + $0x50] sm:$0xff] %v170_v10  ;;  %173 = vst [vmem:[%s4158_s27 + $0x58] sm:$0xff] %v172_v11  ;;  %v176_v13 = vld [vmem:[%s4153_s26 + $0xb0] sm:$0xff]  ;;  %v178_v14 = vld [vmem:[%s4153_s26 + $0xb8] sm:$0xff] }
  0x1a   : > { %175 = vst [vmem:[%s4158_s27 + $0x60] sm:$0xff] %v174_v12  ;;  %177 = vst [vmem:[%s4158_s27 + $0x68] sm:$0xff] %v176_v13  ;;  %v180_v15 = vld [vmem:[%s4153_s26 + $0xc0] sm:$0xff]  ;;  %v182_v16 = vld [vmem:[%s4153_s26 + $0xc8] sm:$0xff] }
  0x1b   : > { %179 = vst [vmem:[%s4158_s27 + $0x70] sm:$0xff] %v178_v14  ;;  %v184_v17 = vld [vmem:[%s4153_s26 + $0xd0] sm:$0xff]  ;;  %181 = vst [vmem:[%s4158_s27 + $0x78] sm:$0xff] %v180_v15  ;;  %v186_v18 = vld [vmem:[%s4153_s26 + $0x120] sm:$0xff] }
  0x1c   : > { %183 = vst [vmem:[%s4158_s27 + $0x80] sm:$0xff] %v182_v16  ;;  %185 = vst [vmem:[%s4158_s27 + $0x88] sm:$0xff] %v184_v17  ;;  %v188_v19 = vld [vmem:[%s4153_s26 + $0x128] sm:$0xff]  ;;  %v190_v20 = vld [vmem:[%s4153_s26 + $0x130] sm:$0xff] }
  0x1d   : > { %187 = vst [vmem:[%s4158_s27 + $0x90] sm:$0xff] %v186_v18  ;;  %189 = vst [vmem:[%s4158_s27 + $0x98] sm:$0xff] %v188_v19  ;;  %v192_v21 = vld [vmem:[%s4153_s26 + $0x138] sm:$0xff]  ;;  %v194_v22 = vld [vmem:[%s4153_s26 + $0x140] sm:$0xff] }
  0x1e   : > { %191 = vst [vmem:[%s4158_s27 + $0xa0] sm:$0xff] %v190_v20  ;;  %v196_v23 = vld [vmem:[%s4153_s26 + $0x148] sm:$0xff]  ;;  %193 = vst [vmem:[%s4158_s27 + $0xa8] sm:$0xff] %v192_v21  ;;  %v198_v24 = vld [vmem:[%s4153_s26 + $0x150] sm:$0xff] }
  0x1f   : > { %195 = vst [vmem:[%s4158_s27 + $0xb0] sm:$0xff] %v194_v22  ;;  %197 = vst [vmem:[%s4158_s27 + $0xb8] sm:$0xff] %v196_v23  ;;  %v200_v25 = vld [vmem:[%s4153_s26 + $0x158] sm:$0xff]  ;;  %v202_v26 = vld [vmem:[%s4153_s26 + $0x160] sm:$0xff] }
  0x20   : > { %199 = vst [vmem:[%s4158_s27 + $0xc0] sm:$0xff] %v198_v24  ;;  %201 = vst [vmem:[%s4158_s27 + $0xc8] sm:$0xff] %v200_v25  ;;  %v204_v27 = vld [vmem:[%s4153_s26 + $0x1b0] sm:$0xff]  ;;  %v206_v28 = vld [vmem:[%s4153_s26 + $0x1b8] sm:$0xff] }
  0x21   : > { %203 = vst [vmem:[%s4158_s27 + $0xd0] sm:$0xff] %v202_v26  ;;  %v208_v29 = vld [vmem:[%s4153_s26 + $0x1c0] sm:$0xff]  ;;  %205 = vst [vmem:[%s4158_s27 + $0xd8] sm:$0xff] %v204_v27  ;;  %v210_v30 = vld [vmem:[%s4153_s26 + $0x1c8] sm:$0xff] }
  0x22   : > { %207 = vst [vmem:[%s4158_s27 + $0xe0] sm:$0xff] %v206_v28  ;;  %209 = vst [vmem:[%s4158_s27 + $0xe8] sm:$0xff] %v208_v29  ;;  %v212_v31 = vld [vmem:[%s4153_s26 + $0x1d0] sm:$0xff]  ;;  %v214_v32 = vld [vmem:[%s4153_s26 + $0x1d8] sm:$0xff] }
  0x23   : > { %211 = vst [vmem:[%s4158_s27 + $0xf0] sm:$0xff] %v210_v30  ;;  %213 = vst [vmem:[%s4158_s27 + $0xf8] sm:$0xff] %v212_v31  ;;  %v216_v33 = vld [vmem:[%s4153_s26 + $0x1e0] sm:$0xff]  ;;  %v218_v34 = vld [vmem:[%s4153_s26 + $0x1e8] sm:$0xff] }
  0x24   : > { %215 = vst [vmem:[%s4158_s27 + $0x100] sm:$0xff] %v214_v32  ;;  %v220_v35 = vld [vmem:[%s4153_s26 + $0x1f0] sm:$0xff]  ;;  %217 = vst [vmem:[%s4158_s27 + $0x108] sm:$0xff] %v216_v33  ;;  %v222_v36 = vld [vmem:[%s4153_s26 + $0x240] sm:$0xff] }
  0x25   : > { %219 = vst [vmem:[%s4158_s27 + $0x110] sm:$0xff] %v218_v34  ;;  %221 = vst [vmem:[%s4158_s27 + $0x118] sm:$0xff] %v220_v35  ;;  %v224_v37 = vld [vmem:[%s4153_s26 + $0x248] sm:$0xff]  ;;  %v226_v38 = vld [vmem:[%s4153_s26 + $0x250] sm:$0xff] }
  0x26   : > { %223 = vst [vmem:[%s4158_s27 + $0x120] sm:$0xff] %v222_v36  ;;  %225 = vst [vmem:[%s4158_s27 + $0x128] sm:$0xff] %v224_v37  ;;  %v228_v39 = vld [vmem:[%s4153_s26 + $0x258] sm:$0xff]  ;;  %v230_v40 = vld [vmem:[%s4153_s26 + $0x260] sm:$0xff] }
  0x27   : > { %227 = vst [vmem:[%s4158_s27 + $0x130] sm:$0xff] %v226_v38  ;;  %v232_v41 = vld [vmem:[%s4153_s26 + $0x268] sm:$0xff]  ;;  %229 = vst [vmem:[%s4158_s27 + $0x138] sm:$0xff] %v228_v39  ;;  %v234_v42 = vld [vmem:[%s4153_s26 + $0x270] sm:$0xff] }
  0x28   : > { %231 = vst [vmem:[%s4158_s27 + $0x140] sm:$0xff] %v230_v40  ;;  %233 = vst [vmem:[%s4158_s27 + $0x148] sm:$0xff] %v232_v41  ;;  %v236_v43 = vld [vmem:[%s4153_s26 + $0x278] sm:$0xff]  ;;  %v238_v44 = vld [vmem:[%s4153_s26 + $0x280] sm:$0xff] }
  0x29   : > { %235 = vst [vmem:[%s4158_s27 + $0x150] sm:$0xff] %v234_v42  ;;  %237 = vst [vmem:[%s4158_s27 + $0x158] sm:$0xff] %v236_v43  ;;  %v240_v45 = vld [vmem:[%s4153_s26 + $0x2d0] sm:$0xff]  ;;  %v242_v46 = vld [vmem:[%s4153_s26 + $0x2d8] sm:$0xff] }
  0x2a   : > { %239 = vst [vmem:[%s4158_s27 + $0x160] sm:$0xff] %v238_v44  ;;  %v244_v47 = vld [vmem:[%s4153_s26 + $0x2e0] sm:$0xff]  ;;  %241 = vst [vmem:[%s4158_s27 + $0x168] sm:$0xff] %v240_v45  ;;  %v246_v48 = vld [vmem:[%s4153_s26 + $0x2e8] sm:$0xff] }
  0x2b   : > { %243 = vst [vmem:[%s4158_s27 + $0x170] sm:$0xff] %v242_v46  ;;  %245 = vst [vmem:[%s4158_s27 + $0x178] sm:$0xff] %v244_v47  ;;  %v248_v49 = vld [vmem:[%s4153_s26 + $0x2f0] sm:$0xff]  ;;  %v250_v50 = vld [vmem:[%s4153_s26 + $0x2f8] sm:$0xff] }
  0x2c   : > { %247 = vst [vmem:[%s4158_s27 + $0x180] sm:$0xff] %v246_v48  ;;  %249 = vst [vmem:[%s4158_s27 + $0x188] sm:$0xff] %v248_v49  ;;  %v252_v51 = vld [vmem:[%s4153_s26 + $0x300] sm:$0xff]  ;;  %v254_v52 = vld [vmem:[%s4153_s26 + $0x308] sm:$0xff] }
  0x2d   : > { %251 = vst [vmem:[%s4158_s27 + $0x190] sm:$0xff] %v250_v50  ;;  %v256_v53 = vld [vmem:[%s4153_s26 + $0x310] sm:$0xff]  ;;  %253 = vst [vmem:[%s4158_s27 + $0x198] sm:$0xff] %v252_v51  ;;  %v258_v54 = vld [vmem:[%s4153_s26 + $0x360] sm:$0xff] }
  0x2e   : > { %255 = vst [vmem:[%s4158_s27 + $0x1a0] sm:$0xff] %v254_v52  ;;  %257 = vst [vmem:[%s4158_s27 + $0x1a8] sm:$0xff] %v256_v53  ;;  %v260_v55 = vld [vmem:[%s4153_s26 + $0x368] sm:$0xff]  ;;  %v262_v56 = vld [vmem:[%s4153_s26 + $0x370] sm:$0xff] }
  0x2f   : > { %259 = vst [vmem:[%s4158_s27 + $0x1b0] sm:$0xff] %v258_v54  ;;  %261 = vst [vmem:[%s4158_s27 + $0x1b8] sm:$0xff] %v260_v55  ;;  %v264_v57 = vld [vmem:[%s4153_s26 + $0x378] sm:$0xff]  ;;  %v266_v58 = vld [vmem:[%s4153_s26 + $0x380] sm:$0xff] }
  0x30   : > { %263 = vst [vmem:[%s4158_s27 + $0x1c0] sm:$0xff] %v262_v56  ;;  %v268_v59 = vld [vmem:[%s4153_s26 + $0x388] sm:$0xff]  ;;  %265 = vst [vmem:[%s4158_s27 + $0x1c8] sm:$0xff] %v264_v57  ;;  %v270_v60 = vld [vmem:[%s4153_s26 + $0x390] sm:$0xff] }
  0x31   : > { %267 = vst [vmem:[%s4158_s27 + $0x1d0] sm:$0xff] %v266_v58  ;;  %269 = vst [vmem:[%s4158_s27 + $0x1d8] sm:$0xff] %v268_v59  ;;  %v272_v61 = vld [vmem:[%s4153_s26 + $0x398] sm:$0xff]  ;;  %v274_v62 = vld [vmem:[%s4153_s26 + $0x3a0] sm:$0xff] }
  0x32   : > { %271 = vst [vmem:[%s4158_s27 + $0x1e0] sm:$0xff] %v270_v60  ;;  %273 = vst [vmem:[%s4158_s27 + $0x1e8] sm:$0xff] %v272_v61  ;;  %v276_v63 = vld [vmem:[%s4153_s26 + $0x3f0] sm:$0xff]  ;;  %v278_v0 = vld [vmem:[%s4153_s26 + $0x3f8] sm:$0xff] }
  0x33   : > { %275 = vst [vmem:[%s4158_s27 + $0x1f0] sm:$0xff] %v274_v62  ;;  %v280_v1 = vld [vmem:[%s4153_s26 + $0x400] sm:$0xff]  ;;  %277 = vst [vmem:[%s4158_s27 + $0x1f8] sm:$0xff] %v276_v63  ;;  %v282_v2 = vld [vmem:[%s4153_s26 + $0x408] sm:$0xff] }
  0x34   : > { %279 = vst [vmem:[%s4158_s27 + $0x200] sm:$0xff] %v278_v0  ;;  %281 = vst [vmem:[%s4158_s27 + $0x208] sm:$0xff] %v280_v1  ;;  %v284_v3 = vld [vmem:[%s4153_s26 + $0x410] sm:$0xff]  ;;  %v286_v4 = vld [vmem:[%s4153_s26 + $0x418] sm:$0xff] }
  0x35   : > { %283 = vst [vmem:[%s4158_s27 + $0x210] sm:$0xff] %v282_v2  ;;  %285 = vst [vmem:[%s4158_s27 + $0x218] sm:$0xff] %v284_v3  ;;  %v288_v5 = vld [vmem:[%s4153_s26 + $0x420] sm:$0xff]  ;;  %v290_v6 = vld [vmem:[%s4153_s26 + $0x428] sm:$0xff] }
  0x36   : > { %287 = vst [vmem:[%s4158_s27 + $0x220] sm:$0xff] %v286_v4  ;;  %v292_v7 = vld [vmem:[%s4153_s26 + $0x430] sm:$0xff]  ;;  %289 = vst [vmem:[%s4158_s27 + $0x228] sm:$0xff] %v288_v5  ;;  %v294_v8 = vld [vmem:[%s4153_s26 + $0x480] sm:$0xff] }
  0x37   : > { %291 = vst [vmem:[%s4158_s27 + $0x230] sm:$0xff] %v290_v6  ;;  %293 = vst [vmem:[%s4158_s27 + $0x238] sm:$0xff] %v292_v7  ;;  %v296_v9 = vld [vmem:[%s4153_s26 + $0x488] sm:$0xff]  ;;  %v298_v10 = vld [vmem:[%s4153_s26 + $0x490] sm:$0xff] }
  0x38   : > { %295 = vst [vmem:[%s4158_s27 + $0x240] sm:$0xff] %v294_v8  ;;  %297 = vst [vmem:[%s4158_s27 + $0x248] sm:$0xff] %v296_v9  ;;  %v300_v11 = vld [vmem:[%s4153_s26 + $0x498] sm:$0xff]  ;;  %v302_v12 = vld [vmem:[%s4153_s26 + $0x4a0] sm:$0xff] }
  0x39   : > { %299 = vst [vmem:[%s4158_s27 + $0x250] sm:$0xff] %v298_v10  ;;  %v304_v13 = vld [vmem:[%s4153_s26 + $0x4a8] sm:$0xff]  ;;  %301 = vst [vmem:[%s4158_s27 + $0x258] sm:$0xff] %v300_v11  ;;  %v306_v14 = vld [vmem:[%s4153_s26 + $0x4b0] sm:$0xff] }
  0x3a   : > { %303 = vst [vmem:[%s4158_s27 + $0x260] sm:$0xff] %v302_v12  ;;  %305 = vst [vmem:[%s4158_s27 + $0x268] sm:$0xff] %v304_v13  ;;  %v308_v15 = vld [vmem:[%s4153_s26 + $0x4b8] sm:$0xff]  ;;  %v310_v16 = vld [vmem:[%s4153_s26 + $0x4c0] sm:$0xff] }
  0x3b   : > { %307 = vst [vmem:[%s4158_s27 + $0x270] sm:$0xff] %v306_v14  ;;  %309 = vst [vmem:[%s4158_s27 + $0x278] sm:$0xff] %v308_v15  ;;  %v312_v17 = vld [vmem:[%s4153_s26 + $0x510] sm:$0xff]  ;;  %v314_v18 = vld [vmem:[%s4153_s26 + $0x518] sm:$0xff] }
  0x3c   : > { %311 = vst [vmem:[%s4158_s27 + $0x280] sm:$0xff] %v310_v16  ;;  %v316_v19 = vld [vmem:[%s4153_s26 + $0x520] sm:$0xff]  ;;  %313 = vst [vmem:[%s4158_s27 + $0x288] sm:$0xff] %v312_v17  ;;  %v318_v20 = vld [vmem:[%s4153_s26 + $0x528] sm:$0xff] }
  0x3d   : > { %315 = vst [vmem:[%s4158_s27 + $0x290] sm:$0xff] %v314_v18  ;;  %317 = vst [vmem:[%s4158_s27 + $0x298] sm:$0xff] %v316_v19  ;;  %v320_v21 = vld [vmem:[%s4153_s26 + $0x530] sm:$0xff]  ;;  %v322_v22 = vld [vmem:[%s4153_s26 + $0x538] sm:$0xff] }
  0x3e   : > { %319 = vst [vmem:[%s4158_s27 + $0x2a0] sm:$0xff] %v318_v20  ;;  %321 = vst [vmem:[%s4158_s27 + $0x2a8] sm:$0xff] %v320_v21  ;;  %v324_v23 = vld [vmem:[%s4153_s26 + $0x540] sm:$0xff]  ;;  %v326_v24 = vld [vmem:[%s4153_s26 + $0x548] sm:$0xff] }
  0x3f   : > { %323 = vst [vmem:[%s4158_s27 + $0x2b0] sm:$0xff] %v322_v22  ;;  %v328_v25 = vld [vmem:[%s4153_s26 + $0x550] sm:$0xff]  ;;  %325 = vst [vmem:[%s4158_s27 + $0x2b8] sm:$0xff] %v324_v23  ;;  %v330_v26 = vld [vmem:[%s4153_s26 + $0x5a0] sm:$0xff] }
  0x40   : > { %327 = vst [vmem:[%s4158_s27 + $0x2c0] sm:$0xff] %v326_v24  ;;  %329 = vst [vmem:[%s4158_s27 + $0x2c8] sm:$0xff] %v328_v25  ;;  %v332_v27 = vld [vmem:[%s4153_s26 + $0x5a8] sm:$0xff]  ;;  %v334_v28 = vld [vmem:[%s4153_s26 + $0x5b0] sm:$0xff] }
  0x41   : > { %331 = vst [vmem:[%s4158_s27 + $0x2d0] sm:$0xff] %v330_v26  ;;  %333 = vst [vmem:[%s4158_s27 + $0x2d8] sm:$0xff] %v332_v27  ;;  %v336_v29 = vld [vmem:[%s4153_s26 + $0x5b8] sm:$0xff]  ;;  %v338_v30 = vld [vmem:[%s4153_s26 + $0x5c0] sm:$0xff] }
  0x42   : > { %335 = vst [vmem:[%s4158_s27 + $0x2e0] sm:$0xff] %v334_v28  ;;  %v340_v31 = vld [vmem:[%s4153_s26 + $0x5c8] sm:$0xff]  ;;  %337 = vst [vmem:[%s4158_s27 + $0x2e8] sm:$0xff] %v336_v29  ;;  %v342_v32 = vld [vmem:[%s4153_s26 + $0x5d0] sm:$0xff] }
  0x43   : > { %339 = vst [vmem:[%s4158_s27 + $0x2f0] sm:$0xff] %v338_v30  ;;  %341 = vst [vmem:[%s4158_s27 + $0x2f8] sm:$0xff] %v340_v31  ;;  %v344_v33 = vld [vmem:[%s4153_s26 + $0x5d8] sm:$0xff]  ;;  %v346_v34 = vld [vmem:[%s4153_s26 + $0x5e0] sm:$0xff] }
  0x44   : > { %343 = vst [vmem:[%s4158_s27 + $0x300] sm:$0xff] %v342_v32  ;;  %345 = vst [vmem:[%s4158_s27 + $0x308] sm:$0xff] %v344_v33  ;;  %v348_v35 = vld [vmem:[%s4153_s26 + $0x630] sm:$0xff]  ;;  %v350_v36 = vld [vmem:[%s4153_s26 + $0x638] sm:$0xff] }
  0x45   : > { %347 = vst [vmem:[%s4158_s27 + $0x310] sm:$0xff] %v346_v34  ;;  %v352_v37 = vld [vmem:[%s4153_s26 + $0x640] sm:$0xff]  ;;  %349 = vst [vmem:[%s4158_s27 + $0x318] sm:$0xff] %v348_v35  ;;  %v354_v38 = vld [vmem:[%s4153_s26 + $0x648] sm:$0xff] }
  0x46   : > { %351 = vst [vmem:[%s4158_s27 + $0x320] sm:$0xff] %v350_v36  ;;  %353 = vst [vmem:[%s4158_s27 + $0x328] sm:$0xff] %v352_v37  ;;  %v356_v39 = vld [vmem:[%s4153_s26 + $0x650] sm:$0xff]  ;;  %v358_v40 = vld [vmem:[%s4153_s26 + $0x658] sm:$0xff] }
  0x47   : > { %355 = vst [vmem:[%s4158_s27 + $0x330] sm:$0xff] %v354_v38  ;;  %357 = vst [vmem:[%s4158_s27 + $0x338] sm:$0xff] %v356_v39  ;;  %v360_v41 = vld [vmem:[%s4153_s26 + $0x660] sm:$0xff]  ;;  %v362_v42 = vld [vmem:[%s4153_s26 + $0x668] sm:$0xff] }
  0x48   : > { %359 = vst [vmem:[%s4158_s27 + $0x340] sm:$0xff] %v358_v40  ;;  %v364_v43 = vld [vmem:[%s4153_s26 + $0x670] sm:$0xff]  ;;  %361 = vst [vmem:[%s4158_s27 + $0x348] sm:$0xff] %v360_v41  ;;  %v366_v44 = vld [vmem:[%s4153_s26 + $0x6c0] sm:$0xff] }
  0x49   : > { %363 = vst [vmem:[%s4158_s27 + $0x350] sm:$0xff] %v362_v42  ;;  %365 = vst [vmem:[%s4158_s27 + $0x358] sm:$0xff] %v364_v43  ;;  %v368_v45 = vld [vmem:[%s4153_s26 + $0x6c8] sm:$0xff]  ;;  %v370_v46 = vld [vmem:[%s4153_s26 + $0x6d0] sm:$0xff] }
  0x4a   : > { %367 = vst [vmem:[%s4158_s27 + $0x360] sm:$0xff] %v366_v44  ;;  %369 = vst [vmem:[%s4158_s27 + $0x368] sm:$0xff] %v368_v45  ;;  %v372_v47 = vld [vmem:[%s4153_s26 + $0x6d8] sm:$0xff]  ;;  %v374_v48 = vld [vmem:[%s4153_s26 + $0x6e0] sm:$0xff] }
  0x4b   : > { %371 = vst [vmem:[%s4158_s27 + $0x370] sm:$0xff] %v370_v46  ;;  %v376_v49 = vld [vmem:[%s4153_s26 + $0x6e8] sm:$0xff]  ;;  %373 = vst [vmem:[%s4158_s27 + $0x378] sm:$0xff] %v372_v47  ;;  %v378_v50 = vld [vmem:[%s4153_s26 + $0x6f0] sm:$0xff] }
  0x4c   : > { %375 = vst [vmem:[%s4158_s27 + $0x380] sm:$0xff] %v374_v48  ;;  %377 = vst [vmem:[%s4158_s27 + $0x388] sm:$0xff] %v376_v49  ;;  %v380_v51 = vld [vmem:[%s4153_s26 + $0x6f8] sm:$0xff]  ;;  %v382_v52 = vld [vmem:[%s4153_s26 + $0x700] sm:$0xff] }
  0x4d   : > { %379 = vst [vmem:[%s4158_s27 + $0x390] sm:$0xff] %v378_v50  ;;  %381 = vst [vmem:[%s4158_s27 + $0x398] sm:$0xff] %v380_v51  ;;  %v384_v53 = vld [vmem:[%s4153_s26 + $0x750] sm:$0xff]  ;;  %v386_v54 = vld [vmem:[%s4153_s26 + $0x758] sm:$0xff] }
  0x4e   : > { %383 = vst [vmem:[%s4158_s27 + $0x3a0] sm:$0xff] %v382_v52  ;;  %v388_v55 = vld [vmem:[%s4153_s26 + $0x760] sm:$0xff]  ;;  %385 = vst [vmem:[%s4158_s27 + $0x3a8] sm:$0xff] %v384_v53  ;;  %v390_v56 = vld [vmem:[%s4153_s26 + $0x768] sm:$0xff] }
  0x4f   : > { %387 = vst [vmem:[%s4158_s27 + $0x3b0] sm:$0xff] %v386_v54  ;;  %389 = vst [vmem:[%s4158_s27 + $0x3b8] sm:$0xff] %v388_v55  ;;  %v392_v57 = vld [vmem:[%s4153_s26 + $0x770] sm:$0xff]  ;;  %v394_v58 = vld [vmem:[%s4153_s26 + $0x778] sm:$0xff] }
  0x50   : > { %391 = vst [vmem:[%s4158_s27 + $0x3c0] sm:$0xff] %v390_v56  ;;  %393 = vst [vmem:[%s4158_s27 + $0x3c8] sm:$0xff] %v392_v57  ;;  %v396_v59 = vld [vmem:[%s4153_s26 + $0x780] sm:$0xff]  ;;  %v398_v60 = vld [vmem:[%s4153_s26 + $0x788] sm:$0xff] }
  0x51   : > { %395 = vst [vmem:[%s4158_s27 + $0x3d0] sm:$0xff] %v394_v58  ;;  %v400_v61 = vld [vmem:[%s4153_s26 + $0x790] sm:$0xff]  ;;  %397 = vst [vmem:[%s4158_s27 + $0x3d8] sm:$0xff] %v396_v59  ;;  %v402_v62 = vld [vmem:[%s4153_s26 + $0x7e0] sm:$0xff] }
  0x52   : > { %399 = vst [vmem:[%s4158_s27 + $0x3e0] sm:$0xff] %v398_v60  ;;  %401 = vst [vmem:[%s4158_s27 + $0x3e8] sm:$0xff] %v400_v61  ;;  %v404_v63 = vld [vmem:[%s4153_s26 + $0x7e8] sm:$0xff]  ;;  %v406_v0 = vld [vmem:[%s4153_s26 + $0x7f0] sm:$0xff] }
  0x53   : > { %403 = vst [vmem:[%s4158_s27 + $0x3f0] sm:$0xff] %v402_v62  ;;  %405 = vst [vmem:[%s4158_s27 + $0x3f8] sm:$0xff] %v404_v63  ;;  %v408_v1 = vld [vmem:[%s4153_s26 + $0x7f8] sm:$0xff]  ;;  %v410_v2 = vld [vmem:[%s4153_s26 + $0x800] sm:$0xff] }
  0x54   : > { %407 = vst [vmem:[%s4158_s27 + $0x400] sm:$0xff] %v406_v0  ;;  %v412_v3 = vld [vmem:[%s4153_s26 + $0x808] sm:$0xff]  ;;  %409 = vst [vmem:[%s4158_s27 + $0x408] sm:$0xff] %v408_v1  ;;  %v414_v4 = vld [vmem:[%s4153_s26 + $0x810] sm:$0xff] }
  0x55   : > { %411 = vst [vmem:[%s4158_s27 + $0x410] sm:$0xff] %v410_v2  ;;  %413 = vst [vmem:[%s4158_s27 + $0x418] sm:$0xff] %v412_v3  ;;  %v416_v5 = vld [vmem:[%s4153_s26 + $0x818] sm:$0xff]  ;;  %v418_v6 = vld [vmem:[%s4153_s26 + $0x820] sm:$0xff] }
  0x56   : > { %415 = vst [vmem:[%s4158_s27 + $0x420] sm:$0xff] %v414_v4  ;;  %417 = vst [vmem:[%s4158_s27 + $0x428] sm:$0xff] %v416_v5  ;;  %v420_v7 = vld [vmem:[%s4153_s26 + $0x870] sm:$0xff]  ;;  %v422_v8 = vld [vmem:[%s4153_s26 + $0x878] sm:$0xff] }
  0x57   : > { %419 = vst [vmem:[%s4158_s27 + $0x430] sm:$0xff] %v418_v6  ;;  %v424_v9 = vld [vmem:[%s4153_s26 + $0x880] sm:$0xff]  ;;  %421 = vst [vmem:[%s4158_s27 + $0x438] sm:$0xff] %v420_v7  ;;  %v426_v10 = vld [vmem:[%s4153_s26 + $0x888] sm:$0xff] }
  0x58   : > { %423 = vst [vmem:[%s4158_s27 + $0x440] sm:$0xff] %v422_v8  ;;  %425 = vst [vmem:[%s4158_s27 + $0x448] sm:$0xff] %v424_v9  ;;  %v428_v11 = vld [vmem:[%s4153_s26 + $0x890] sm:$0xff]  ;;  %v430_v12 = vld [vmem:[%s4153_s26 + $0x898] sm:$0xff] }
  0x59   : > { %427 = vst [vmem:[%s4158_s27 + $0x450] sm:$0xff] %v426_v10  ;;  %429 = vst [vmem:[%s4158_s27 + $0x458] sm:$0xff] %v428_v11  ;;  %v432_v13 = vld [vmem:[%s4153_s26 + $0x8a0] sm:$0xff]  ;;  %v434_v14 = vld [vmem:[%s4153_s26 + $0x8a8] sm:$0xff] }
  0x5a   : > { %431 = vst [vmem:[%s4158_s27 + $0x460] sm:$0xff] %v430_v12  ;;  %v436_v15 = vld [vmem:[%s4153_s26 + $0x8b0] sm:$0xff]  ;;  %433 = vst [vmem:[%s4158_s27 + $0x468] sm:$0xff] %v432_v13 }
  0x5b   : > { %435 = vst [vmem:[%s4158_s27 + $0x470] sm:$0xff] %v434_v14  ;;  %437 = vst [vmem:[%s4158_s27 + $0x478] sm:$0xff] %v436_v15 }
  0x5c PF: > { %p3488_p7 = scmp.ge.s32.totalorder %s4089_s14, 1  ;;  %p442_p8 = scmp.lt.s32.totalorder %s4089_s14, 3 }
  0x5e   : > { %p443_p9 = pnand %p3488_p7, %p442_p8 }
  0x60   : > { %446 = sbr.rel (%p443_p9) target bundleno = 472 (0x1d8), region = 51 }
  0x65   : > { %s449_s28 = sand.u32 1, %s4081_s12   ;;  %vm683_vm0 = vcmask 1043456   ;;  %vm684_vm1 = vcmask 1044480   ;;  %v4091_v16 = vmov 65535   ;;  %v4092_v18 = vmov 0   ;;  %s3818_s18 = smul.u32 (%p4143_p5), 72, %s3483_s15 }
  0x66   : > { %s3820_s29 = smul.u32 1152, %s449_s28  ;;  %v685_v17 = vsel %vm683_vm0, 4294967295, %v4091_v16  ;;  %773 = vmatprep.mubr.bf16.mxu0 %v4092_v18  ;;  %816 = vmatprep.mubr.bf16.mxu1 %v4092_v18  ;;  %v4476_v36 = vld [vmem:[%s5319_s1] sm:$0x1f]   ;;  %vm679_vm2 = vcmask 203776  }
  0x67   : > { %3848 = vset.pattern.permute.xlu0 %v4092_v18  ;;  %v4453_v19 = vsel %vm684_vm1, %v685_v17, 0  ;;  %s5063_s17 = smul.u32 144, %s449_s28  ;;  %s3375_s21 = scalar_lea.vmem (%p4143_p5), %s5321_s3, %s3818_s18 }
  0x68   : > { %s4455_s30 = scalar_lea.vmem [#allocation2], %s3820_s29 }
  0x69   : > { %v3849_v20 = vld [vmem:[%s4455_s30 + $0x94] ss:$72 sps:$4 sm:$0x1f]   ;;  %v3853_v23 = vld [vmem:[%s4455_s30 + $0x90] ss:$72 sps:$4 sm:$0x1f]  }
  0x6a   : > { %v3851_v21 = vld [vmem:[%s4455_s30 + $0x9c] ss:$72 sps:$4 sm:$0x1f]   ;;  %v691_v22 = vand.u32 %v3849_v20, %v4453_v19  ;;  %v3854_v24 = vld [vmem:[%s4455_s30 + $0x98] ss:$72 sps:$4 sm:$0x1f]   ;;  %v688_v27 = vand.u32 %v3853_v23, %v4453_v19 }
  0x6b   : > { %v697_v25 = vand.u32 %v3851_v21, %v4453_v19  ;;  %v3855_v26 = vld [vmem:[%s4455_s30 + $0x4] ss:$72 sps:$4 sm:$0xff]   ;;  %v694_v28 = vand.u32 %v3854_v24, %v4453_v19  ;;  %v3859_v30 = vld [vmem:[%s4455_s30] ss:$72 sps:$4 sm:$0xff]   ;;  %v3870_v41 = vld [vmem:[%s4455_s30 + $0x14] ss:$72 sps:$4 sm:$0xff]  }
  0x6c   : > { %753 = vmatprep.subr.bf16.mxu0 %v691_v22  ;;  %v3857_v29 = vld [vmem:[%s4455_s30 + $0xc] ss:$72 sps:$4 sm:$0xff]   ;;  %v3860_v31 = vld [vmem:[%s4455_s30 + $0x8] ss:$72 sps:$4 sm:$0xff]   ;;  %v3873_v42 = vld [vmem:[%s4455_s30 + $0x1c] ss:$72 sps:$4 sm:$0xff]  }
  0x6d   : > { %796 = vmatprep.subr.bf16.mxu1 %v697_v25  ;;  %754 = vmatpush1.bf16.msra.mxu0 %v688_v27  ;;  %v3862_v32 = vld [vmem:[%s4455_s30 + $0xa0] ss:$72 sps:$4 sm:$0x1f]   ;;  %v3864_v33 = vld [vmem:[%s4455_s30 + $0xa4] ss:$72 sps:$4 sm:$0x1f]  }
  0x6e   : > { %797 = vmatpush1.bf16.msra.mxu1 %v694_v28  ;;  %755 = vmatprep.subr.bf16.mxu0 %v3855_v26  ;;  %v3865_v34 = vld [vmem:[%s4455_s30 + $0xa8] ss:$72 sps:$4 sm:$0x1f]   ;;  %v3867_v35 = vld [vmem:[%s4455_s30 + $0xac] ss:$72 sps:$4 sm:$0x1f]   ;;  %v703_v37 = vand.u32 %v3864_v33, %v4453_v19  ;;  %v700_v39 = vand.u32 %v3862_v32, %v4453_v19 }
  0x6f   : > { %798 = vmatprep.subr.bf16.mxu1 %v3857_v29  ;;  %v709_v38 = vand.u32 %v3867_v35, %v4453_v19  ;;  %v706_v40 = vand.u32 %v3865_v34, %v4453_v19  ;;  %v3868_v43 = vld [vmem:[%s4455_s30 + $0x10] ss:$72 sps:$4 sm:$0xff]   ;;  %v3876_v46 = vld [vmem:[%s4455_s30 + $0xb4] ss:$72 sps:$4 sm:$0x1f]   ;;  %s5130_s12 = scalar_lea.vmem [#allocation3], %s5063_s17 }
  0x70   : > { %v3871_v44 = vld [vmem:[%s4455_s30 + $0x18] ss:$72 sps:$4 sm:$0xff]   ;;  %v3879_v48 = vld [vmem:[%s4455_s30 + $0xbc] ss:$72 sps:$4 sm:$0x1f]   ;;  %v715_v49 = vand.u32 %v3876_v46, %v4453_v19 }
  0x71   : > { %756 = vmatpush1.bf16.msra.mxu0 %v3859_v30  ;;  %v3874_v45 = vld [vmem:[%s4455_s30 + $0xb0] ss:$72 sps:$4 sm:$0x1f]   ;;  %v721_v50 = vand.u32 %v3879_v48, %v4453_v19  ;;  %v3882_v51 = vld [vmem:[%s4455_s30 + $0x24] ss:$72 sps:$4 sm:$0xff]  }
  0x72   : > { %799 = vmatpush1.bf16.msra.mxu1 %v3860_v31  ;;  %839 = vmatprep.subr.bf16.mxu0 %v703_v37  ;;  %v3877_v47 = vld [vmem:[%s4455_s30 + $0xb8] ss:$72 sps:$4 sm:$0x1f]   ;;  %v712_v52 = vand.u32 %v3874_v45, %v4453_v19  ;;  %v3885_v54 = vld [vmem:[%s4455_s30 + $0x2c] ss:$72 sps:$4 sm:$0xff]  }
  0x73   : > { %882 = vmatprep.subr.bf16.mxu1 %v709_v38  ;;  %v718_v53 = vand.u32 %v3877_v47, %v4453_v19  ;;  %v3888_v55 = vld [vmem:[%s4455_s30 + $0xc4] ss:$72 sps:$4 sm:$0x1f]   ;;  %v3880_v57 = vld [vmem:[%s4455_s30 + $0x20] ss:$72 sps:$4 sm:$0xff]  }
  0x74   : > { %3526 = vmatmul.mubr.msk.bf16.vlgmr.msra.gmra.mxu0 %vm679_vm2, %v4476_v36  ;;  %v3891_v56 = vld [vmem:[%s4455_s30 + $0xcc] ss:$72 sps:$4 sm:$0x1f]   ;;  %v3886_v58 = vld [vmem:[%s4455_s30 + $0xc0] ss:$72 sps:$4 sm:$0x1f]   ;;  %v727_v61 = vand.u32 %v3888_v55, %v4453_v19 }
  0x75   : > { %3527 = vmatmul.mubr.msk.bf16.vlgmr.msra.gmra.mxu1 %vm679_vm2, %v4476_v36  ;;  %840 = vmatpush1.bf16.msra.mxu0 %v700_v39  ;;  %v3883_v59 = vld [vmem:[%s4455_s30 + $0x28] ss:$72 sps:$4 sm:$0xff]   ;;  %v733_v62 = vand.u32 %v3891_v56, %v4453_v19  ;;  %v3894_v63 = vld [vmem:[%s4455_s30 + $0x34] ss:$72 sps:$4 sm:$0xff]   ;;  %v724_v0 = vand.u32 %v3886_v58, %v4453_v19  ;;  %v3895_v6 = vld [vmem:[%s4455_s30 + $0x38] ss:$72 sps:$4 sm:$0xff]  }
  0x76   : > { %883 = vmatpush1.bf16.msra.mxu1 %v706_v40  ;;  %841 = vmatprep.subr.bf16.mxu0 %v3870_v41  ;;  %v3889_v60 = vld [vmem:[%s4455_s30 + $0xc8] ss:$72 sps:$4 sm:$0x1f]   ;;  %v3897_v2 = vld [vmem:[%s4455_s30 + $0x3c] ss:$72 sps:$4 sm:$0xff]  }
  0x77   : > { %884 = vmatprep.subr.bf16.mxu1 %v3873_v42  ;;  %859 = vmatprep.mubr.bf16.mxu0 %v4092_v18  ;;  %v730_v1 = vand.u32 %v3889_v60, %v4453_v19  ;;  %v3900_v3 = vld [vmem:[%s4455_s30 + $0xd4] ss:$72 sps:$4 sm:$0x1f]   ;;  %v3892_v5 = vld [vmem:[%s4455_s30 + $0x30] ss:$72 sps:$4 sm:$0xff]  }
  0x78   : > { %902 = vmatprep.mubr.bf16.mxu1 %v4092_v18  ;;  %v3903_v4 = vld [vmem:[%s4455_s30 + $0x1b4] ss:$72 sps:$4 sm:$0x1f]   ;;  %v3898_v7 = vld [vmem:[%s4455_s30 + $0xd0] ss:$72 sps:$4 sm:$0x1f]   ;;  %v739_v9 = vand.u32 %v3900_v3, %v4453_v19 }
  0x79   : > { %842 = vmatpush1.bf16.msra.mxu0 %v3868_v43  ;;  %v3901_v8 = vld [vmem:[%s4455_s30 + $0x1b0] ss:$72 sps:$4 sm:$0x1f]   ;;  %v1331_v10 = vand.u32 %v3903_v4, %v4453_v19  ;;  %v3906_v11 = vld [vmem:[%s4455_s30 + $0x44] ss:$72 sps:$4 sm:$0xff]   ;;  %v736_v13 = vand.u32 %v3898_v7, %v4453_v19 }
  0x7a   : > { %885 = vmatpush1.bf16.msra.mxu1 %v3871_v44  ;;  %925 = vmatprep.subr.bf16.mxu0 %v715_v49  ;;  %v3909_v12 = vld [vmem:[%s4455_s30 + $0x124] ss:$72 sps:$4 sm:$0xff]   ;;  %v1328_v14 = vand.u32 %v3901_v8, %v4453_v19  ;;  %v3904_v17 = vld [vmem:[%s4455_s30 + $0x40] ss:$72 sps:$4 sm:$0xff]   ;;  %v3921_v29 = vld [vmem:[%s4455_s30 + $0x134] ss:$72 sps:$4 sm:$0xff]  }
  0x7b   : > { %968 = vmatprep.subr.bf16.mxu1 %v721_v50  ;;  %v3912_v15 = vld [vmem:[%s4455_s30 + $0x1bc] ss:$72 sps:$4 sm:$0x1f]   ;;  %v3907_v20 = vld [vmem:[%s4455_s30 + $0x120] ss:$72 sps:$4 sm:$0xff]  }
  0x7c   : > { %3528 = vmatmul.mubr.msk.bf16.vlgmr.msra.gmra.mxu0 %vm679_vm2, %v4476_v36  ;;  %v3915_v16 = vld [vmem:[%s4455_s30 + $0x1c4] ss:$72 sps:$4 sm:$0x1f]   ;;  %v3910_v21 = vld [vmem:[%s4455_s30 + $0x1b8] ss:$72 sps:$4 sm:$0x1f]   ;;  %v1337_v23 = vand.u32 %v3912_v15, %v4453_v19 }
  0x7d   : > { %3529 = vmatmul.mubr.msk.bf16.vlgmr.msra.gmra.mxu1 %vm679_vm2, %v4476_v36  ;;  %926 = vmatpush1.bf16.msra.mxu0 %v712_v52  ;;  %v3913_v22 = vld [vmem:[%s4455_s30 + $0x1c0] ss:$72 sps:$4 sm:$0x1f]   ;;  %v1343_v24 = vand.u32 %v3915_v16, %v4453_v19  ;;  %v1334_v25 = vand.u32 %v3910_v21, %v4453_v19  ;;  %v3918_v27 = vld [vmem:[%s4455_s30 + $0x12c] ss:$72 sps:$4 sm:$0xff]  }
  0x7e   : > { %969 = vmatpush1.bf16.msra.mxu1 %v718_v53  ;;  %927 = vmatprep.subr.bf16.mxu0 %v3882_v51  ;;  %v1340_v26 = vand.u32 %v3913_v22, %v4453_v19  ;;  %v3924_v28 = vld [vmem:[%s4455_s30 + $0x1cc] ss:$72 sps:$4 sm:$0x1f]   ;;  %v3916_v31 = vld [vmem:[%s4455_s30 + $0x128] ss:$72 sps:$4 sm:$0xff]  }
  0x7f   : > { %970 = vmatprep.subr.bf16.mxu1 %v3885_v54  ;;  %945 = vmatprep.mubr.bf16.mxu0 %v4092_v18  ;;  %v3927_v30 = vld [vmem:[%s4455_s30 + $0x1d4] ss:$72 sps:$4 sm:$0x1f]   ;;  %v3919_v32 = vld [vmem:[%s4455_s30 + $0x130] ss:$72 sps:$4 sm:$0xff]   ;;  %v1349_v35 = vand.u32 %v3924_v28, %v4453_v19 }
  0x80   : > { %988 = vmatprep.mubr.bf16.mxu1 %v4092_v18  ;;  %v3922_v33 = vld [vmem:[%s4455_s30 + $0x1c8] ss:$72 sps:$4 sm:$0x1f]   ;;  %v1355_v37 = vand.u32 %v3927_v30, %v4453_v19  ;;  %v3930_v38 = vld [vmem:[%s4455_s30 + $0x13c] ss:$72 sps:$4 sm:$0xff]  }
  0x81   : > { %928 = vmatpush1.bf16.msra.mxu0 %v3880_v57  ;;  %v3925_v34 = vld [vmem:[%s4455_s30 + $0x1d0] ss:$72 sps:$4 sm:$0x1f]   ;;  %v1346_v39 = vand.u32 %v3922_v33, %v4453_v19  ;;  %v3933_v41 = vld [vmem:[%s4455_s30 + $0x144] ss:$72 sps:$4 sm:$0xff]  }
  0x82   : > { %971 = vmatpush1.bf16.msra.mxu1 %v3883_v59  ;;  %1011 = vmatprep.subr.bf16.mxu0 %v727_v61  ;;  %v1352_v40 = vand.u32 %v3925_v34, %v4453_v19  ;;  %v3936_v42 = vld [vmem:[%s4455_s30 + $0x1dc] ss:$72 sps:$4 sm:$0x1f]   ;;  %v3928_v44 = vld [vmem:[%s4455_s30 + $0x138] ss:$72 sps:$4 sm:$0xff]  }
  0x83   : > { %1054 = vmatprep.subr.bf16.mxu1 %v733_v62  ;;  %v3939_v43 = vld [vmem:[%s4455_s30 + $0x1e4] ss:$72 sps:$4 sm:$0x1f]   ;;  %v3931_v45 = vld [vmem:[%s4455_s30 + $0x140] ss:$72 sps:$4 sm:$0xff]   ;;  %v1361_v48 = vand.u32 %v3936_v42, %v4453_v19 }
  0x84   : > { %3530 = vmatmul.mubr.msk.bf16.vlgmr.msra.gmra.mxu0 %vm679_vm2, %v4476_v36  ;;  %v3934_v46 = vld [vmem:[%s4455_s30 + $0x1d8] ss:$72 sps:$4 sm:$0x1f]   ;;  %v1367_v49 = vand.u32 %v3939_v43, %v4453_v19  ;;  %v3942_v50 = vld [vmem:[%s4455_s30 + $0x14c] ss:$72 sps:$4 sm:$0xff]  }
  0x85   : > { %3531 = vmatmul.mubr.msk.bf16.vlgmr.msra.gmra.mxu1 %vm679_vm2, %v4476_v36  ;;  %1012 = vmatpush1.bf16.msra.mxu0 %v724_v0  ;;  %v3937_v47 = vld [vmem:[%s4455_s30 + $0x1e0] ss:$72 sps:$4 sm:$0x1f]   ;;  %v1358_v51 = vand.u32 %v3934_v46, %v4453_v19  ;;  %v3945_v53 = vld [vmem:[%s4455_s30 + $0x154] ss:$72 sps:$4 sm:$0xff]  }
  0x86   : > { %1055 = vmatpush1.bf16.msra.mxu1 %v730_v1  ;;  %1013 = vmatprep.subr.bf16.mxu0 %v3894_v63  ;;  %v1364_v52 = vand.u32 %v3937_v47, %v4453_v19  ;;  %v3948_v54 = vld [vmem:[%s4455_s30 + $0x1ec] ss:$72 sps:$4 sm:$0x1f]   ;;  %v3940_v56 = vld [vmem:[%s4455_s30 + $0x148] ss:$72 sps:$4 sm:$0xff]  }
  0x87   : > { %1056 = vmatprep.subr.bf16.mxu1 %v3897_v2  ;;  %1031 = vmatprep.mubr.bf16.mxu0 %v4092_v18  ;;  %v3951_v55 = vld [vmem:[%s4455_s30 + $0x1f4] ss:$72 sps:$4 sm:$0x1f]   ;;  %v3943_v57 = vld [vmem:[%s4455_s30 + $0x150] ss:$72 sps:$4 sm:$0xff]   ;;  %v1373_v60 = vand.u32 %v3948_v54, %v4453_v19 }
  0x88   : > { %1074 = vmatprep.mubr.bf16.mxu1 %v4092_v18  ;;  %v3946_v58 = vld [vmem:[%s4455_s30 + $0x1e8] ss:$72 sps:$4 sm:$0x1f]   ;;  %v1379_v61 = vand.u32 %v3951_v55, %v4453_v19  ;;  %v3954_v0 = vld [vmem:[%s4455_s30 + $0x15c] ss:$72 sps:$4 sm:$0xff]  }
  0x89   : > { %1014 = vmatpush1.bf16.msra.mxu0 %v3892_v5  ;;  %v3949_v59 = vld [vmem:[%s4455_s30 + $0x1f0] ss:$72 sps:$4 sm:$0x1f]   ;;  %v1370_v62 = vand.u32 %v3946_v58, %v4453_v19  ;;  %v3960_v1 = vld [vmem:[%s4455_s30 + $0x2d4] ss:$72 sps:$4 sm:$0x1f]  }
  0x8a   : > { %1057 = vmatpush1.bf16.msra.mxu1 %v3895_v6  ;;  %1097 = vmatprep.subr.bf16.mxu0 %v739_v9  ;;  %v1376_v63 = vand.u32 %v3949_v59, %v4453_v19  ;;  %v3957_v2 = vld [vmem:[%s4455_s30 + $0x164] ss:$72 sps:$4 sm:$0xff]   ;;  %v3952_v4 = vld [vmem:[%s4455_s30 + $0x158] ss:$72 sps:$4 sm:$0xff]   ;;  %v2007_v8 = vand.u32 %v3960_v1, %v4453_v19 }
  0x8b   : > { %1393 = vmatprep.subr.bf16.mxu1 %v1331_v10  ;;  %v3963_v3 = vld [vmem:[%s4455_s30 + $0x2dc] ss:$72 sps:$4 sm:$0x1f]   ;;  %v3955_v5 = vld [vmem:[%s4455_s30 + $0x160] ss:$72 sps:$4 sm:$0xff]  }
  0x8c   : > { %3532 = vmatmul.mubr.msk.bf16.vlgmr.msra.gmra.mxu0 %vm679_vm2, %v4476_v36  ;;  %v3958_v6 = vld [vmem:[%s4455_s30 + $0x2d0] ss:$72 sps:$4 sm:$0x1f]   ;;  %v2013_v9 = vand.u32 %v3963_v3, %v4453_v19  ;;  %v3966_v10 = vld [vmem:[%s4455_s30 + $0x244] ss:$72 sps:$4 sm:$0xff]  }
  0x8d   : > { %3533 = vmatmul.mubr.msk.bf16.vlgmr.msra.gmra.mxu1 %vm679_vm2, %v4476_v36  ;;  %1098 = vmatpush1.bf16.msra.mxu0 %v736_v13  ;;  %v3961_v7 = vld [vmem:[%s4455_s30 + $0x2d8] ss:$72 sps:$4 sm:$0x1f]   ;;  %v3975_v15 = vld [vmem:[%s4455_s30 + $0x2ec] ss:$72 sps:$4 sm:$0x1f]  }
  0x8e   : > { %1394 = vmatpush1.bf16.msra.mxu1 %v1328_v14  ;;  %1099 = vmatprep.subr.bf16.mxu0 %v3906_v11  ;;  %v3969_v11 = vld [vmem:[%s4455_s30 + $0x24c] ss:$72 sps:$4 sm:$0xff]   ;;  %v2010_v13 = vand.u32 %v3961_v7, %v4453_v19  ;;  %v3964_v16 = vld [vmem:[%s4455_s30 + $0x240] ss:$72 sps:$4 sm:$0xff]   ;;  %v3981_v28 = vld [vmem:[%s4455_s30 + $0x25c] ss:$72 sps:$4 sm:$0xff]  }
  0x8f   : > { %1395 = vmatprep.subr.bf16.mxu1 %v3909_v12  ;;  %1117 = vmatprep.mubr.bf16.mxu0 %v4092_v18  ;;  %v2004_v12 = vand.u32 %v3958_v6, %v4453_v19  ;;  %v3972_v14 = vld [vmem:[%s4455_s30 + $0x2e4] ss:$72 sps:$4 sm:$0x1f]   ;;  %v3973_v21 = vld [vmem:[%s4455_s30 + $0x2e8] ss:$72 sps:$4 sm:$0x1f]  }
  0x90   : > { %1413 = vmatprep.mubr.bf16.mxu1 %v4092_v18  ;;  %v2019_v22 = vand.u32 %v3972_v14, %v4453_v19  ;;  %v3976_v30 = vld [vmem:[%s4455_s30 + $0x250] ss:$72 sps:$4 sm:$0xff]   ;;  %v3999_v42 = vld [vmem:[%s4455_s30 + $0x30c] ss:$72 sps:$4 sm:$0x1f]  }
  0x91   : > { %1100 = vmatpush1.bf16.msra.mxu0 %v3904_v17  ;;  %v3967_v17 = vld [vmem:[%s4455_s30 + $0x248] ss:$72 sps:$4 sm:$0xff]   ;;  %v3985_v33 = vld [vmem:[%s4455_s30 + $0x2f8] ss:$72 sps:$4 sm:$0x1f]  }
  0x92   : > { %1396 = vmatpush1.bf16.msra.mxu1 %v3907_v20  ;;  %1436 = vmatprep.subr.bf16.mxu0 %v1337_v23  ;;  %v3970_v20 = vld [vmem:[%s4455_s30 + $0x2e0] ss:$72 sps:$4 sm:$0x1f]   ;;  %v2025_v23 = vand.u32 %v3975_v15, %v4453_v19  ;;  %v4011_v54 = vld [vmem:[%s4455_s30 + $0x3f4] ss:$72 sps:$4 sm:$0x1f]  }
  0x93   : > { %1479 = vmatprep.subr.bf16.mxu1 %v1343_v24  ;;  %v3978_v24 = vld [vmem:[%s4455_s30 + $0x254] ss:$72 sps:$4 sm:$0xff]   ;;  %v3988_v43 = vld [vmem:[%s4455_s30 + $0x260] ss:$72 sps:$4 sm:$0xff]   ;;  %v4000_v55 = vld [vmem:[%s4455_s30 + $0x270] ss:$72 sps:$4 sm:$0xff]  }
  0x94   : > { %3534 = vmatmul.mubr.msk.bf16.vlgmr.msra.gmra.mxu0 %vm679_vm2, %v4476_v36  ;;  %v3997_v46 = vld [vmem:[%s4455_s30 + $0x308] ss:$72 sps:$4 sm:$0x1f]   ;;  %v3156_v59 = vld [vmem:[%s5320_s2] sm:$0xff]  ;;  %v4017_v1 = vld [vmem:[%s4455_s30 + $0x364] ss:$72 sps:$4 sm:$0xff]  }
  0x95   : > { %3607 = vmatmul.mubr.msk.bf16.vlgmr.msra.gmra.mxu1 %vm679_vm2, %v4476_v36  ;;  %1437 = vmatpush1.bf16.msra.mxu0 %v1334_v25  ;;  %v2016_v25 = vand.u32 %v3970_v20, %v4453_v19  ;;  %v4009_v58 = vld [vmem:[%s4455_s30 + $0x3f0] ss:$72 sps:$4 sm:$0x1f]   ;;  %v4023_v3 = vld [vmem:[%s4455_s30 + $0x404] ss:$72 sps:$4 sm:$0x1f]  }
  0x96   : > { %1480 = vmatpush1.bf16.msra.mxu1 %v1340_v26  ;;  %1438 = vmatprep.subr.bf16.mxu0 %v3918_v27  ;;  %v2022_v26 = vand.u32 %v3973_v21, %v4453_v19  ;;  %v3984_v27 = vld [vmem:[%s4455_s30 + $0x2f4] ss:$72 sps:$4 sm:$0x1f]   ;;  %v4018_v6 = vld [vmem:[%s4455_s30 + $0x3f8] ss:$72 sps:$4 sm:$0x1f]  }
  0x97   : > { %1481 = vmatprep.subr.bf16.mxu1 %v3921_v29  ;;  %1456 = vmatprep.mubr.bf16.mxu0 %v4092_v18  ;;  %v3987_v29 = vld [vmem:[%s4455_s30 + $0x2fc] ss:$72 sps:$4 sm:$0x1f]   ;;  %v2031_v34 = vand.u32 %v3984_v27, %v4453_v19  ;;  %v4021_v7 = vld [vmem:[%s4455_s30 + $0x400] ss:$72 sps:$4 sm:$0x1f]  }
  0x98   : > { %1499 = vmatprep.mubr.bf16.mxu1 %v4092_v18  ;;  %3160 = vperm.xlu0 %3848, %v3156_v59   ;;  %v4029_v14 = vld [vmem:[%s4455_s30 + $0x374] ss:$72 sps:$4 sm:$0xff]   ;;  %v4027_v20 = vld [vmem:[%s4455_s30 + $0x370] ss:$72 sps:$4 sm:$0xff]  }
  0x99   : > { %1439 = vmatpush1.bf16.msra.mxu0 %v3916_v31  ;;  %v3979_v31 = vld [vmem:[%s4455_s30 + $0x258] ss:$72 sps:$4 sm:$0xff]   ;;  %v4032_v15 = vld [vmem:[%s4455_s30 + $0x40c] ss:$72 sps:$4 sm:$0x1f]  }
  0x9a   : > { %1482 = vmatpush1.bf16.msra.mxu1 %v3919_v32  ;;  %1522 = vmatprep.subr.bf16.mxu0 %v1349_v35  ;;  %v3982_v32 = vld [vmem:[%s4455_s30 + $0x2f0] ss:$72 sps:$4 sm:$0x1f]   ;;  %v2037_v35 = vand.u32 %v3987_v29, %v4453_v19  ;;  %v4038_v27 = vld [vmem:[%s4455_s30 + $0x37c] ss:$72 sps:$4 sm:$0xff]  }
  0x9b   : > { %1565 = vmatprep.subr.bf16.mxu1 %v1355_v37  ;;  %v3990_v37 = vld [vmem:[%s4455_s30 + $0x264] ss:$72 sps:$4 sm:$0xff]   ;;  %v4030_v21 = vld [vmem:[%s4455_s30 + $0x408] ss:$72 sps:$4 sm:$0x1f]  }
  0x9c   : > { %3608 = vmatmul.mubr.msk.bf16.vlgmr.msra.gmra.mxu0 %vm679_vm2, %v4476_v36  ;;  %v4044_v29 = vld [vmem:[%s4455_s30 + $0x41c] ss:$72 sps:$4 sm:$0x1f]  }
  0x9d   : > { %3609 = vmatmul.mubr.msk.bf16.vlgmr.msra.gmra.mxu1 %vm679_vm2, %v4476_v36  ;;  %1523 = vmatpush1.bf16.msra.mxu0 %v1346_v39  ;;  %v2034_v39 = vand.u32 %v3985_v33, %v4453_v19  ;;  %v4042_v33 = vld [vmem:[%s4455_s30 + $0x418] ss:$72 sps:$4 sm:$0x1f]  }
  0x9e   : > { %1566 = vmatpush1.bf16.msra.mxu1 %v1352_v40  ;;  %1524 = vmatprep.subr.bf16.mxu0 %v3930_v38  ;;  %v2028_v38 = vand.u32 %v3982_v32, %v4453_v19  ;;  %v3993_v40 = vld [vmem:[%s4455_s30 + $0x26c] ss:$72 sps:$4 sm:$0xff]   ;;  %v4039_v32 = vld [vmem:[%s4455_s30 + $0x380] ss:$72 sps:$4 sm:$0xff]  }
  0x9f   : > { %1567 = vmatprep.subr.bf16.mxu1 %v3933_v41  ;;  %1542 = vmatprep.mubr.bf16.mxu0 %v4092_v18  ;;  %v3996_v41 = vld [vmem:[%s4455_s30 + $0x304] ss:$72 sps:$4 sm:$0x1f]  }
  0xa0   : > { %1585 = vmatprep.mubr.bf16.mxu1 %v4092_v18  ;;  %v2043_v47 = vand.u32 %v3996_v41, %v4453_v19  ;;  %v4053_v41 = vld [vmem:[%s4455_s30 + $0x394] ss:$72 sps:$4 sm:$0xff]  }
  0xa1   : > { %1525 = vmatpush1.bf16.msra.mxu0 %v3928_v44  ;;  %v3994_v44 = vld [vmem:[%s4455_s30 + $0x300] ss:$72 sps:$4 sm:$0x1f]  }
  0xa2   : > { %1568 = vmatpush1.bf16.msra.mxu1 %v3931_v45  ;;  %1608 = vmatprep.subr.bf16.mxu0 %v1361_v48  ;;  %v3991_v45 = vld [vmem:[%s4455_s30 + $0x268] ss:$72 sps:$4 sm:$0xff]   ;;  %v2049_v48 = vand.u32 %v3999_v42, %v4453_v19  ;;  %v4056_v42 = vld [vmem:[%s4455_s30 + $0x42c] ss:$72 sps:$4 sm:$0x1f]  }
  0xa3   : > { %1651 = vmatprep.subr.bf16.mxu1 %v1367_v49  ;;  %v4002_v49 = vld [vmem:[%s4455_s30 + $0x274] ss:$72 sps:$4 sm:$0xff]  }
  0xa4   : > { %3610 = vmatmul.mubr.msk.bf16.vlgmr.msra.gmra.mxu0 %vm679_vm2, %v4476_v36 }
  0xa5   : > { %3611 = vmatmul.mubr.msk.bf16.vlgmr.msra.gmra.mxu1 %vm679_vm2, %v4476_v36  ;;  %1609 = vmatpush1.bf16.msra.mxu0 %v1358_v51  ;;  %v2040_v51 = vand.u32 %v3994_v44, %v4453_v19  ;;  %v4048_v44 = vld [vmem:[%s4455_s30 + $0x388] ss:$72 sps:$4 sm:$0xff]  }
  0xa6   : > { %1652 = vmatpush1.bf16.msra.mxu1 %v1364_v52  ;;  %1610 = vmatprep.subr.bf16.mxu0 %v3942_v50  ;;  %v4005_v50 = vld [vmem:[%s4455_s30 + $0x27c] ss:$72 sps:$4 sm:$0xff]   ;;  %v2046_v52 = vand.u32 %v3997_v46, %v4453_v19  ;;  %v4054_v46 = vld [vmem:[%s4455_s30 + $0x428] ss:$72 sps:$4 sm:$0x1f]  }
  0xa7   : > { %1653 = vmatprep.subr.bf16.mxu1 %v3945_v53  ;;  %1628 = vmatprep.mubr.bf16.mxu0 %v4092_v18  ;;  %v4008_v53 = vld [vmem:[%s4455_s30 + $0x314] ss:$72 sps:$4 sm:$0x1f]  }
  0xa8   : > { %1671 = vmatprep.mubr.bf16.mxu1 %v4092_v18 }
  0xa9   : > { %1611 = vmatpush1.bf16.msra.mxu0 %v3940_v56  ;;  %v4006_v56 = vld [vmem:[%s4455_s30 + $0x310] ss:$72 sps:$4 sm:$0x1f]  }
  0xaa   : > { %1654 = vmatpush1.bf16.msra.mxu1 %v3943_v57  ;;  %1694 = vmatprep.subr.bf16.mxu0 %v1373_v60  ;;  %v4003_v57 = vld [vmem:[%s4455_s30 + $0x278] ss:$72 sps:$4 sm:$0xff]   ;;  %v2055_v60 = vand.u32 %v4008_v53, %v4453_v19 }
  0xab   : > { %1737 = vmatprep.subr.bf16.mxu1 %v1379_v61  ;;  %v2683_v61 = vand.u32 %v4011_v54, %v4453_v19  ;;  %v4066_v53 = vld [vmem:[%s5319_s1] sm:$0x1f]  }
  0xac   : > { %3612 = vmatmul.mubr.msk.bf16.vlgmr.msra.gmra.mxu0 %vm679_vm2, %v4476_v36  ;;  %v4060_v54 = vld [vmem:[%s4455_s30 + $0x398] ss:$72 sps:$4 sm:$0xff]  }
  0xad   : > { %3613 = vmatmul.mubr.msk.bf16.vlgmr.msra.gmra.mxu1 %vm679_vm2, %v4476_v36  ;;  %1695 = vmatpush1.bf16.msra.mxu0 %v1370_v62  ;;  %v2052_v62 = vand.u32 %v4006_v56, %v4453_v19 }
  0xae   : > { %1738 = vmatpush1.bf16.msra.mxu1 %v1376_v63  ;;  %1696 = vmatprep.subr.bf16.mxu0 %v3954_v0  ;;  %v2680_v63 = vand.u32 %v4009_v58, %v4453_v19  ;;  %v4014_v0 = vld [vmem:[%s4455_s30 + $0x284] ss:$72 sps:$4 sm:$0xff]  }
  0xaf   : > { %1739 = vmatprep.subr.bf16.mxu1 %v3957_v2  ;;  %1714 = vmatprep.mubr.bf16.mxu0 %v4092_v18  ;;  %v4020_v2 = vld [vmem:[%s4455_s30 + $0x3fc] ss:$72 sps:$4 sm:$0x1f]  }
  0xb0   : > { %1757 = vmatprep.mubr.bf16.mxu1 %v4092_v18 }
  0xb1   : > { %1697 = vmatpush1.bf16.msra.mxu0 %v3952_v4  ;;  %v4012_v4 = vld [vmem:[%s4455_s30 + $0x280] ss:$72 sps:$4 sm:$0xff]  }
  0xb2   : > { %1740 = vmatpush1.bf16.msra.mxu1 %v3955_v5  ;;  %2069 = vmatprep.subr.bf16.mxu0 %v2007_v8  ;;  %v4015_v5 = vld [vmem:[%s4455_s30 + $0x360] ss:$72 sps:$4 sm:$0xff]  }
  0xb3   : > { %2112 = vmatprep.subr.bf16.mxu1 %v2013_v9  ;;  %v3157_v8 = vld [vmem:[%s5320_s2 + $0x8] sm:$0x3]  ;;  %v2689_v9 = vand.u32 %v4020_v2, %v4453_v19 }
  0xb4   : > { %3614 = vmatmul.mubr.msk.bf16.vlgmr.msra.gmra.mxu0 %vm679_vm2, %v4476_v36  ;;  %3165 = vperm.xlu0 %3848, %v3157_v8  }
  0xb5   : > { %3615 = vmatmul.mubr.msk.bf16.vlgmr.msra.gmra.mxu1 %vm679_vm2, %v4476_v36  ;;  %2070 = vmatpush1.bf16.msra.mxu0 %v2004_v12  ;;  %v2692_v12 = vand.u32 %v4021_v7, %v4453_v19 }
  0xb6   : > { %2113 = vmatpush1.bf16.msra.mxu1 %v2010_v13  ;;  %2071 = vmatprep.subr.bf16.mxu0 %v3966_v10  ;;  %v2695_v10 = vand.u32 %v4023_v3, %v4453_v19  ;;  %v4026_v13 = vld [vmem:[%s4455_s30 + $0x36c] ss:$72 sps:$4 sm:$0xff]  }
  0xb7   : > { %2114 = vmatprep.subr.bf16.mxu1 %v3969_v11  ;;  %2089 = vmatprep.mubr.bf16.mxu0 %v4092_v18  ;;  %v2686_v11 = vand.u32 %v4018_v6, %v4453_v19 }
  0xb8   : > { %2132 = vmatprep.mubr.bf16.mxu1 %v4092_v18 }
  0xb9   : > { %2072 = vmatpush1.bf16.msra.mxu0 %v3964_v16  ;;  %v4035_v16 = vld [vmem:[%s4455_s30 + $0x414] ss:$72 sps:$4 sm:$0x1f]  }
  0xba   : > { %2115 = vmatpush1.bf16.msra.mxu1 %v3967_v17  ;;  %2155 = vmatprep.subr.bf16.mxu0 %v2019_v22  ;;  %v4024_v17 = vld [vmem:[%s4455_s30 + $0x368] ss:$72 sps:$4 sm:$0xff]  }
  0xbb   : > { %2198 = vmatprep.subr.bf16.mxu1 %v2025_v23  ;;  %v4033_v22 = vld [vmem:[%s4455_s30 + $0x410] ss:$72 sps:$4 sm:$0x1f]   ;;  %v2701_v23 = vand.u32 %v4032_v15, %v4453_v19 }
  0xbc   : > { %3688 = vmatmul.mubr.msk.bf16.vlgmr.msra.gmra.mxu0 %vm679_vm2, %v4476_v36 }
  0xbd   : > { %3689 = vmatmul.mubr.msk.bf16.vlgmr.msra.gmra.mxu1 %vm679_vm2, %v4476_v36  ;;  %2156 = vmatpush1.bf16.msra.mxu0 %v2016_v25  ;;  %v2698_v25 = vand.u32 %v4030_v21, %v4453_v19 }
  0xbe   : > { %2199 = vmatpush1.bf16.msra.mxu1 %v2022_v26  ;;  %2157 = vmatprep.subr.bf16.mxu0 %v3978_v24  ;;  %v2707_v24 = vand.u32 %v4035_v16, %v4453_v19  ;;  %v2704_v26 = vand.u32 %v4033_v22, %v4453_v19 }
  0xbf   : > { %2200 = vmatprep.subr.bf16.mxu1 %v3981_v28  ;;  %2175 = vmatprep.mubr.bf16.mxu0 %v4092_v18  ;;  %v4041_v28 = vld [vmem:[%s4455_s30 + $0x384] ss:$72 sps:$4 sm:$0xff]  }
  0xc0   : > { %2218 = vmatprep.mubr.bf16.mxu1 %v4092_v18 }
  0xc1   : > { %2158 = vmatpush1.bf16.msra.mxu0 %v3976_v30  ;;  %v4047_v30 = vld [vmem:[%s4455_s30 + $0x424] ss:$72 sps:$4 sm:$0x1f]  }
  0xc2   : > { %2201 = vmatpush1.bf16.msra.mxu1 %v3979_v31  ;;  %2241 = vmatprep.subr.bf16.mxu0 %v2031_v34  ;;  %v4036_v31 = vld [vmem:[%s4455_s30 + $0x378] ss:$72 sps:$4 sm:$0xff]  }
  0xc3   : > { %2284 = vmatprep.subr.bf16.mxu1 %v2037_v35  ;;  %v4045_v34 = vld [vmem:[%s4455_s30 + $0x420] ss:$72 sps:$4 sm:$0x1f]   ;;  %v2713_v35 = vand.u32 %v4044_v29, %v4453_v19 }
  0xc4   : > { %3690 = vmatmul.mubr.msk.bf16.vlgmr.msra.gmra.mxu0 %vm679_vm2, %v4476_v36 }
  0xc5   : > { %3691 = vmatmul.mubr.msk.bf16.vlgmr.msra.gmra.mxu1 %vm679_vm2, %v4476_v36  ;;  %2242 = vmatpush1.bf16.msra.mxu0 %v2028_v38  ;;  %v2710_v38 = vand.u32 %v4042_v33, %v4453_v19 }
  0xc6   : > { %2285 = vmatpush1.bf16.msra.mxu1 %v2034_v39  ;;  %2243 = vmatprep.subr.bf16.mxu0 %v3990_v37  ;;  %v2719_v37 = vand.u32 %v4047_v30, %v4453_v19  ;;  %v2716_v39 = vand.u32 %v4045_v34, %v4453_v19 }
  0xc7   : > { %2286 = vmatprep.subr.bf16.mxu1 %v3993_v40  ;;  %2261 = vmatprep.mubr.bf16.mxu0 %v4092_v18  ;;  %v4050_v40 = vld [vmem:[%s4455_s30 + $0x38c] ss:$72 sps:$4 sm:$0xff]  }
  0xc8   : > { %2304 = vmatprep.mubr.bf16.mxu1 %v4092_v18 }
  0xc9   : > { %2244 = vmatpush1.bf16.msra.mxu0 %v3988_v43  ;;  %v4059_v43 = vld [vmem:[%s4455_s30 + $0x434] ss:$72 sps:$4 sm:$0x1f]  }
  0xca   : > { %2287 = vmatpush1.bf16.msra.mxu1 %v3991_v45  ;;  %2327 = vmatprep.subr.bf16.mxu0 %v2043_v47  ;;  %v4051_v45 = vld [vmem:[%s4455_s30 + $0x390] ss:$72 sps:$4 sm:$0xff]  }
  0xcb   : > { %2370 = vmatprep.subr.bf16.mxu1 %v2049_v48  ;;  %v4057_v47 = vld [vmem:[%s4455_s30 + $0x430] ss:$72 sps:$4 sm:$0x1f]   ;;  %v2725_v48 = vand.u32 %v4056_v42, %v4453_v19 }
  0xcc   : > { %3692 = vmatmul.mubr.msk.bf16.vlgmr.msra.gmra.mxu0 %vm679_vm2, %v4476_v36 }
  0xcd   : > { %3693 = vmatmul.mubr.msk.bf16.vlgmr.msra.gmra.mxu1 %vm679_vm2, %v4476_v36  ;;  %2328 = vmatpush1.bf16.msra.mxu0 %v2040_v51  ;;  %v4062_v51 = vld [vmem:[%s4455_s30 + $0x39c] ss:$72 sps:$4 sm:$0xff]  }
  0xce   : > { %2371 = vmatpush1.bf16.msra.mxu1 %v2046_v52  ;;  %2329 = vmatprep.subr.bf16.mxu0 %v4002_v49  ;;  %v2731_v49 = vand.u32 %v4059_v43, %v4453_v19  ;;  %v4065_v52 = vld [vmem:[%s4455_s30 + $0x3a4] ss:$72 sps:$4 sm:$0xff]  }
  0xcf   : > { %2372 = vmatprep.subr.bf16.mxu1 %v4005_v50  ;;  %2347 = vmatprep.mubr.bf16.mxu0 %v4092_v18  ;;  %v2728_v50 = vand.u32 %v4057_v47, %v4453_v19 }
  0xd0   : > { %2390 = vmatprep.mubr.bf16.mxu1 %v4092_v18 }
  0xd1   : > { %2330 = vmatpush1.bf16.msra.mxu0 %v4000_v55  ;;  %v4063_v55 = vld [vmem:[%s4455_s30 + $0x3a0] ss:$72 sps:$4 sm:$0xff]  }
  0xd2   : > { %2373 = vmatpush1.bf16.msra.mxu1 %v4003_v57  ;;  %2413 = vmatprep.subr.bf16.mxu0 %v2055_v60 }
  0xd3   : > { %2745 = vmatprep.subr.bf16.mxu1 %v2683_v61 }
  0xd4   : > { %3694 = vmatmul.mubr.msk.bf16.vlgmr.msra.gmra.mxu0 %vm679_vm2, %v4476_v36 }
  0xd5   : > { %3695 = vmatmul.mubr.msk.bf16.vlgmr.msra.gmra.mxu1 %vm679_vm2, %v4476_v36  ;;  %2414 = vmatpush1.bf16.msra.mxu0 %v2052_v62 }
  0xd6   : > { %2746 = vmatpush1.bf16.msra.mxu1 %v2680_v63  ;;  %2415 = vmatprep.subr.bf16.mxu0 %v4014_v0 }
  0xd7   : > { %2747 = vmatprep.subr.bf16.mxu1 %v4017_v1  ;;  %2433 = vmatprep.mubr.bf16.mxu0 %v4092_v18 }
  0xd8   : > { %2765 = vmatprep.mubr.bf16.mxu1 %v4092_v18 }
  0xd9   : > { %2416 = vmatpush1.bf16.msra.mxu0 %v4012_v4 }
  0xda   : > { %2748 = vmatpush1.bf16.msra.mxu1 %v4015_v5  ;;  %2788 = vmatprep.subr.bf16.mxu0 %v2689_v9 }
  0xdb   : > { %2831 = vmatprep.subr.bf16.mxu1 %v2695_v10 }
  0xdc   : > { %3696 = vmatmul.mubr.msk.bf16.vlgmr.msra.gmra.mxu0 %vm679_vm2, %v4476_v36 }
  0xdd   : > { %3769 = vmatmul.mubr.msk.bf16.vlgmr.msra.gmra.mxu1 %vm679_vm2, %v4476_v36  ;;  %2789 = vmatpush1.bf16.msra.mxu0 %v2686_v11 }
  0xde   : > { %2832 = vmatpush1.bf16.msra.mxu1 %v2692_v12  ;;  %2790 = vmatprep.subr.bf16.mxu0 %v4026_v13 }
  0xdf   : > { %2833 = vmatprep.subr.bf16.mxu1 %v4029_v14  ;;  %2808 = vmatprep.mubr.bf16.mxu0 %v4092_v18 }
  0xe0   : > { %2851 = vmatprep.mubr.bf16.mxu1 %v4092_v18 }
  0xe1   : > { %2791 = vmatpush1.bf16.msra.mxu0 %v4024_v17 }
  0xe2   : > { %2834 = vmatpush1.bf16.msra.mxu1 %v4027_v20  ;;  %2874 = vmatprep.subr.bf16.mxu0 %v2701_v23 }
  0xe3   : > { %2917 = vmatprep.subr.bf16.mxu1 %v2707_v24 }
  0xe4   : > { %3770 = vmatmul.mubr.msk.bf16.vlgmr.msra.gmra.mxu0 %vm679_vm2, %v4476_v36 }
  0xe5   : > { %3771 = vmatmul.mubr.msk.bf16.vlgmr.msra.gmra.mxu1 %vm679_vm2, %v4476_v36  ;;  %2875 = vmatpush1.bf16.msra.mxu0 %v2698_v25 }
  0xe6   : > { %2918 = vmatpush1.bf16.msra.mxu1 %v2704_v26  ;;  %2876 = vmatprep.subr.bf16.mxu0 %v4038_v27 }
  0xe7   : > { %2919 = vmatprep.subr.bf16.mxu1 %v4041_v28  ;;  %2894 = vmatprep.mubr.bf16.mxu0 %v4092_v18 }
  0xe8   : > { %2937 = vmatprep.mubr.bf16.mxu1 %v4092_v18 }
  0xe9   : > { %2877 = vmatpush1.bf16.msra.mxu0 %v4036_v31 }
  0xea   : > { %2920 = vmatpush1.bf16.msra.mxu1 %v4039_v32  ;;  %2960 = vmatprep.subr.bf16.mxu0 %v2713_v35 }
  0xeb   : > { %3003 = vmatprep.subr.bf16.mxu1 %v2719_v37 }
  0xec   : > { %3772 = vmatmul.mubr.msk.bf16.vlgmr.msra.gmra.mxu0 %vm679_vm2, %v4476_v36 }
  0xed   : > { %3773 = vmatmul.mubr.msk.bf16.vlgmr.msra.gmra.mxu1 %vm679_vm2, %v4476_v36  ;;  %2961 = vmatpush1.bf16.msra.mxu0 %v2710_v38  ;;  %v2722_v36 = vand.u32 %v4054_v46, %v4453_v19 }
  0xee   : > { %3004 = vmatpush1.bf16.msra.mxu1 %v2716_v39  ;;  %2962 = vmatprep.subr.bf16.mxu0 %v4050_v40 }
  0xef   : > { %3005 = vmatprep.subr.bf16.mxu1 %v4053_v41  ;;  %2980 = vmatprep.mubr.bf16.mxu0 %v4092_v18 }
  0xf0   : > { %3023 = vmatprep.mubr.bf16.mxu1 %v4092_v18 }
  0xf1   : > { %2963 = vmatpush1.bf16.msra.mxu0 %v4048_v44 }
  0xf2   : > { %3006 = vmatpush1.bf16.msra.mxu1 %v4051_v45  ;;  %3046 = vmatprep.subr.bf16.mxu0 %v2725_v48 }
  0xf3   : > { %3089 = vmatprep.subr.bf16.mxu1 %v2731_v49 }
  0xf4   : > { %3774 = vmatmul.mubr.msk.bf16.vlgmr.msra.gmra.mxu0 %vm679_vm2, %v4066_v53 }
  0xf5   : > { %3775 = vmatmul.mubr.msk.bf16.vlgmr.msra.gmra.mxu1 %vm679_vm2, %v4066_v53  ;;  %3047 = vmatpush1.bf16.msra.mxu0 %v2722_v36 }
  0xf6   : > { %3090 = vmatpush1.bf16.msra.mxu1 %v2728_v50  ;;  %3048 = vmatprep.subr.bf16.mxu0 %v4062_v51 }
  0xf7   : > { %3091 = vmatprep.subr.bf16.mxu1 %v4065_v52  ;;  %3066 = vmatprep.mubr.bf16.mxu0 %v4092_v18 }
  0xf8   : > { %3109 = vmatprep.mubr.bf16.mxu1 %v4092_v18 }
  0xf9   : > { %3049 = vmatpush1.bf16.msra.mxu0 %v4060_v54 }
  0xfa   : > { %3092 = vmatpush1.bf16.msra.mxu1 %v4063_v55 }
  0xfc   : > { %3776 = vmatmul.mubr.msk.bf16.vlgmr.msra.gmra.mxu0 %vm679_vm2, %v4066_v53 }
  0xfd   : > { %3777 = vmatmul.mubr.msk.bf16.vlgmr.msra.gmra.mxu1 %vm679_vm2, %v4066_v53 }
 0x134   : > { %v4789_v19 = vpop.f32.mrf.mxu0 }
 0x135   : > { %v4791_v56 = vpop.f32.mrf.mxu1 }
 0x136   : > { %v4793_v57 = vpop.f32.mrf.mxu0 }
 0x137   : > { %v4795_v58 = vpop.f32.mrf.mxu1 }
 0x138   : > { %v4797_v59 = vpop.f32.mrf.mxu0 }
 0x139   : > { %v4799_v60 = vpop.f32.mrf.mxu1 }
 0x13a   : > { %v4801_v61 = vpop.f32.mrf.mxu0 }
 0x13b   : > { %v4803_v18 = vpop.f32.mrf.mxu1 }
 0x13c   : > { %v4805_v62 = vpop.f32.mrf.mxu0 }
 0x13d   : > { %v4807_v63 = vpop.f32.mrf.mxu1 }
 0x13e   : > { %v4809_v0 = vpop.f32.mrf.mxu0 }
 0x13f   : > { %v4811_v1 = vpop.f32.mrf.mxu1 }
 0x140   : > { %v4813_v2 = vpop.f32.mrf.mxu0 }
 0x141   : > { %v4815_v3 = vpop.f32.mrf.mxu1 }
 0x142   : > { %v4817_v4 = vpop.f32.mrf.mxu0 }
 0x143   : > { %v4819_v5 = vpop.f32.mrf.mxu1 }
 0x144   : > { %v4821_v6 = vpop.f32.mrf.mxu0 }
 0x145   : > { %5364 = vst [vmem:[#allocation4_spill] sm:$0xff] %v4821_v6  ;;  %v4823_v7 = vpop.f32.mrf.mxu1 }
 0x146   : > { %5365 = vst [vmem:[#allocation5_spill] sm:$0xff] %v4823_v7  ;;  %v4825_v8 = vpop.f32.mrf.mxu0 }
 0x147   : > { %5366 = vst [vmem:[#allocation6_spill] sm:$0xff] %v4825_v8  ;;  %v4827_v9 = vpop.f32.mrf.mxu1 }
 0x148   : > { %5367 = vst [vmem:[#allocation7_spill] sm:$0xff] %v4827_v9  ;;  %v4829_v10 = vpop.f32.mrf.mxu0 }
 0x149   : > { %5368 = vst [vmem:[#allocation8_spill] sm:$0xff] %v4829_v10  ;;  %v4831_v11 = vpop.f32.mrf.mxu1 }
 0x14a   : > { %5369 = vst [vmem:[#allocation9_spill] sm:$0xff] %v4831_v11  ;;  %v4833_v12 = vpop.f32.mrf.mxu0 }
 0x14b   : > { %5370 = vst [vmem:[#allocation10_spill] sm:$0xff] %v4833_v12  ;;  %v4835_v13 = vpop.f32.mrf.mxu1 }
 0x14c   : > { %5371 = vst [vmem:[#allocation11_spill] sm:$0xff] %v4835_v13  ;;  %v4837_v14 = vpop.f32.mrf.mxu0 }
 0x14d   : > { %5372 = vst [vmem:[#allocation12_spill] sm:$0xff] %v4837_v14  ;;  %v4839_v15 = vpop.f32.mrf.mxu1 }
 0x14e   : > { %5373 = vst [vmem:[#allocation13_spill] sm:$0xff] %v4839_v15  ;;  %v4841_v16 = vpop.f32.mrf.mxu0 }
 0x14f   : > { %5374 = vst [vmem:[#allocation14_spill] sm:$0xff] %v4841_v16  ;;  %v4843_v17 = vpop.f32.mrf.mxu1 }
 0x150   : > { %5375 = vst [vmem:[#allocation15_spill] sm:$0xff] %v4843_v17  ;;  %v4845_v20 = vpop.f32.mrf.mxu0 }
 0x151   : > { %5376 = vst [vmem:[#allocation16_spill] sm:$0xff] %v4845_v20  ;;  %v4847_v21 = vpop.f32.mrf.mxu1 }
 0x152   : > { %5377 = vst [vmem:[#allocation17_spill] sm:$0xff] %v4847_v21  ;;  %v4849_v22 = vpop.f32.mrf.mxu0 }
 0x153   : > { %5378 = vst [vmem:[#allocation18_spill] sm:$0xff] %v4849_v22  ;;  %v4851_v23 = vpop.f32.mrf.mxu1 }
 0x154   : > { %5379 = vst [vmem:[#allocation19_spill] sm:$0xff] %v4851_v23  ;;  %v4853_v24 = vpop.f32.mrf.mxu0 }
 0x155   : > { %5380 = vst [vmem:[#allocation20_spill] sm:$0xff] %v4853_v24  ;;  %v4855_v25 = vpop.f32.mrf.mxu1 }
 0x156   : > { %v4859_v27 = vpop.f32.mrf.mxu0 }
 0x157   : > { %5381 = vst [vmem:[#allocation21_spill] sm:$0xff] %v4859_v27  ;;  %v4861_v28 = vpop.f32.mrf.mxu1 }
 0x158   : > { %v4865_v30 = vpop.f32.mrf.mxu0 }
 0x159   : > { %5382 = vst [vmem:[#allocation22_spill] sm:$0xff] %v4865_v30  ;;  %v4867_v31 = vpop.f32.mrf.mxu1 }
 0x15a   : > { %v4871_v33 = vpop.f32.mrf.mxu0 }
 0x15b   : > { %5383 = vst [vmem:[#allocation23_spill] sm:$0xff] %v4871_v33  ;;  %v4873_v34 = vpop.f32.mrf.mxu1 }
 0x15c   : > { %v4877_v37 = vpop.f32.mrf.mxu0 }
 0x15d   : > { %v4879_v38 = vpop.f32.mrf.mxu1 }
 0x15e   : > { %v4885_v41 = vpop.f32.mrf.mxu0 }
 0x15f   : > { %v4887_v42 = vpop.f32.mrf.mxu1 }
 0x160   : > { %v4893_v45 = vpop.f32.mrf.mxu0 }
 0x161   : > { %v4895_v46 = vpop.f32.mrf.mxu1 }
 0x162   : > { %v4901_v49 = vpop.f32.mrf.mxu0 }
 0x163   : > { %v4903_v36 = vpop.f32.mrf.mxu1 }
 0x164   : > { %v4909_v52 = vpop.f32.mrf.mxu0 }
 0x165   : > { %v4911_v53 = vpop.f32.mrf.mxu1 }
 0x166   : > { %5384 = vst [vmem:[#allocation24_spill] sm:$0xff] %v4911_v53  ;;  %v4917_v48 = vpop.f32.mrf.mxu0  ;;  %v5025_v53 = vpop.permute.xlu0 %3160 }
 0x167   : > { %v4919_v44 = vpop.f32.mrf.mxu1 }
 0x168   : > { %5385 = vst [vmem:[#allocation25_spill] sm:$0xff] %v4919_v44  ;;  %v4925_v50 = vpop.f32.mrf.mxu0 }
 0x169   : > { %v4927_v35 = vpop.f32.mrf.mxu1 }
 0x16a   : > { %5386 = vst [vmem:[#allocation26_spill] sm:$0xff] %v4927_v35  ;;  %v4933_v47 = vpop.f32.mrf.mxu0 }
 0x16b   : > { %5387 = vst [vmem:[#allocation27_spill] sm:$0xff] %v4933_v47  ;;  %v4935_v43 = vpop.f32.mrf.mxu1 }
 0x16c   : > { %5388 = vst [vmem:[#allocation28_spill] sm:$0xff] %v4935_v43  ;;  %v4941_v39 = vpop.f32.mrf.mxu0 }
 0x16d   : > { %5389 = vst [vmem:[#allocation29_spill] sm:$0xff] %v4941_v39  ;;  %v4943_v32 = vpop.f32.mrf.mxu1 }
 0x16e   : > { %5390 = vst [vmem:[#allocation30_spill] sm:$0xff] %v4943_v32  ;;  %v4949_v29 = vpop.f32.mrf.mxu0 }
 0x16f   : > { %5391 = vst [vmem:[#allocation31_spill] sm:$0xff] %v4949_v29  ;;  %v4951_v26 = vpop.f32.mrf.mxu1 }
 0x170   : > { %5392 = vst [vmem:[#allocation32_spill] sm:$0xff] %v4951_v26  ;;  %v4957_v43 = vpop.f32.mrf.mxu0 }
 0x171   : > { %5393 = vst [vmem:[#allocation33_spill] sm:$0xff] %v4957_v43  ;;  %v4959_v12 = vpop.f32.mrf.mxu1 }
 0x172   : > { %5394 = vst [vmem:[#allocation34_spill] sm:$0xff] %v4959_v12  ;;  %v4965_v32 = vpop.f32.mrf.mxu0 }
 0x173   : > { %5395 = vst [vmem:[#allocation35_spill] sm:$0xff] %v4965_v32  ;;  %v4967_v14 = vpop.f32.mrf.mxu1 }
 0x174   : > { %5396 = vst [vmem:[#allocation36_spill] sm:$0xff] %v4967_v14  ;;  %v4973_v26 = vpop.f32.mrf.mxu0 }
 0x175   : > { %5397 = vst [vmem:[#allocation37_spill] sm:$0xff] %v4973_v26  ;;  %v4975_v16 = vpop.f32.mrf.mxu1 }
 0x176   : > { %5398 = vst [vmem:[#allocation38_spill] sm:$0xff] %v4975_v16  ;;  %v4981_v12 = vpop.f32.mrf.mxu0 }
 0x177   : > { %5399 = vst [vmem:[#allocation39_spill] sm:$0xff] %v4981_v12  ;;  %v4983_v20 = vpop.f32.mrf.mxu1 }
 0x178   : > { %5400 = vst [vmem:[#allocation40_spill] sm:$0xff] %v4983_v20  ;;  %v4989_v14 = vpop.f32.mrf.mxu0 }
 0x179   : > { %5401 = vst [vmem:[#allocation41_spill] sm:$0xff] %v4989_v14  ;;  %v4991_v22 = vpop.f32.mrf.mxu1 }
 0x17a   : > { %5402 = vst [vmem:[#allocation42_spill] sm:$0xff] %v4991_v22  ;;  %v4997_v16 = vpop.f32.mrf.mxu0 }
 0x17b   : > { %5403 = vst [vmem:[#allocation43_spill] sm:$0xff] %v4997_v16  ;;  %v4999_v24 = vpop.f32.mrf.mxu1 }
 0x17c   : > { %5404 = vst [vmem:[#allocation44_spill] sm:$0xff] %v4999_v24  ;;  %v2091_v20 = vpop.f32.mrf.mxu0 }
 0x17d   : > { %v2134_v27 = vpop.f32.mrf.mxu1 }
 0x17e   : > { %v2093_v12 = vpop.f32.mrf.mxu0 }
 0x17f   : > { %v2136_v17 = vpop.f32.mrf.mxu1 }
 0x180   : > { %v2095_v26 = vpop.f32.mrf.mxu0 }
 0x181   : > { %v2138_v15 = vpop.f32.mrf.mxu1 }
 0x182   : > { %v2097_v54 = vpop.f32.mrf.mxu0 }
 0x183   : > { %v2140_v14 = vpop.f32.mrf.mxu1 }
 0x184   : > { %v2177_v21 = vpop.f32.mrf.mxu0 }
 0x185   : > { %v2220_v55 = vpop.f32.mrf.mxu1 }
 0x186   : > { %v2179_v22 = vpop.f32.mrf.mxu0 }
 0x187   : > { %v2222_v30 = vpop.f32.mrf.mxu1 }
 0x188   : > { %v2181_v32 = vpop.f32.mrf.mxu0 }
 0x189   : > { %v2224_v13 = vpop.f32.mrf.mxu1 }
 0x18a   : > { %v2183_v43 = vpop.f32.mrf.mxu0 }
 0x18b   : > { %v2226_v11 = vpop.f32.mrf.mxu1 }
 0x18c   : > { %v2263_v40 = vpop.f32.mrf.mxu0 }
 0x18d   : > { %v2306_v16 = vpop.f32.mrf.mxu1 }
 0x18e   : > { %v2265_v23 = vpop.f32.mrf.mxu0 }
 0x18f   : > { %v2308_v51 = vpop.f32.mrf.mxu1 }
 0x190   : > { %v5005_v24 = vpop.f32.mrf.mxu0 }
 0x191   : > { %5405 = vst [vmem:[#allocation45_spill] sm:$0xff] %v5005_v24  ;;  %v5007_v33 = vpop.f32.mrf.mxu1 }
 0x192   : > { %5406 = vst [vmem:[#allocation46_spill] sm:$0xff] %v5007_v33  ;;  %v5009_v35 = vpop.f32.mrf.mxu0 }
 0x193   : > { %5407 = vst [vmem:[#allocation47_spill] sm:$0xff] %v5009_v35  ;;  %v5011_v10 = vpop.f32.mrf.mxu1 }
 0x194   : > { %5408 = vst [vmem:[#allocation48_spill] sm:$0xff] %v5011_v10  ;;  %v5013_v29 = vpop.f32.mrf.mxu0  ;;  %v5417_v10 = vmax.f32 %v4789_v19, %v4855_v25  ;;  %v5045_v25 = vpop.permute.xlu0 %3165 }
 0x195   : > { %5409 = vst [vmem:[#allocation49_spill] sm:$0xff] %v5013_v29  ;;  %v5015_v9 = vpop.f32.mrf.mxu1 }
 0x196   : > { %5410 = vst [vmem:[#allocation50_spill] sm:$0xff] %v5015_v9  ;;  %v5017_v44 = vpop.f32.mrf.mxu0  ;;  %v2444_v29 = vmax.f32 %v5417_v10, %v2091_v20  ;;  %v5420_v10 = vmax.f32 %v4791_v56, %v4877_v37 }
 0x197   : > { %5411 = vst [vmem:[#allocation51_spill] sm:$0xff] %v5017_v44  ;;  %v5019_v8 = vpop.f32.mrf.mxu1 }
 0x198   : > { %5412 = vst [vmem:[#allocation52_spill] sm:$0xff] %v5019_v8  ;;  %v5021_v39 = vpop.f32.mrf.mxu0  ;;  %v5418_v8 = vmax.f32 %v4793_v57, %v4861_v28  ;;  %v2446_v20 = vmax.f32 %v5420_v10, %v2134_v27  ;;  %v5421_v57 = vmax.f32 %v4795_v58, %v4885_v41 }
 0x199   : > { %5413 = vst [vmem:[#allocation53_spill] sm:$0xff] %v5021_v39  ;;  %v5023_v7 = vpop.f32.mrf.mxu1 }
 0x19a   : > { %5414 = vst [vmem:[#allocation54_spill] sm:$0xff] %v5023_v7  ;;  %v5027_v24 = vpop.f32.mrf.mxu0  ;;  %v2445_v39 = vmax.f32 %v5418_v8, %v2093_v12  ;;  %v2447_v8 = vmax.f32 %v5421_v57, %v2136_v17  ;;  %v5422_v12 = vmax.f32 %v4799_v60, %v4893_v45  ;;  %v5425_v60 = vmax.f32 %v4805_v62, %v4879_v38 }
 0x19b   : > { %5415 = vst [vmem:[#allocation55_spill] sm:$0xff] %v5027_v24  ;;  %v5029_v33 = vpop.f32.mrf.mxu1  ;;  %v5419_v24 = vmax.f32 %v4797_v59, %v4867_v31  ;;  %v5423_v59 = vmax.f32 %v4801_v61, %v4873_v34  ;;  %v5426_v61 = vmax.f32 %v4807_v63, %v4909_v52  ;;  %v5427_v31 = vmax.f32 %v4809_v0, %v4887_v42  ;;  %v5434_v42 = vld [vmem:[#allocation4_spill] sm:$0xff]  ;;  %v5440_v52 = vld [vmem:[#allocation6_spill] sm:$0xff] }
 0x19c   : > { %5416 = vst [vmem:[#allocation56_spill] sm:$0xff] %v5029_v33  ;;  %v5034_v9 = vpop.f32.mrf.mxu0  ;;  %v5056_v28 = vmax.f32 %v5422_v12, %v2138_v15  ;;  %v2448_v15 = vmax.f32 %v5425_v60, %v2177_v21  ;;  %v5429_v62 = vmax.f32 %v4813_v2, %v4895_v46  ;;  %v5430_v0 = vmax.f32 %v4815_v3, %v4925_v50  ;;  %v5432_v2 = vld [vmem:[#allocation27_spill] sm:$0xff]  ;;  %v5437_v3 = vld [vmem:[#allocation5_spill] sm:$0xff]  ;;  %v5447_v60 = vld [vmem:[#allocation8_spill] sm:$0xff] }
 0x19d   : > { %v2767_v44 = vpop.f32.mrf.mxu1  ;;  %v2462_v33 = vmax.f32 %v5419_v24, %v2095_v26  ;;  %v5424_v26 = vmax.f32 %v4803_v18, %v4901_v49  ;;  %v2449_v34 = vmax.f32 %v5427_v31, %v2179_v22  ;;  %v5428_v18 = vmax.f32 %v4811_v1, %v4917_v48  ;;  %v5451_v31 = vld [vmem:[#allocation9_spill] sm:$0xff] }
 0x19e   : > { %v3120_v35 = vmax.f32 %v2444_v29, %v2767_v44  ;;  %v5039_v7 = vpop.f32.mrf.mxu0  ;;  %v5079_v29 = vmax.f32 %v5426_v61, %v2220_v55  ;;  %v2466_v21 = vmax.f32 %v5429_v62, %v2181_v32  ;;  %v5098_v22 = vmax.f32 %v5430_v0, %v2224_v13  ;;  %v5435_v44 = vld [vmem:[#allocation24_spill] sm:$0xff]  ;;  %v5438_v13 = vld [vmem:[#allocation29_spill] sm:$0xff]  ;;  %v5443_v55 = vld [vmem:[#allocation7_spill] sm:$0xff] }
 0x19f   : > { %v2769_v6 = vpop.f32.mrf.mxu1  ;;  %v5070_v58 = vmax.f32 %v5424_v26, %v2140_v14  ;;  %v5087_v14 = vmax.f32 %v5428_v18, %v2222_v30  ;;  %v5431_v1 = vmax.f32 %v4817_v4, %v4903_v36  ;;  %v5433_v32 = vmax.f32 %v4819_v5, %v5432_v2  ;;  %v5441_v5 = vld [vmem:[#allocation25_spill] sm:$0xff]  ;;  %v5459_v2 = vld [vmem:[#allocation11_spill] sm:$0xff] }
 0x1a0   : > { %v3121_v47 = vmax.f32 %v2445_v39, %v2769_v6  ;;  %v3168_v19 = vadd.f32 %v5025_v53, %v3120_v35  ;;  %v2463_v6 = vmax.f32 %v5423_v59, %v2097_v54  ;;  %v5065_v24 = vpop.f32.mrf.mxu0  ;;  %v5436_v45 = vmax.f32 %v5434_v42, %v5435_v44 }
 0x1a1   : > { %v2771_v56 = vpop.f32.mrf.mxu1  ;;  %v2467_v30 = vmax.f32 %v5431_v1, %v2183_v43  ;;  %v5106_v41 = vmax.f32 %v5433_v32, %v2226_v11  ;;  %v5439_v49 = vmax.f32 %v5437_v3, %v5438_v13  ;;  %v5442_v11 = vmax.f32 %v5440_v52, %v5441_v5  ;;  %v5458_v1 = vld [vmem:[#allocation48_spill] sm:$0xff]  ;;  %v5460_v32 = vld [vmem:[#allocation35_spill] sm:$0xff] }
 0x1a2   : > { %v3169_v17 = vadd.f32 %v5025_v53, %v3121_v47  ;;  %v3138_v27 = vmax.f32 %v2462_v33, %v2771_v56  ;;  %v5092_v35 = vpop.f32.mrf.mxu0  ;;  %v3204_v37 = vmax.f32 %v3168_v19, 0.0  ;;  %v5111_v46 = vmax.f32 %v5436_v45, %v2263_v40  ;;  %v5444_v19 = vld [vmem:[#allocation31_spill] sm:$0xff] }
 0x1a3   : > { %v2773_v33 = vpop.f32.mrf.mxu1  ;;  %v5116_v50 = vmax.f32 %v5439_v49, %v2306_v16  ;;  %v5122_v54 = vmax.f32 %v5442_v11, %v2265_v23  ;;  %v5445_v40 = vmax.f32 %v5443_v55, %v5444_v19  ;;  %v5446_v23 = vld [vmem:[#allocation45_spill] sm:$0xff]  ;;  %v5461_v42 = vmax.f32 %v5459_v2, %v5460_v32  ;;  %v5472_v2 = vld [vmem:[#allocation32_spill] sm:$0xff] }
 0x1a4   : > { %v3205_v63 = vmax.f32 %v3169_v17, 0.0  ;;  %v3139_v38 = vmax.f32 %v2463_v6, %v2773_v33  ;;  %v3186_v39 = vadd.f32 %v5045_v25, %v3138_v27  ;;  %v2810_v47 = vpop.f32.mrf.mxu0  ;;  %v5448_v17 = vld [vmem:[#allocation26_spill] sm:$0xff]  ;;  %v5454_v33 = vld [vmem:[#allocation47_spill] sm:$0xff]  ;;  %v5462_v19 = vld [vmem:[#allocation49_spill] sm:$0xff] }
 0x1a5   : > { %v2853_v48 = vpop.f32.mrf.mxu1  ;;  %v3122_v36 = vmax.f32 %v2446_v20, %v2810_v47  ;;  %v5127_v10 = vmax.f32 %v5445_v40, %v2308_v51  ;;  %v5449_v27 = vmax.f32 %v5447_v60, %v5448_v17  ;;  %v5450_v51 = vld [vmem:[#allocation46_spill] sm:$0xff]  ;;  %v5157_v44 = vmax.f32 %v5461_v42, %v5458_v1  ;;  %v5463_v40 = vld [vmem:[#allocation12_spill] sm:$0xff] }
 0x1a6   : > { %v3800_v4 = vpack.c.bf16 %v3205_v63, %v3204_v37  ;;  %v3187_v43 = vadd.f32 %v5045_v25, %v3139_v38  ;;  %v3222_v57 = vmax.f32 %v3186_v39, 0.0  ;;  %v3124_v12 = vmax.f32 %v2448_v15, %v2853_v48  ;;  %v2812_v59 = vpop.f32.mrf.mxu0  ;;  %v5452_v15 = vld [vmem:[#allocation33_spill] sm:$0xff]  ;;  %v5455_v37 = vld [vmem:[#allocation10_spill] sm:$0xff]  ;;  %v5456_v63 = vld [vmem:[#allocation28_spill] sm:$0xff] }
 0x1a7   : > { %v2855_v6 = vpop.f32.mrf.mxu1  ;;  %v3170_v20 = vadd.f32 %v5025_v53, %v3122_v36  ;;  %v3123_v56 = vmax.f32 %v2447_v8, %v2812_v59  ;;  %v5138_v61 = vmax.f32 %v5449_v27, %v5446_v23  ;;  %v5453_v18 = vmax.f32 %v5451_v31, %v5452_v15  ;;  %v5471_v1 = vld [vmem:[#allocation14_spill] sm:$0xff] }
 0x1a8   : > { %3348 = vst [vmem:[%s5130_s12] sm:$0xff] %v3800_v4  ;;  %v3223_v16 = vmax.f32 %v3187_v43, 0.0  ;;  %v3125_v26 = vmax.f32 %v2449_v34, %v2855_v6  ;;  %v5457_v38 = vmax.f32 %v5455_v37, %v5456_v63  ;;  %v3172_v8 = vadd.f32 %v5025_v53, %v3124_v12  ;;  %v2814_v34 = vpop.f32.mrf.mxu0  ;;  %v5466_v6 = vld [vmem:[#allocation50_spill] sm:$0xff] }
 0x1a9   : > { %v5144_v62 = vmax.f32 %v5453_v18, %v5450_v51  ;;  %v2857_v0 = vpop.f32.mrf.mxu1  ;;  %v3171_v47 = vadd.f32 %v5025_v53, %v3123_v56  ;;  %v3206_v3 = vmax.f32 %v3170_v20, 0.0  ;;  %v3140_v49 = vmax.f32 %v5056_v28, %v2814_v34  ;;  %v5468_v20 = vld [vmem:[#allocation37_spill] sm:$0xff] }
 0x1aa   : > { %v5150_v39 = vmax.f32 %v5457_v38, %v5454_v33  ;;  %v3809_v45 = vpack.c.bf16 %v3223_v16, %v3222_v57  ;;  %v3173_v48 = vadd.f32 %v5025_v53, %v3125_v26  ;;  %v3208_v13 = vmax.f32 %v3172_v8, 0.0  ;;  %v2816_v43 = vpop.f32.mrf.mxu0  ;;  %v5464_v57 = vld [vmem:[#allocation30_spill] sm:$0xff]  ;;  %v5467_v16 = vld [vmem:[#allocation13_spill] sm:$0xff] }
 0x1ab   : > { %v3142_v4 = vmax.f32 %v2466_v21, %v2857_v0  ;;  %v2859_v36 = vpop.f32.mrf.mxu1  ;;  %v3207_v52 = vmax.f32 %v3171_v47, 0.0  ;;  %v3141_v11 = vmax.f32 %v5070_v58, %v2816_v43  ;;  %v5465_v12 = vmax.f32 %v5463_v40, %v5464_v57  ;;  %v5470_v0 = vld [vmem:[#allocation51_spill] sm:$0xff] }
 0x1ac   : > { %3357 = vst [vmem:[%s5130_s12 + $0x48] sm:$0x11] %v3809_v45  ;;  %v3209_v5 = vmax.f32 %v3173_v48, 0.0  ;;  %v3143_v55 = vmax.f32 %v2467_v30, %v2859_v36  ;;  %v5469_v56 = vmax.f32 %v5467_v16, %v5468_v20  ;;  %v3188_v21 = vadd.f32 %v5045_v25, %v3140_v49  ;;  %v2896_v58 = vpop.f32.mrf.mxu0  ;;  %v5474_v45 = vld [vmem:[#allocation52_spill] sm:$0xff]  ;;  %v5475_v47 = vld [vmem:[#allocation15_spill] sm:$0xff]  ;;  %v5478_v20 = vld [vmem:[#allocation53_spill] sm:$0xff] }
 0x1ad   : > { %v5168_v59 = vmax.f32 %v5465_v12, %v5462_v19  ;;  %v3190_v26 = vadd.f32 %v5045_v25, %v3142_v4  ;;  %v2939_v30 = vpop.f32.mrf.mxu1  ;;  %v3801_v23 = vpack.c.bf16 %v3207_v52, %v3206_v3  ;;  %v3189_v17 = vadd.f32 %v5045_v25, %v3141_v11 }
 0x1ae   : > { %v5174_v28 = vmax.f32 %v5469_v56, %v5466_v6  ;;  %v3802_v60 = vpack.c.bf16 %v3209_v5, %v3208_v13  ;;  %v3191_v27 = vadd.f32 %v5045_v25, %v3143_v55  ;;  %v3224_v51 = vmax.f32 %v3188_v21, 0.0  ;;  %v2898_v33 = vpop.f32.mrf.mxu0  ;;  %v5479_v56 = vld [vmem:[#allocation16_spill] sm:$0xff]  ;;  %v5480_v21 = vld [vmem:[#allocation34_spill] sm:$0xff] }
 0x1af   : > { %v3226_v31 = vmax.f32 %v3190_v26, 0.0  ;;  %v3126_v15 = vmax.f32 %v5079_v29, %v2896_v58  ;;  %v3128_v18 = vmax.f32 %v5111_v46, %v2939_v30  ;;  %v2941_v37 = vpop.f32.mrf.mxu1  ;;  %3349 = vst [vmem:[%s5130_s12 + $0x8] sm:$0xff] %v3801_v23  ;;  %v3225_v63 = vmax.f32 %v3189_v17, 0.0  ;;  %v5476_v29 = vld [vmem:[#allocation39_spill] sm:$0xff]  ;;  %v5482_v30 = vld [vmem:[#allocation54_spill] sm:$0xff]  ;;  %v5483_v23 = vld [vmem:[#allocation17_spill] sm:$0xff] }
 0x1b0   : > { %3350 = vst [vmem:[%s5130_s12 + $0x10] sm:$0xff] %v3802_v60  ;;  %v3227_v38 = vmax.f32 %v3191_v27, 0.0  ;;  %v3127_v8 = vmax.f32 %v5087_v14, %v2898_v33  ;;  %v3129_v34 = vmax.f32 %v5122_v54, %v2941_v37  ;;  %v5473_v32 = vmax.f32 %v5471_v1, %v5472_v2  ;;  %v2900_v14 = vpop.f32.mrf.mxu0 }
 0x1b1   : > { %v5477_v48 = vmax.f32 %v5475_v47, %v5476_v29  ;;  %v3174_v3 = vadd.f32 %v5025_v53, %v3126_v15  ;;  %v3176_v13 = vadd.f32 %v5025_v53, %v3128_v18  ;;  %v2943_v49 = vpop.f32.mrf.mxu1  ;;  %v3810_v54 = vpack.c.bf16 %v3225_v63, %v3224_v51  ;;  %v5487_v47 = vld [vmem:[#allocation18_spill] sm:$0xff]  ;;  %v5488_v29 = vld [vmem:[#allocation36_spill] sm:$0xff] }
 0x1b2   : > { %v2457_v42 = vmax.f32 %v5473_v32, %v5470_v0  ;;  %v3811_v4 = vpack.c.bf16 %v3227_v38, %v3226_v31  ;;  %v3175_v43 = vadd.f32 %v5025_v53, %v3127_v8  ;;  %v3177_v36 = vadd.f32 %v5025_v53, %v3129_v34  ;;  %v2902_v19 = vpop.f32.mrf.mxu0 }
 0x1b3   : > { %v5194_v46 = vmax.f32 %v5477_v48, %v5474_v45  ;;  %v3210_v52 = vmax.f32 %v3174_v3, 0.0  ;;  %v3212_v5 = vmax.f32 %v3176_v13, 0.0  ;;  %v3144_v11 = vmax.f32 %v5098_v22, %v2900_v14  ;;  %v2945_v40 = vpop.f32.mrf.mxu1  ;;  %3358 = vst [vmem:[%s5130_s12 + $0x50] sm:$0x11] %v3810_v54  ;;  %v5484_v22 = vld [vmem:[#allocation41_spill] sm:$0xff]  ;;  %v5486_v45 = vld [vmem:[#allocation55_spill] sm:$0xff] }
 0x1b4   : > { %v3146_v55 = vmax.f32 %v5138_v61, %v2943_v49  ;;  %3359 = vst [vmem:[%s5130_s12 + $0x58] sm:$0x11] %v3811_v4  ;;  %v3211_v57 = vmax.f32 %v3175_v43, 0.0  ;;  %v3213_v12 = vmax.f32 %v3177_v36, 0.0  ;;  %v3145_v6 = vmax.f32 %v5106_v41, %v2902_v19  ;;  %v2982_v41 = vpop.f32.mrf.mxu0  ;;  %v5490_v13 = vld [vmem:[#allocation56_spill] sm:$0xff]  ;;  %v5491_v14 = vld [vmem:[#allocation19_spill] sm:$0xff] }
 0x1b5   : > { %v3147_v16 = vmax.f32 %v5150_v39, %v2945_v40  ;;  %v5481_v26 = vmax.f32 %v5479_v56, %v5480_v21  ;;  %v5485_v60 = vmax.f32 %v5483_v23, %v5484_v22  ;;  %v3192_v17 = vadd.f32 %v5045_v25, %v3144_v11  ;;  %v3025_v51 = vpop.f32.mrf.mxu1  ;;  %v5492_v49 = vld [vmem:[#allocation43_spill] sm:$0xff]  ;;  %v5494_v21 = vld [vmem:[#allocation20_spill] sm:$0xff]  ;;  %v5497_v22 = vld [vmem:[#allocation21_spill] sm:$0xff] }
 0x1b6   : > { %v3194_v27 = vadd.f32 %v5045_v25, %v3146_v55  ;;  %v3803_v39 = vpack.c.bf16 %v3211_v57, %v3210_v52  ;;  %v3804_v31 = vpack.c.bf16 %v3213_v12, %v3212_v5  ;;  %v3193_v15 = vadd.f32 %v5045_v25, %v3145_v6  ;;  %v2984_v8 = vpop.f32.mrf.mxu0 }
 0x1b7   : > { %v2474_v58 = vmax.f32 %v5481_v26, %v5478_v20  ;;  %v5214_v61 = vmax.f32 %v5485_v60, %v5482_v30  ;;  %v3195_v18 = vadd.f32 %v5045_v25, %v3147_v16  ;;  %v3228_v33 = vmax.f32 %v3192_v17, 0.0  ;;  %v3027_v34 = vpop.f32.mrf.mxu1  ;;  %v5495_v26 = vld [vmem:[#allocation38_spill] sm:$0xff]  ;;  %v5498_v60 = vld [vmem:[#allocation40_spill] sm:$0xff] }
 0x1b8   : > { %v3230_v37 = vmax.f32 %v3194_v27, 0.0  ;;  %v3130_v63 = vmax.f32 %v5116_v50, %v2982_v41  ;;  %v3132_v38 = vmax.f32 %v5168_v59, %v3025_v51  ;;  %3351 = vst [vmem:[%s5130_s12 + $0x18] sm:$0xff] %v3803_v39  ;;  %3352 = vst [vmem:[%s5130_s12 + $0x20] sm:$0xff] %v3804_v31  ;;  %v3229_v0 = vmax.f32 %v3193_v15, 0.0  ;;  %v2986_v43 = vpop.f32.mrf.mxu0 }
 0x1b9   : > { %v3231_v1 = vmax.f32 %v3195_v18, 0.0  ;;  %v3131_v2 = vmax.f32 %v5127_v10, %v2984_v8  ;;  %v3133_v32 = vmax.f32 %v2457_v42, %v3027_v34  ;;  %v5489_v48 = vmax.f32 %v5487_v47, %v5488_v29  ;;  %v3029_v10 = vpop.f32.mrf.mxu1  ;;  %v5503_v47 = vld [vmem:[#allocation23_spill] sm:$0xff]  ;;  %v5504_v29 = vld [vmem:[#allocation44_spill] sm:$0xff] }
 0x1ba   : > { %v5493_v50 = vmax.f32 %v5491_v14, %v5492_v49  ;;  %v3178_v54 = vadd.f32 %v5025_v53, %v3130_v63  ;;  %v3180_v4 = vadd.f32 %v5025_v53, %v3132_v38  ;;  %v3812_v42 = vpack.c.bf16 %v3229_v0, %v3228_v33  ;;  %v2988_v57 = vpop.f32.mrf.mxu0 }
 0x1bb   : > { %v2475_v3 = vmax.f32 %v5489_v48, %v5486_v45  ;;  %v3813_v36 = vpack.c.bf16 %v3231_v1, %v3230_v37  ;;  %v3179_v52 = vadd.f32 %v5025_v53, %v3131_v2  ;;  %v3181_v5 = vadd.f32 %v5025_v53, %v3133_v32  ;;  %v3031_v12 = vpop.f32.mrf.mxu1  ;;  %v5500_v1 = vld [vmem:[#allocation22_spill] sm:$0xff] }
 0x1bc   : > { %v5233_v59 = vmax.f32 %v5493_v50, %v5490_v13  ;;  %v3214_v11 = vmax.f32 %v3178_v54, 0.0  ;;  %v3216_v55 = vmax.f32 %v3180_v4, 0.0  ;;  %v3148_v19 = vmax.f32 %v5144_v62, %v2986_v43  ;;  %3360 = vst [vmem:[%s5130_s12 + $0x60] sm:$0x11] %v3812_v42  ;;  %v3068_v41 = vpop.f32.mrf.mxu0  ;;  %v5501_v2 = vld [vmem:[#allocation42_spill] sm:$0xff] }
 0x1bd   : > { %v3150_v40 = vmax.f32 %v2474_v58, %v3029_v10  ;;  %3361 = vst [vmem:[%s5130_s12 + $0x68] sm:$0x11] %v3813_v36  ;;  %v3215_v6 = vmax.f32 %v3179_v52, 0.0  ;;  %v3217_v16 = vmax.f32 %v3181_v5, 0.0  ;;  %v3149_v20 = vmax.f32 %v5157_v44, %v2988_v57  ;;  %v3111_v51 = vpop.f32.mrf.mxu1 }
 0x1be   : > { %v3151_v56 = vmax.f32 %v2475_v3, %v3031_v12  ;;  %v5496_v30 = vmax.f32 %v5494_v21, %v5495_v26  ;;  %v5499_v17 = vmax.f32 %v5497_v22, %v5498_v60  ;;  %v3196_v58 = vadd.f32 %v5045_v25, %v3148_v19  ;;  %v3070_v63 = vpop.f32.mrf.mxu0  ;;  %v3390_v26 = vld [vmem:[%s5130_s12 + $0x8] sm:$0xff] (%p4143_p5) }
 0x1bf   : > { %v3198_v27 = vadd.f32 %v5045_v25, %v3150_v40  ;;  %v3805_v44 = vpack.c.bf16 %v3215_v6, %v3214_v11  ;;  %v3806_v39 = vpack.c.bf16 %v3217_v16, %v3216_v55  ;;  %v3197_v31 = vadd.f32 %v5045_v25, %v3149_v20  ;;  %v3396_v22 = vld [vmem:[%s5130_s12 + $0x20] sm:$0xff] (%p4143_p5)  ;;  %3391 = vst [vmem:[%s3375_s21 + $0x8] sm:$0xff] (%p4143_p5), %v3390_v26 }
 0x1c0   : > { %v2460_v23 = vmax.f32 %v5496_v30, %v5034_v9  ;;  %v2461_v62 = vmax.f32 %v5499_v17, %v5039_v7  ;;  %v3199_v15 = vadd.f32 %v5045_v25, %v3151_v56  ;;  %v3232_v9 = vmax.f32 %v3196_v58, 0.0  ;;  %v3113_v7 = vpop.f32.mrf.mxu1  ;;  %v3072_v14 = vpop.f32.mrf.mxu0  ;;  %v3392_v30 = vld [vmem:[%s5130_s12 + $0x10] sm:$0xff] (%p4143_p5)  ;;  %3397 = vst [vmem:[%s3375_s21 + $0x20] sm:$0xff] (%p4143_p5), %v3396_v22 }
 0x1c1   : > { %v3234_v18 = vmax.f32 %v3198_v27, 0.0  ;;  %v3134_v33 = vmax.f32 %v5174_v28, %v3068_v41  ;;  %3353 = vst [vmem:[%s5130_s12 + $0x28] sm:$0xff] %v3805_v44  ;;  %3354 = vst [vmem:[%s5130_s12 + $0x30] sm:$0xff] %v3806_v39  ;;  %v3233_v38 = vmax.f32 %v3197_v31, 0.0  ;;  %v3135_v34 = vmax.f32 %v5194_v46, %v3070_v63  ;;  %v3406_v27 = vld [vmem:[%s5130_s12 + $0x48] sm:$0xff] (%p4143_p5)  ;;  %v3408_v41 = vld [vmem:[%s5130_s12 + $0x50] sm:$0xff] (%p4143_p5) }
 0x1c2   : > { %v3136_v37 = vmax.f32 %v2460_v23, %v3111_v51  ;;  %v3235_v8 = vmax.f32 %v3199_v15, 0.0  ;;  %v3137_v0 = vmax.f32 %v2461_v62, %v3113_v7  ;;  %v5502_v32 = vmax.f32 %v5500_v1, %v5501_v2  ;;  %v3115_v49 = vpop.f32.mrf.mxu1  ;;  %v3394_v23 = vld [vmem:[%s5130_s12 + $0x18] sm:$0xff] (%p4143_p5)  ;;  %3393 = vst [vmem:[%s3375_s21 + $0x10] sm:$0xff] (%p4143_p5), %v3392_v30  ;;  %3407 = vst [vmem:[%s3375_s21 + $0x90] sm:$0xff] (%p4143_p5), %v3406_v27 }
 0x1c3   : > { %v5505_v48 = vmax.f32 %v5503_v47, %v5504_v29  ;;  %v3182_v3 = vadd.f32 %v5025_v53, %v3134_v33  ;;  %v3814_v46 = vpack.c.bf16 %v3233_v38, %v3232_v9  ;;  %v3183_v54 = vadd.f32 %v5025_v53, %v3135_v34  ;;  %3395 = vst [vmem:[%s3375_s21 + $0x18] sm:$0xff] (%p4143_p5), %v3394_v23  ;;  %v3410_v51 = vld [vmem:[%s5130_s12 + $0x58] sm:$0xff] (%p4143_p5)  ;;  %v3412_v44 = vld [vmem:[%s5130_s12 + $0x60] sm:$0xff] (%p4143_p5) }
 0x1c4   : > { %v2478_v45 = vmax.f32 %v5502_v32, %v5065_v24  ;;  %v3184_v13 = vadd.f32 %v5025_v53, %v3136_v37  ;;  %v3815_v50 = vpack.c.bf16 %v3235_v8, %v3234_v18  ;;  %v3185_v4 = vadd.f32 %v5025_v53, %v3137_v0  ;;  %v3117_v36 = vpop.f32.mrf.mxu1  ;;  %3409 = vst [vmem:[%s3375_s21 + $0x98] sm:$0xff] (%p4143_p5), %v3408_v41  ;;  %v3414_v39 = vld [vmem:[%s5130_s12 + $0x68] sm:$0xff] (%p4143_p5) }
 0x1c5   : > { %v2479_v28 = vmax.f32 %v5505_v48, %v5092_v35  ;;  %v3218_v24 = vmax.f32 %v3182_v3, 0.0  ;;  %v3152_v10 = vmax.f32 %v5214_v61, %v3072_v14  ;;  %v3074_v35 = vpop.f32.mrf.mxu0  ;;  %3362 = vst [vmem:[%s5130_s12 + $0x70] sm:$0x11] %v3814_v46  ;;  %v3219_v52 = vmax.f32 %v3183_v54, 0.0  ;;  %3411 = vst [vmem:[%s3375_s21 + $0xa0] sm:$0xff] (%p4143_p5), %v3410_v51 }
 0x1c6   : > { %v3220_v43 = vmax.f32 %v3184_v13, 0.0  ;;  %v3154_v42 = vmax.f32 %v2478_v45, %v3115_v49  ;;  %3363 = vst [vmem:[%s5130_s12 + $0x78] sm:$0x11] %v3815_v50  ;;  %v3221_v5 = vmax.f32 %v3185_v4, 0.0  ;;  %v3153_v11 = vmax.f32 %v5233_v59, %v3074_v35  ;;  %3413 = vst [vmem:[%s3375_s21 + $0xa8] sm:$0xff] (%p4143_p5), %v3412_v44 }
 0x1c7   : > { %v3155_v55 = vmax.f32 %v2479_v28, %v3117_v36  ;;  %v3200_v53 = vadd.f32 %v5045_v25, %v3152_v10  ;;  %v3807_v40 = vpack.c.bf16 %v3219_v52, %v3218_v24  ;;  %3415 = vst [vmem:[%s3375_s21 + $0xb0] sm:$0xff] (%p4143_p5), %v3414_v39 }
 0x1c8   : > { %v3202_v19 = vadd.f32 %v5045_v25, %v3154_v42  ;;  %v3808_v61 = vpack.c.bf16 %v3221_v5, %v3220_v43  ;;  %v3201_v57 = vadd.f32 %v5045_v25, %v3153_v11  ;;  %v3398_v60 = vld [vmem:[%s5130_s12 + $0x28] sm:$0xff] (%p4143_p5)  ;;  %v3400_v17 = vld [vmem:[%s5130_s12 + $0x30] sm:$0xff] (%p4143_p5) }
 0x1c9   : > { %v3203_v12 = vadd.f32 %v5045_v25, %v3155_v55  ;;  %3355 = vst [vmem:[%s5130_s12 + $0x38] sm:$0xff] %v3807_v40  ;;  %v3236_v6 = vmax.f32 %v3200_v53, 0.0  ;;  %v3388_v25 = vld [vmem:[%s5130_s12] sm:$0xff] (%p4143_p5)  ;;  %3399 = vst [vmem:[%s3375_s21 + $0x28] sm:$0xff] (%p4143_p5), %v3398_v60 }
 0x1ca   : > { %3356 = vst [vmem:[%s5130_s12 + $0x40] sm:$0xff] %v3808_v61  ;;  %v3238_v16 = vmax.f32 %v3202_v19, 0.0  ;;  %v3237_v20 = vmax.f32 %v3201_v57, 0.0  ;;  %3389 = vst [vmem:[%s3375_s21] sm:$0xff] (%p4143_p5), %v3388_v25 }
 0x1cb   : > { %v3239_v56 = vmax.f32 %v3203_v12, 0.0  ;;  %3372 = sbr.rel (!%p4143_p5) target bundleno = 472 (0x1d8), region = 59  ;;  %3401 = vst [vmem:[%s3375_s21 + $0x30] sm:$0xff] (%p4143_p5), %v3400_v17 }
 0x1cc   : > { %v3816_v59 = vpack.c.bf16 %v3237_v20, %v3236_v6  ;;  %v3416_v31 = vld [vmem:[%s5130_s12 + $0x70] sm:$0xff] (%p4143_p5) }
 0x1cd   : > { %v3817_v21 = vpack.c.bf16 %v3239_v56, %v3238_v16  ;;  %3417 = vst [vmem:[%s3375_s21 + $0xb8] sm:$0xff] (%p4143_p5), %v3416_v31  ;;  %v3418_v15 = vld [vmem:[%s5130_s12 + $0x78] sm:$0xff] (%p4143_p5) }
 0x1ce   : > { %3364 = vst [vmem:[%s5130_s12 + $0x80] sm:$0x11] %v3816_v59  ;;  %3419 = vst [vmem:[%s3375_s21 + $0xc0] sm:$0xff] (%p4143_p5), %v3418_v15 }
 0x1cf   : > { %3365 = vst [vmem:[%s5130_s12 + $0x88] sm:$0x11] %v3817_v21 }
 0x1d0   : > { %v3402_v62 = vld [vmem:[%s5130_s12 + $0x38] sm:$0xff] }
 0x1d1   : > { %v3404_v58 = vld [vmem:[%s5130_s12 + $0x40] sm:$0xff]  ;;  %3403 = vst [vmem:[%s3375_s21 + $0x38] sm:$0xff] %v3402_v62 }
 0x1d2   : > { %3405 = vst [vmem:[%s3375_s21 + $0x40] sm:$0xff] %v3404_v58 }
 0x1d5   : > { %v3420_v9 = vld [vmem:[%s5130_s12 + $0x80] sm:$0xff] }
 0x1d6   : > { %v3422_v18 = vld [vmem:[%s5130_s12 + $0x88] sm:$0xff]  ;;  %3421 = vst [vmem:[%s3375_s21 + $0xc8] sm:$0xff] %v3420_v9 }
 0x1d7   : > { %3423 = vst [vmem:[%s3375_s21 + $0xd0] sm:$0xff] %v3422_v18 }
 0x1d8 PF: > { %p10_p10 = scmp.ge.s32.totalorder %s4130_s16, 4   ;;  %s5506_s12 = smov %s4085_s13 }
 0x1d9   : > { %s5507_s13 = smov %s4141_s19  ;;  %s5508_s14 = smov %s4130_s16 }
 0x1da   :  { %12 = sbr.rel (!%p10_p10) target bundleno = 2 (0x2), region = 116 }

// kernel: _lambda_.3
= control target key start
LH: loop header
LB: loop body
LE: loop exit
PB: predicated region body
PF: predicated region fallthrough
CT: control target
= control target key end

     0   :  { %s5014_s24 = smov 0   ;;  %s5994_s0 = inlined_call_operand.vmem [shape: bf16[2048,250], index: 0, kind: input, shape index: {}]   ;;  %s5995_s1 = inlined_call_operand.vmem [shape: bf16[250,20], index: 1, kind: input, shape index: {}]   ;;  %s5996_s2 = inlined_call_operand.vmem [shape: f32[1,20], index: 2, kind: input, shape index: {}]   ;;  %s5997_s3 = inlined_call_operand.vmem [shape: bf16[16,20,50], index: 3, kind: input, shape index: {}]   ;;  %s5998_s4 = inlined_call_operand.vmem [shape: f32[1,50], index: 4, kind: input, shape index: {}]   ;;  %s5999_s5 = inlined_call_operand.vmem [shape: bf16[50,10], index: 5, kind: input, shape index: {}]   ;;  %s6000_s6 = inlined_call_operand.vmem [shape: f32[1,10], index: 6, kind: input, shape index: {}]   ;;  %s6001_s7 = inlined_call_operand.vmem [shape: f32[32,10], index: 7, kind: output, shape index: {}]  }
   0x1 LB: > { %s3638_s25 = sadd.s32 4294967295, %s4970_s24   ;;  %p3642_p0 = scmp.ge.s32.totalorder %s4970_s24, 1  ;;  %s4970_s24 = sphi %s5014_s24, %s17_s24  }
   0x2   : > { %p239_p1 = scmp.lt.s32.totalorder %s4970_s24, 3 }
   0x4   : > { %p240_p2 = pnand %p3642_p0, %p239_p1 }
   0x6   : > { %243 = sbr.rel (%p240_p2) target bundleno = 1268 (0x4f4), region = 48 }
   0xb   : > { %v5025_v0 = vld [vmem:[%s5995_s1 + $0x78] sm:$0x1f]   ;;  %vm638_vm0 = vcmask 1044480   ;;  %v5039_v2 = vld [vmem:[%s5995_s1 + $0x70] sm:$0xff]   ;;  %s3643_s9 = sshll.u32 %s3638_s25, 7  ;;  %v5055_v4 = vld [vmem:[%s5995_s1 + $0x68] sm:$0xff]  }
   0xc   : > { %v5030_v1 = vld [vmem:[%s5995_s1 + $0x38] sm:$0xff]   ;;  %4681 = vmatprep.subr.msk.bf16.mxu0 %vm638_vm0, %v5025_v0  ;;  %4682 = vmatprep.subr.msk.bf16.mxu1 %vm638_vm0, %v5025_v0  ;;  %v5048_v3 = vld [vmem:[%s5995_s1 + $0x30] sm:$0xff]   ;;  %p273_p3 = scmp.lt.s32.totalorder %s3643_s9, 255  ;;  %v5062_v5 = vld [vmem:[%s5995_s1 + $0x28] sm:$0xff]   ;;  %vm589_vm1 = vcmask 998400   ;;  %vm2314_vm2 = vcmask 1041408  }
   0xd   : > { %4041 = vmatpush3.bf16.msra.mxu0 %v5030_v1  ;;  %4153 = vmatpush3.bf16.msra.mxu1 %v5030_v1  ;;  %v5069_v6 = vld [vmem:[%s5995_s1 + $0x60] sm:$0xff]   ;;  %v5083_v8 = vld [vmem:[%s5995_s1 + $0x58] sm:$0xff]   ;;  %v5102_v10 = vld [vmem:[%s5995_s1 + $0x50] sm:$0xff]   ;;  %vm4973_vm3 = vmmov 0   ;;  %vm2253_vm4 = vcmask 158720   ;;  %vm2286_vm5 = vcmask 408576  }
   0xe   : > { %4042 = vmatprep.subr.bf16.mxu0 %v5039_v2  ;;  %4154 = vmatprep.subr.bf16.mxu1 %v5039_v2  ;;  %s6101_s9 = smov (!%p273_p3, %s3643_s9), 255  ;;  %v5076_v7 = vld [vmem:[%s5995_s1 + $0x20] sm:$0xff]   ;;  %v5095_v9 = vld [vmem:[%s5995_s1 + $0x18] sm:$0xff]   ;;  %v5111_v13 = vld [vmem:[%s5995_s1 + $0x10] sm:$0xff]   ;;  %vm2310_vm6 = vcmask 162816   ;;  %vm3510_vm7 = vcmask 1040384  }
   0xf   : > { %s4007_s20 = sshll.u32 %s6101_s9, 3  ;;  %v5118_v14 = vld [vmem:[%s5995_s1 + $0x48] sm:$0xff]   ;;  %v5134_v16 = vld [vmem:[%s5995_s1 + $0x40] sm:$0xff]   ;;  %vm3555_vm8 = vcmask 80896   ;;  %s3646_s15 = sshll.u32 %s3638_s25, 1 }
  0x10   : > { %s5088_s27 = scalar_lea.vmem %s5994_s0, %s4007_s20  ;;  %v5127_v15 = vld [vmem:[%s5995_s1 + $0x8] sm:$0xff]   ;;  %v5141_v17 = vld [vmem:[%s5995_s1] sm:$0xff]   ;;  %p280_p4 = scmp.lt.s32.totalorder %s3646_s15, 3 }
  0x11   : > { %4043 = vmatpush3.bf16.msra.mxu0 %v5048_v3  ;;  %4155 = vmatpush3.bf16.msra.mxu1 %v5048_v3  ;;  %v4713_v11 = vld [vmem:[%s5088_s27 + $0x4] ss:$8 sps:$4 sm:$0xff]   ;;  %v4711_v18 = vld [vmem:[%s5088_s27] ss:$8 sps:$4 sm:$0xff]   ;;  %v4717_v20 = vld [vmem:[%s5088_s27 + $0x14] ss:$8 sps:$4 sm:$0xff]  }
  0x12   : > { %4044 = vmatprep.subr.bf16.mxu0 %v5055_v4  ;;  %4156 = vmatprep.subr.bf16.mxu1 %v5055_v4  ;;  %v4716_v12 = vld [vmem:[%s5088_s27 + $0x104] ss:$8 sps:$4 sm:$0xff]   ;;  %v4714_v19 = vld [vmem:[%s5088_s27 + $0x100] ss:$8 sps:$4 sm:$0xff]   ;;  %v4719_v21 = vld [vmem:[%s5088_s27 + $0x114] ss:$8 sps:$4 sm:$0xff]  }
  0x13   : > { %3696 = vmatprep.mubr.msk.bf16.mxu0 %vm589_vm1, %v4713_v11  ;;  %3744 = vmatprep.mubr.msk.bf16.mxu1 %vm589_vm1, %v4716_v12  ;;  %v4721_v22 = vld [vmem:[%s5088_s27 + $0x10] ss:$8 sps:$4 sm:$0xff]   ;;  %v4723_v24 = vld [vmem:[%s5088_s27 + $0x24] ss:$8 sps:$4 sm:$0xff]   ;;  %v4727_v26 = vld [vmem:[%s5088_s27 + $0x20] ss:$8 sps:$4 sm:$0xff]  }
  0x14   : > { %v4722_v23 = vld [vmem:[%s5088_s27 + $0x110] ss:$8 sps:$4 sm:$0xff]   ;;  %v4725_v25 = vld [vmem:[%s5088_s27 + $0x124] ss:$8 sps:$4 sm:$0xff]   ;;  %v4728_v27 = vld [vmem:[%s5088_s27 + $0x120] ss:$8 sps:$4 sm:$0xff]  }
  0x15   : > { %4045 = vmatpush3.bf16.msra.mxu0 %v5062_v5  ;;  %4157 = vmatpush3.bf16.msra.mxu1 %v5062_v5  ;;  %v4729_v28 = vld [vmem:[%s5088_s27 + $0x34] ss:$8 sps:$4 sm:$0xff]   ;;  %v4733_v30 = vld [vmem:[%s5088_s27 + $0x30] ss:$8 sps:$4 sm:$0xff]   ;;  %v4735_v32 = vld [vmem:[%s5088_s27 + $0x44] ss:$8 sps:$4 sm:$0xff]  }
  0x16   : > { %4046 = vmatprep.subr.bf16.mxu0 %v5069_v6  ;;  %4158 = vmatprep.subr.bf16.mxu1 %v5069_v6  ;;  %v4731_v29 = vld [vmem:[%s5088_s27 + $0x134] ss:$8 sps:$4 sm:$0xff]   ;;  %v4734_v31 = vld [vmem:[%s5088_s27 + $0x130] ss:$8 sps:$4 sm:$0xff]   ;;  %v4737_v33 = vld [vmem:[%s5088_s27 + $0x144] ss:$8 sps:$4 sm:$0xff]  }
  0x17   : > { %v4739_v34 = vld [vmem:[%s5088_s27 + $0x40] ss:$8 sps:$4 sm:$0xff]   ;;  %v4741_v36 = vld [vmem:[%s5088_s27 + $0x54] ss:$8 sps:$4 sm:$0xff]   ;;  %v4745_v38 = vld [vmem:[%s5088_s27 + $0x50] ss:$8 sps:$4 sm:$0xff]  }
  0x18   : > { %v4740_v35 = vld [vmem:[%s5088_s27 + $0x140] ss:$8 sps:$4 sm:$0xff]   ;;  %v4743_v37 = vld [vmem:[%s5088_s27 + $0x154] ss:$8 sps:$4 sm:$0xff]   ;;  %v4746_v39 = vld [vmem:[%s5088_s27 + $0x150] ss:$8 sps:$4 sm:$0xff]  }
  0x19   : > { %4047 = vmatpush3.bf16.msra.mxu0 %v5076_v7  ;;  %4159 = vmatpush3.bf16.msra.mxu1 %v5076_v7  ;;  %v4747_v40 = vld [vmem:[%s5088_s27 + $0x64] ss:$8 sps:$4 sm:$0xff]   ;;  %v4751_v42 = vld [vmem:[%s5088_s27 + $0x60] ss:$8 sps:$4 sm:$0xff]   ;;  %v4753_v44 = vld [vmem:[%s5088_s27 + $0x74] ss:$8 sps:$4 sm:$0xff]  }
  0x1a   : > { %4048 = vmatprep.subr.bf16.mxu0 %v5083_v8  ;;  %4160 = vmatprep.subr.bf16.mxu1 %v5083_v8  ;;  %v4749_v41 = vld [vmem:[%s5088_s27 + $0x164] ss:$8 sps:$4 sm:$0xff]   ;;  %v4752_v43 = vld [vmem:[%s5088_s27 + $0x160] ss:$8 sps:$4 sm:$0xff]   ;;  %v4755_v45 = vld [vmem:[%s5088_s27 + $0x174] ss:$8 sps:$4 sm:$0xff]  }
  0x1b   : > { %v4757_v46 = vld [vmem:[%s5088_s27 + $0x70] ss:$8 sps:$4 sm:$0xff]   ;;  %v4759_v48 = vld [vmem:[%s5088_s27 + $0x84] ss:$8 sps:$4 sm:$0xff]   ;;  %v4763_v50 = vld [vmem:[%s5088_s27 + $0x80] ss:$8 sps:$4 sm:$0xff]  }
  0x1c   : > { %v4758_v47 = vld [vmem:[%s5088_s27 + $0x170] ss:$8 sps:$4 sm:$0xff]   ;;  %v4761_v49 = vld [vmem:[%s5088_s27 + $0x184] ss:$8 sps:$4 sm:$0xff]   ;;  %v4764_v51 = vld [vmem:[%s5088_s27 + $0x180] ss:$8 sps:$4 sm:$0xff]  }
  0x1d   : > { %4049 = vmatpush3.bf16.msra.mxu0 %v5095_v9  ;;  %4161 = vmatpush3.bf16.msra.mxu1 %v5095_v9  ;;  %v4765_v52 = vld [vmem:[%s5088_s27 + $0x94] ss:$8 sps:$4 sm:$0xff]   ;;  %v4769_v54 = vld [vmem:[%s5088_s27 + $0x90] ss:$8 sps:$4 sm:$0xff]   ;;  %v4771_v56 = vld [vmem:[%s5088_s27 + $0xa4] ss:$8 sps:$4 sm:$0xff]  }
  0x1e   : > { %4050 = vmatprep.subr.bf16.mxu0 %v5102_v10  ;;  %4162 = vmatprep.subr.bf16.mxu1 %v5102_v10  ;;  %v4767_v53 = vld [vmem:[%s5088_s27 + $0x194] ss:$8 sps:$4 sm:$0xff]   ;;  %v4770_v55 = vld [vmem:[%s5088_s27 + $0x190] ss:$8 sps:$4 sm:$0xff]   ;;  %v4773_v57 = vld [vmem:[%s5088_s27 + $0x1a4] ss:$8 sps:$4 sm:$0xff]  }
  0x1f   : > { %v4775_v58 = vld [vmem:[%s5088_s27 + $0xa0] ss:$8 sps:$4 sm:$0xff]   ;;  %v4777_v60 = vld [vmem:[%s5088_s27 + $0xb4] ss:$8 sps:$4 sm:$0xff]   ;;  %v4781_v62 = vld [vmem:[%s5088_s27 + $0xb0] ss:$8 sps:$4 sm:$0xff]  }
  0x20   : > { %v4776_v59 = vld [vmem:[%s5088_s27 + $0x1a0] ss:$8 sps:$4 sm:$0xff]   ;;  %v4779_v61 = vld [vmem:[%s5088_s27 + $0x1b4] ss:$8 sps:$4 sm:$0xff]   ;;  %v4782_v63 = vld [vmem:[%s5088_s27 + $0x1b0] ss:$8 sps:$4 sm:$0xff]  }
  0x21   : > { %4051 = vmatpush3.bf16.msra.mxu0 %v5111_v13  ;;  %4163 = vmatpush3.bf16.msra.mxu1 %v5111_v13  ;;  %v4799_v11 = vld [vmem:[%s5088_s27 + $0xe0] ss:$8 sps:$4 sm:$0xff]   ;;  %s6103_s15 = smov (!%p280_p4, %s3646_s15), 3 }
  0x22   : > { %4052 = vmatprep.subr.bf16.mxu0 %v5118_v14  ;;  %4164 = vmatprep.subr.bf16.mxu1 %v5118_v14  ;;  %v4800_v12 = vld [vmem:[%s5088_s27 + $0x1e0] ss:$8 sps:$4 sm:$0xff]   ;;  %s3647_s16 = sshll.u32 %s6103_s15, 3 }
  0x23   : > { %s283_s19 = scalar_lea.vmem %s6001_s7, %s3647_s16 }
  0x25   : > { %4053 = vmatpush3.bf16.msra.mxu0 %v5127_v15  ;;  %4165 = vmatpush3.bf16.msra.mxu1 %v5127_v15 }
  0x26   : > { %4054 = vmatprep.subr.bf16.mxu0 %v5134_v16  ;;  %4166 = vmatprep.subr.bf16.mxu1 %v5134_v16 }
  0x29   : > { %4055 = vmatpush3.bf16.msra.mxu0 %v5141_v17  ;;  %4167 = vmatpush3.bf16.msra.mxu1 %v5141_v17 }
  0x2a   : > { %4683 = vmatprep.subr.msk.bf16.mxu0 %vm638_vm0, %v5025_v0  ;;  %4684 = vmatprep.subr.msk.bf16.mxu1 %vm638_vm0, %v5025_v0  ;;  %v4783_v0 = vld [vmem:[%s5088_s27 + $0xc4] ss:$8 sps:$4 sm:$0xff]  }
  0x2c   : > { %675 = vmatmul.mubr.bf16.vlgmr.msra.gmra.mxu0 %v4711_v18  ;;  %1060 = vmatmul.mubr.bf16.vlgmr.msra.gmra.mxu1 %v4714_v19  ;;  %v4812_v18 = vld [vmem:[%s5088_s27 + $0x304] ss:$8 sps:$4 sm:$0xff]   ;;  %v4879_v19 = vld [vmem:[%s5997_s3 + $0x8] ss:$0 sps:$4 sm:$0x33]  }
  0x2d   : > { %4265 = vmatpush3.bf16.msra.mxu0 %v5030_v1  ;;  %4377 = vmatpush3.bf16.msra.mxu1 %v5030_v1  ;;  %v4785_v1 = vld [vmem:[%s5088_s27 + $0x1c4] ss:$8 sps:$4 sm:$0xff]  }
  0x2e   : > { %3697 = vmatprep.mubr.msk.bf16.mxu0 %vm589_vm1, %v4717_v20  ;;  %3745 = vmatprep.mubr.msk.bf16.mxu1 %vm589_vm1, %v4719_v21  ;;  %v4898_v20 = vld [vmem:[%s5997_s3 + $0x20] ss:$0 sps:$4 sm:$0x33]  }
  0x2f   : > { %4266 = vmatprep.subr.bf16.mxu0 %v5039_v2  ;;  %4378 = vmatprep.subr.bf16.mxu1 %v5039_v2  ;;  %v4787_v2 = vld [vmem:[%s5088_s27 + $0xc0] ss:$8 sps:$4 sm:$0xff]  }
  0x30   : > { %v4807_v21 = vld [vmem:[%s5088_s27 + $0x200] ss:$8 sps:$4 sm:$0xff]  }
  0x31   : > { %4267 = vmatpush3.bf16.msra.mxu0 %v5048_v3  ;;  %4379 = vmatpush3.bf16.msra.mxu1 %v5048_v3  ;;  %v4788_v3 = vld [vmem:[%s5088_s27 + $0x1c0] ss:$8 sps:$4 sm:$0xff]  }
  0x32   : > { %4268 = vmatprep.subr.bf16.mxu0 %v5055_v4  ;;  %4380 = vmatprep.subr.bf16.mxu1 %v5055_v4  ;;  %v4789_v4 = vld [vmem:[%s5088_s27 + $0xd4] ss:$8 sps:$4 sm:$0xff]  }
  0x34   : > { %683 = vmatmul.mubr.bf16.gmra.mxu0 %v4721_v22  ;;  %1068 = vmatmul.mubr.bf16.gmra.mxu1 %v4722_v23  ;;  %v4810_v22 = vld [vmem:[%s5088_s27 + $0x300] ss:$8 sps:$4 sm:$0xff]   ;;  %v4813_v23 = vld [vmem:[%s5088_s27 + $0x214] ss:$8 sps:$4 sm:$0xff]  }
  0x35   : > { %3698 = vmatprep.mubr.msk.bf16.mxu0 %vm589_vm1, %v4723_v24  ;;  %3746 = vmatprep.mubr.msk.bf16.mxu1 %vm589_vm1, %v4725_v25  ;;  %v4815_v24 = vld [vmem:[%s5088_s27 + $0x314] ss:$8 sps:$4 sm:$0xff]   ;;  %v2316_v25 = vsel %vm2314_vm2, %v4879_v19, 0 }
  0x36   : > { %4269 = vmatpush3.bf16.msra.mxu0 %v5062_v5  ;;  %4381 = vmatpush3.bf16.msra.mxu1 %v5062_v5  ;;  %v4791_v5 = vld [vmem:[%s5088_s27 + $0x1d4] ss:$8 sps:$4 sm:$0xff]  }
  0x37   : > { %4270 = vmatprep.subr.bf16.mxu0 %v5069_v6  ;;  %4382 = vmatprep.subr.bf16.mxu1 %v5069_v6  ;;  %v6002_v6 = vmov 0.0  }
  0x3a   : > { %4271 = vmatpush3.bf16.msra.mxu0 %v5076_v7  ;;  %4383 = vmatpush3.bf16.msra.mxu1 %v5076_v7  ;;  %v4793_v7 = vld [vmem:[%s5088_s27 + $0xd0] ss:$8 sps:$4 sm:$0xff]  }
  0x3b   : > { %4272 = vmatprep.subr.bf16.mxu0 %v5083_v8  ;;  %4384 = vmatprep.subr.bf16.mxu1 %v5083_v8  ;;  %v4794_v8 = vld [vmem:[%s5088_s27 + $0x1d0] ss:$8 sps:$4 sm:$0xff]  }
  0x3c   : > { %691 = vmatmul.mubr.bf16.gmra.mxu0 %v4727_v26  ;;  %1076 = vmatmul.mubr.bf16.gmra.mxu1 %v4728_v27  ;;  %v2462_v26 = vsel %vm2314_vm2, %v4898_v20, 0  ;;  %v4817_v27 = vld [vmem:[%s5088_s27 + $0x210] ss:$8 sps:$4 sm:$0xff]  }
  0x3d   : > { %3699 = vmatprep.mubr.msk.bf16.mxu0 %vm589_vm1, %v4729_v28  ;;  %3747 = vmatprep.mubr.msk.bf16.mxu1 %vm589_vm1, %v4731_v29  ;;  %v4818_v28 = vld [vmem:[%s5088_s27 + $0x310] ss:$8 sps:$4 sm:$0xff]   ;;  %v4819_v29 = vld [vmem:[%s5088_s27 + $0x224] ss:$8 sps:$4 sm:$0xff]  }
  0x3e   : > { %4273 = vmatpush3.bf16.msra.mxu0 %v5095_v9  ;;  %4385 = vmatpush3.bf16.msra.mxu1 %v5095_v9  ;;  %v4795_v9 = vld [vmem:[%s5088_s27 + $0xe4] ss:$8 sps:$4 sm:$0xff]  }
  0x3f   : > { %4274 = vmatprep.subr.bf16.mxu0 %v5102_v10  ;;  %4386 = vmatprep.subr.bf16.mxu1 %v5102_v10  ;;  %v4797_v10 = vld [vmem:[%s5088_s27 + $0x1e4] ss:$8 sps:$4 sm:$0xff]  }
  0x42   : > { %4275 = vmatpush3.bf16.msra.mxu0 %v5111_v13  ;;  %4387 = vmatpush3.bf16.msra.mxu1 %v5111_v13  ;;  %v4801_v13 = vld [vmem:[%s5088_s27 + $0xf4] ss:$8 sps:$4 sm:$0xff]  }
  0x43   : > { %4276 = vmatprep.subr.bf16.mxu0 %v5118_v14  ;;  %4388 = vmatprep.subr.bf16.mxu1 %v5118_v14  ;;  %v4803_v14 = vld [vmem:[%s5088_s27 + $0x1f4] ss:$8 sps:$4 sm:$0xff]  }
  0x44   : > { %699 = vmatmul.mubr.bf16.gmra.mxu0 %v4733_v30  ;;  %1084 = vmatmul.mubr.bf16.gmra.mxu1 %v4734_v31  ;;  %v4822_v30 = vld [vmem:[%s5088_s27 + $0x324] ss:$8 sps:$4 sm:$0xff]   ;;  %v4821_v31 = vld [vmem:[%s5088_s27 + $0x220] ss:$8 sps:$4 sm:$0xff]  }
  0x45   : > { %3700 = vmatprep.mubr.msk.bf16.mxu0 %vm589_vm1, %v4735_v32  ;;  %3748 = vmatprep.mubr.msk.bf16.mxu1 %vm589_vm1, %v4737_v33  ;;  %v4824_v32 = vld [vmem:[%s5088_s27 + $0x320] ss:$8 sps:$4 sm:$0xff]   ;;  %v4825_v33 = vld [vmem:[%s5088_s27 + $0x234] ss:$8 sps:$4 sm:$0xff]  }
  0x46   : > { %4277 = vmatpush3.bf16.msra.mxu0 %v5127_v15  ;;  %4389 = vmatpush3.bf16.msra.mxu1 %v5127_v15  ;;  %v4805_v15 = vld [vmem:[%s5088_s27 + $0xf0] ss:$8 sps:$4 sm:$0xff]  }
  0x47   : > { %4278 = vmatprep.subr.bf16.mxu0 %v5134_v16  ;;  %4390 = vmatprep.subr.bf16.mxu1 %v5134_v16  ;;  %v4806_v16 = vld [vmem:[%s5088_s27 + $0x1f0] ss:$8 sps:$4 sm:$0xff]  }
  0x4a   : > { %4279 = vmatpush3.bf16.msra.mxu0 %v5141_v17  ;;  %4391 = vmatpush3.bf16.msra.mxu1 %v5141_v17  ;;  %v4809_v17 = vld [vmem:[%s5088_s27 + $0x204] ss:$8 sps:$4 sm:$0xff]  }
  0x4b   : > { %4541 = vmatprep.subr.bf16.mxu1 %v6002_v6  ;;  %4557 = vmatprep.subr.bf16.mxu0 %v6002_v6 }
  0x4c   : > { %707 = vmatmul.mubr.bf16.gmra.mxu0 %v4739_v34  ;;  %1092 = vmatmul.mubr.bf16.gmra.mxu1 %v4740_v35  ;;  %v4828_v34 = vld [vmem:[%s5088_s27 + $0x334] ss:$8 sps:$4 sm:$0xff]   ;;  %v4827_v35 = vld [vmem:[%s5088_s27 + $0x230] ss:$8 sps:$4 sm:$0xff]  }
  0x4d   : > { %3701 = vmatprep.mubr.msk.bf16.mxu0 %vm589_vm1, %v4741_v36  ;;  %3749 = vmatprep.mubr.msk.bf16.mxu1 %vm589_vm1, %v4743_v37  ;;  %v4830_v36 = vld [vmem:[%s5088_s27 + $0x330] ss:$8 sps:$4 sm:$0xff]   ;;  %v4831_v37 = vld [vmem:[%s5088_s27 + $0x244] ss:$8 sps:$4 sm:$0xff]  }
  0x54   : > { %715 = vmatmul.mubr.bf16.gmra.mxu0 %v4745_v38  ;;  %1100 = vmatmul.mubr.bf16.gmra.mxu1 %v4746_v39  ;;  %v4834_v38 = vld [vmem:[%s5088_s27 + $0x344] ss:$8 sps:$4 sm:$0xff]   ;;  %v4833_v39 = vld [vmem:[%s5088_s27 + $0x240] ss:$8 sps:$4 sm:$0xff]  }
  0x55   : > { %3702 = vmatprep.mubr.msk.bf16.mxu0 %vm589_vm1, %v4747_v40  ;;  %3750 = vmatprep.mubr.msk.bf16.mxu1 %vm589_vm1, %v4749_v41  ;;  %v4836_v40 = vld [vmem:[%s5088_s27 + $0x340] ss:$8 sps:$4 sm:$0xff]   ;;  %v4837_v41 = vld [vmem:[%s5088_s27 + $0x254] ss:$8 sps:$4 sm:$0xff]  }
  0x5c   : > { %723 = vmatmul.mubr.bf16.gmra.mxu0 %v4751_v42  ;;  %1108 = vmatmul.mubr.bf16.gmra.mxu1 %v4752_v43  ;;  %v4840_v42 = vld [vmem:[%s5088_s27 + $0x354] ss:$8 sps:$4 sm:$0xff]   ;;  %v4905_v43 = vld [vmem:[%s5997_s3] sm:$0xff]  }
  0x5d   : > { %3703 = vmatprep.mubr.msk.bf16.mxu0 %vm589_vm1, %v4753_v44  ;;  %3751 = vmatprep.mubr.msk.bf16.mxu1 %vm589_vm1, %v4755_v45  ;;  %v4839_v44 = vld [vmem:[%s5088_s27 + $0x250] ss:$8 sps:$4 sm:$0xff]  }
  0x5e   : > { %v4842_v45 = vld [vmem:[%s5088_s27 + $0x350] ss:$8 sps:$4 sm:$0xff]  }
  0x64   : > { %731 = vmatmul.mubr.bf16.gmra.mxu0 %v4757_v46  ;;  %1116 = vmatmul.mubr.bf16.gmra.mxu1 %v4758_v47  ;;  %v4843_v46 = vld [vmem:[%s5088_s27 + $0x264] ss:$8 sps:$4 sm:$0xff]  }
  0x65   : > { %3704 = vmatprep.mubr.msk.bf16.mxu0 %vm589_vm1, %v4759_v48  ;;  %3752 = vmatprep.mubr.msk.bf16.mxu1 %vm589_vm1, %v4761_v49  ;;  %v4846_v47 = vld [vmem:[%s5088_s27 + $0x364] ss:$8 sps:$4 sm:$0xff]   ;;  %v4845_v48 = vld [vmem:[%s5088_s27 + $0x260] ss:$8 sps:$4 sm:$0xff]  }
  0x66   : > { %v4848_v49 = vld [vmem:[%s5088_s27 + $0x360] ss:$8 sps:$4 sm:$0xff]  }
  0x6c   : > { %739 = vmatmul.mubr.bf16.gmra.mxu0 %v4763_v50  ;;  %1124 = vmatmul.mubr.bf16.gmra.mxu1 %v4764_v51  ;;  %v4849_v50 = vld [vmem:[%s5088_s27 + $0x274] ss:$8 sps:$4 sm:$0xff]  }
  0x6d   : > { %3705 = vmatprep.mubr.msk.bf16.mxu0 %vm589_vm1, %v4765_v52  ;;  %3753 = vmatprep.mubr.msk.bf16.mxu1 %vm589_vm1, %v4767_v53  ;;  %v4852_v51 = vld [vmem:[%s5088_s27 + $0x374] ss:$8 sps:$4 sm:$0xff]   ;;  %v4851_v52 = vld [vmem:[%s5088_s27 + $0x270] ss:$8 sps:$4 sm:$0xff]  }
  0x6e   : > { %v4854_v53 = vld [vmem:[%s5088_s27 + $0x370] ss:$8 sps:$4 sm:$0xff]  }
  0x74   : > { %747 = vmatmul.mubr.bf16.gmra.mxu0 %v4769_v54  ;;  %1132 = vmatmul.mubr.bf16.gmra.mxu1 %v4770_v55  ;;  %v4855_v54 = vld [vmem:[%s5088_s27 + $0x284] ss:$8 sps:$4 sm:$0xff]  }
  0x75   : > { %3706 = vmatprep.mubr.msk.bf16.mxu0 %vm589_vm1, %v4771_v56  ;;  %3754 = vmatprep.mubr.msk.bf16.mxu1 %vm589_vm1, %v4773_v57  ;;  %v4858_v55 = vld [vmem:[%s5088_s27 + $0x384] ss:$8 sps:$4 sm:$0xff]   ;;  %v4906_v56 = vld [vmem:[%s5997_s3 + $0x18] sm:$0xff]   ;;  %v4857_v57 = vld [vmem:[%s5088_s27 + $0x280] ss:$8 sps:$4 sm:$0xff]  }
  0x7c   : > { %755 = vmatmul.mubr.bf16.gmra.mxu0 %v4775_v58  ;;  %1140 = vmatmul.mubr.bf16.gmra.mxu1 %v4776_v59  ;;  %v4860_v58 = vld [vmem:[%s5088_s27 + $0x380] ss:$8 sps:$4 sm:$0xff]   ;;  %v4861_v59 = vld [vmem:[%s5088_s27 + $0x294] ss:$8 sps:$4 sm:$0xff]  }
  0x7d   : > { %3707 = vmatprep.mubr.msk.bf16.mxu0 %vm589_vm1, %v4777_v60  ;;  %3755 = vmatprep.mubr.msk.bf16.mxu1 %vm589_vm1, %v4779_v61  ;;  %v4864_v60 = vld [vmem:[%s5088_s27 + $0x394] ss:$8 sps:$4 sm:$0xff]  }
  0x84   : > { %763 = vmatmul.mubr.bf16.gmra.mxu0 %v4781_v62  ;;  %1148 = vmatmul.mubr.bf16.gmra.mxu1 %v4782_v63 }
  0x85   : > { %3708 = vmatprep.mubr.msk.bf16.mxu0 %vm589_vm1, %v4783_v0  ;;  %3756 = vmatprep.mubr.msk.bf16.mxu1 %vm589_vm1, %v4785_v1 }
  0x8c   : > { %771 = vmatmul.mubr.bf16.gmra.mxu0 %v4787_v2  ;;  %1156 = vmatmul.mubr.bf16.gmra.mxu1 %v4788_v3 }
  0x8d   : > { %3709 = vmatprep.mubr.msk.bf16.mxu0 %vm589_vm1, %v4789_v4  ;;  %3757 = vmatprep.mubr.msk.bf16.mxu1 %vm589_vm1, %v4791_v5  ;;  %v4863_v5 = vld [vmem:[%s5088_s27 + $0x290] ss:$8 sps:$4 sm:$0xff]  }
  0x94   : > { %779 = vmatmul.mubr.bf16.gmra.mxu0 %v4793_v7  ;;  %1164 = vmatmul.mubr.bf16.gmra.mxu1 %v4794_v8  ;;  %v4866_v7 = vld [vmem:[%s5088_s27 + $0x390] ss:$8 sps:$4 sm:$0xff]  }
  0x95   : > { %3710 = vmatprep.mubr.msk.bf16.mxu0 %vm589_vm1, %v4795_v9  ;;  %3758 = vmatprep.mubr.msk.bf16.mxu1 %vm589_vm1, %v4797_v10  ;;  %v4867_v9 = vld [vmem:[%s5088_s27 + $0x2a4] ss:$8 sps:$4 sm:$0xff]  }
  0x96   : > { %v4870_v10 = vld [vmem:[%s5088_s27 + $0x3a4] ss:$8 sps:$4 sm:$0xff]  }
  0x9c   : > { %787 = vmatmul.mubr.bf16.gmra.mxu0 %v4799_v11  ;;  %1172 = vmatmul.mubr.bf16.gmra.mxu1 %v4800_v12 }
  0x9d   : > { %3711 = vmatprep.mubr.msk.bf16.mxu0 %vm589_vm1, %v4801_v13  ;;  %3759 = vmatprep.mubr.msk.bf16.mxu1 %vm589_vm1, %v4803_v14 }
  0xa4   : > { %795 = vmatmul.mubr.bf16.gmra.mxu0 %v4805_v15  ;;  %1180 = vmatmul.mubr.bf16.gmra.mxu1 %v4806_v16 }
  0xa5   : > { %3792 = vmatprep.mubr.msk.bf16.mxu0 %vm589_vm1, %v4809_v17  ;;  %3840 = vmatprep.mubr.msk.bf16.mxu1 %vm589_vm1, %v4812_v18 }
  0xac   : > { %1477 = vmatmul.mubr.bf16.vlgmr.msra.gmra.mxu0 %v4807_v21  ;;  %1894 = vmatmul.mubr.bf16.vlgmr.msra.gmra.mxu1 %v4810_v22 }
  0xad   : > { %3793 = vmatprep.mubr.msk.bf16.mxu0 %vm589_vm1, %v4813_v23  ;;  %3841 = vmatprep.mubr.msk.bf16.mxu1 %vm589_vm1, %v4815_v24  ;;  %v4869_v24 = vld [vmem:[%s5088_s27 + $0x2a0] ss:$8 sps:$4 sm:$0xff]  }
  0xae   : > { %4542 = vmatpush3.bf16.msra.mxu1 %v2316_v25  ;;  %4558 = vmatpush3.bf16.msra.mxu0 %v2462_v26  ;;  %v4872_v25 = vld [vmem:[%s5088_s27 + $0x3a0] ss:$8 sps:$4 sm:$0xff]  }
  0xaf   : > { %4543 = vmatprep.subr.bf16.mxu1 %v6002_v6  ;;  %4559 = vmatprep.subr.bf16.mxu0 %v6002_v6 }
  0xb2   : > { %4544 = vmatpush3.bf16.msra.mxu1 %v4905_v43  ;;  %4560 = vmatpush3.bf16.msra.mxu0 %v4906_v56  ;;  %v4878_v43 = vld [vmem:[%s5088_s27 + $0x3b0] ss:$8 sps:$4 sm:$0xff]  }
  0xb3   : > { %4549 = vmatprep.subr.bf16.mxu1 %v6002_v6  ;;  %4573 = vmatprep.subr.bf16.mxu0 %v6002_v6 }
  0xb4   : > { %1485 = vmatmul.mubr.bf16.gmra.mxu0 %v4817_v27  ;;  %1902 = vmatmul.mubr.bf16.gmra.mxu1 %v4818_v28  ;;  %v4873_v27 = vld [vmem:[%s5088_s27 + $0x2b4] ss:$8 sps:$4 sm:$0xff]  }
  0xb5   : > { %3794 = vmatprep.mubr.msk.bf16.mxu0 %vm589_vm1, %v4819_v29  ;;  %3842 = vmatprep.mubr.msk.bf16.mxu1 %vm589_vm1, %v4822_v30  ;;  %v4876_v28 = vld [vmem:[%s5088_s27 + $0x3b4] ss:$8 sps:$4 sm:$0xff]  }
  0xbc   : > { %1493 = vmatmul.mubr.bf16.gmra.mxu0 %v4821_v31  ;;  %1910 = vmatmul.mubr.bf16.gmra.mxu1 %v4824_v32 }
  0xbd   : > { %3795 = vmatprep.mubr.msk.bf16.mxu0 %vm589_vm1, %v4825_v33  ;;  %3843 = vmatprep.mubr.msk.bf16.mxu1 %vm589_vm1, %v4828_v34 }
  0xc4   : > { %1501 = vmatmul.mubr.bf16.gmra.mxu0 %v4827_v35  ;;  %1918 = vmatmul.mubr.bf16.gmra.mxu1 %v4830_v36 }
  0xc5   : > { %3796 = vmatprep.mubr.msk.bf16.mxu0 %vm589_vm1, %v4831_v37  ;;  %3844 = vmatprep.mubr.msk.bf16.mxu1 %vm589_vm1, %v4834_v38 }
  0xcc   : > { %1509 = vmatmul.mubr.bf16.gmra.mxu0 %v4833_v39  ;;  %1926 = vmatmul.mubr.bf16.gmra.mxu1 %v4836_v40 }
  0xcd   : > { %3797 = vmatprep.mubr.msk.bf16.mxu0 %vm589_vm1, %v4837_v41  ;;  %3845 = vmatprep.mubr.msk.bf16.mxu1 %vm589_vm1, %v4840_v42  ;;  %v4875_v42 = vld [vmem:[%s5088_s27 + $0x2b0] ss:$8 sps:$4 sm:$0xff]  }
  0xd4   : > { %1517 = vmatmul.mubr.bf16.gmra.mxu0 %v4839_v44  ;;  %1934 = vmatmul.mubr.bf16.gmra.mxu1 %v4842_v45  ;;  %v4880_v45 = vld [vmem:[%s5088_s27 + $0x2c4] ss:$8 sps:$4 sm:$0xff]  }
  0xd5   : > { %3798 = vmatprep.mubr.msk.bf16.mxu0 %vm589_vm1, %v4843_v46  ;;  %3846 = vmatprep.mubr.msk.bf16.mxu1 %vm589_vm1, %v4846_v47  ;;  %v4883_v46 = vld [vmem:[%s5088_s27 + $0x3c4] ss:$8 sps:$4 sm:$0xff]  }
  0xdc   : > { %1525 = vmatmul.mubr.bf16.gmra.mxu0 %v4845_v48  ;;  %1942 = vmatmul.mubr.bf16.gmra.mxu1 %v4848_v49 }
  0xdd   : > { %3799 = vmatprep.mubr.msk.bf16.mxu0 %vm589_vm1, %v4849_v50  ;;  %3847 = vmatprep.mubr.msk.bf16.mxu1 %vm589_vm1, %v4852_v51 }
  0xe4   : > { %1533 = vmatmul.mubr.bf16.gmra.mxu0 %v4851_v52  ;;  %1950 = vmatmul.mubr.bf16.gmra.mxu1 %v4854_v53 }
  0xe5   : > { %3800 = vmatprep.mubr.msk.bf16.mxu0 %vm589_vm1, %v4855_v54  ;;  %3848 = vmatprep.mubr.msk.bf16.mxu1 %vm589_vm1, %v4858_v55 }
  0xec   : > { %v4056_v61 = vpop.f32.mrf.mxu0  ;;  %v4168_v62 = vpop.f32.mrf.mxu1  ;;  %1541 = vmatmul.mubr.bf16.gmra.mxu0 %v4857_v57  ;;  %1958 = vmatmul.mubr.bf16.gmra.mxu1 %v4860_v58 }
  0xed   : > { %3801 = vmatprep.mubr.msk.bf16.mxu0 %vm589_vm1, %v4861_v59  ;;  %3849 = vmatprep.mubr.msk.bf16.mxu1 %vm589_vm1, %v4864_v60  ;;  %v4882_v60 = vld [vmem:[%s5088_s27 + $0x2c0] ss:$8 sps:$4 sm:$0xff]  }
  0xee   : > { %v4057_v63 = vpop.f32.mrf.mxu0  ;;  %v4169_v0 = vpop.f32.mrf.mxu1 }
  0xef   : > { %v5351_v1 = vadd.f32 %v4057_v63, %v4056_v61  ;;  %v5353_v2 = vadd.f32 %v4169_v0, %v4168_v62  ;;  %v4885_v61 = vld [vmem:[%s5088_s27 + $0x3c0] ss:$8 sps:$4 sm:$0xff]   ;;  %v4886_v63 = vld [vmem:[%s5088_s27 + $0x2d4] ss:$8 sps:$4 sm:$0xff]  }
  0xf0   : > { %v4059_v3 = vpop.f32.mrf.mxu0  ;;  %v4171_v4 = vpop.f32.mrf.mxu1  ;;  %v4889_v0 = vld [vmem:[%s5088_s27 + $0x3d4] ss:$8 sps:$4 sm:$0xff]  }
  0xf2   : > { %v4060_v11 = vpop.f32.mrf.mxu0  ;;  %v4172_v12 = vpop.f32.mrf.mxu1 }
  0xf3   : > { %v5361_v13 = vadd.f32 %v4060_v11, %v4059_v3  ;;  %v5363_v14 = vadd.f32 %v4172_v12, %v4171_v4 }
  0xf4   : > { %v4062_v15 = vpop.f32.mrf.mxu0  ;;  %v4174_v16 = vpop.f32.mrf.mxu1  ;;  %1549 = vmatmul.mubr.bf16.gmra.mxu0 %v4863_v5  ;;  %1966 = vmatmul.mubr.bf16.gmra.mxu1 %v4866_v7 }
  0xf5   : > { %3802 = vmatprep.mubr.msk.bf16.mxu0 %vm589_vm1, %v4867_v9  ;;  %3850 = vmatprep.mubr.msk.bf16.mxu1 %vm589_vm1, %v4870_v10 }
  0xf6   : > { %v4063_v18 = vpop.f32.mrf.mxu0  ;;  %v4175_v19 = vpop.f32.mrf.mxu1 }
  0xf7   : > { %v5369_v20 = vadd.f32 %v4063_v18, %v4062_v15  ;;  %v5371_v21 = vadd.f32 %v4175_v19, %v4174_v16 }
  0xf8   : > { %v4065_v22 = vpop.f32.mrf.mxu0  ;;  %v4177_v23 = vpop.f32.mrf.mxu1 }
  0xfa   : > { %v4066_v29 = vpop.f32.mrf.mxu0  ;;  %v4178_v30 = vpop.f32.mrf.mxu1 }
  0xfb   : > { %v5379_v31 = vadd.f32 %v4066_v29, %v4065_v22  ;;  %v5381_v32 = vadd.f32 %v4178_v30, %v4177_v23  ;;  %v4888_v23 = vld [vmem:[%s5088_s27 + $0x2d0] ss:$8 sps:$4 sm:$0xff]  }
  0xfc   : > { %v4068_v33 = vpop.f32.mrf.mxu0  ;;  %v4180_v34 = vpop.f32.mrf.mxu1  ;;  %1557 = vmatmul.mubr.bf16.gmra.mxu0 %v4869_v24  ;;  %1974 = vmatmul.mubr.bf16.gmra.mxu1 %v4872_v25  ;;  %v4891_v24 = vld [vmem:[%s5088_s27 + $0x3d0] ss:$8 sps:$4 sm:$0xff]  }
  0xfd   : > { %3803 = vmatprep.mubr.msk.bf16.mxu0 %vm589_vm1, %v4873_v27  ;;  %3851 = vmatprep.mubr.msk.bf16.mxu1 %vm589_vm1, %v4876_v28  ;;  %v4892_v27 = vld [vmem:[%s5088_s27 + $0x2e4] ss:$8 sps:$4 sm:$0xff]  }
  0xfe   : > { %v4069_v36 = vpop.f32.mrf.mxu0  ;;  %v4181_v37 = vpop.f32.mrf.mxu1  ;;  %v4895_v28 = vld [vmem:[%s5088_s27 + $0x3e4] ss:$8 sps:$4 sm:$0xff]  }
  0xff   : > { %v5387_v38 = vadd.f32 %v4069_v36, %v4068_v33  ;;  %v5389_v39 = vadd.f32 %v4181_v37, %v4180_v34 }
 0x100   : > { %v4071_v40 = vpop.f32.mrf.mxu0  ;;  %v4183_v41 = vpop.f32.mrf.mxu1 }
 0x102   : > { %v4072_v47 = vpop.f32.mrf.mxu0  ;;  %v4184_v48 = vpop.f32.mrf.mxu1 }
 0x103   : > { %v5397_v49 = vadd.f32 %v4072_v47, %v4071_v40  ;;  %v5399_v50 = vadd.f32 %v4184_v48, %v4183_v41  ;;  %v4894_v48 = vld [vmem:[%s5088_s27 + $0x2e0] ss:$8 sps:$4 sm:$0xff]  }
 0x104   : > { %v4074_v51 = vpop.f32.mrf.mxu0  ;;  %v4186_v52 = vpop.f32.mrf.mxu1  ;;  %1565 = vmatmul.mubr.bf16.gmra.mxu0 %v4875_v42  ;;  %1982 = vmatmul.mubr.bf16.gmra.mxu1 %v4878_v43 }
 0x105   : > { %3804 = vmatprep.mubr.msk.bf16.mxu0 %vm589_vm1, %v4880_v45  ;;  %3852 = vmatprep.mubr.msk.bf16.mxu1 %vm589_vm1, %v4883_v46 }
 0x106   : > { %v4075_v54 = vpop.f32.mrf.mxu0  ;;  %v4187_v55 = vpop.f32.mrf.mxu1 }
 0x107   : > { %v5405_v56 = vadd.f32 %v4075_v54, %v4074_v51  ;;  %v5407_v57 = vadd.f32 %v4187_v55, %v4186_v52  ;;  %v4897_v51 = vld [vmem:[%s5088_s27 + $0x3e0] ss:$8 sps:$4 sm:$0xff]   ;;  %v4899_v54 = vld [vmem:[%s5088_s27 + $0x2f4] ss:$8 sps:$4 sm:$0xff]  }
 0x108   : > { %v4077_v58 = vpop.f32.mrf.mxu0  ;;  %v4189_v59 = vpop.f32.mrf.mxu1  ;;  %v4902_v55 = vld [vmem:[%s5088_s27 + $0x3f4] ss:$8 sps:$4 sm:$0xff]  }
 0x10a   : > { %v4078_v3 = vpop.f32.mrf.mxu0  ;;  %v4190_v4 = vpop.f32.mrf.mxu1 }
 0x10b   : > { %v5415_v5 = vadd.f32 %v4078_v3, %v4077_v58  ;;  %v5417_v7 = vadd.f32 %v4190_v4, %v4189_v59 }
 0x10c   : > { %v4080_v9 = vpop.f32.mrf.mxu0  ;;  %v4192_v10 = vpop.f32.mrf.mxu1  ;;  %1573 = vmatmul.mubr.bf16.gmra.mxu0 %v4882_v60  ;;  %1990 = vmatmul.mubr.bf16.gmra.mxu1 %v4885_v61 }
 0x10d   : > { %3805 = vmatprep.mubr.msk.bf16.mxu0 %vm589_vm1, %v4886_v63  ;;  %3853 = vmatprep.mubr.msk.bf16.mxu1 %vm589_vm1, %v4889_v0 }
 0x10e   : > { %v4081_v12 = vpop.f32.mrf.mxu0  ;;  %v4193_v15 = vpop.f32.mrf.mxu1 }
 0x10f   : > { %v5423_v16 = vadd.f32 %v4081_v12, %v4080_v9  ;;  %v5425_v18 = vadd.f32 %v4193_v15, %v4192_v10 }
 0x110   : > { %v4083_v19 = vpop.f32.mrf.mxu0  ;;  %v4195_v22 = vpop.f32.mrf.mxu1 }
 0x112   : > { %v4084_v29 = vpop.f32.mrf.mxu0  ;;  %v4196_v30 = vpop.f32.mrf.mxu1 }
 0x113   : > { %v5433_v33 = vadd.f32 %v4084_v29, %v4083_v19  ;;  %v5435_v34 = vadd.f32 %v4196_v30, %v4195_v22  ;;  %v4901_v22 = vld [vmem:[%s5088_s27 + $0x2f0] ss:$8 sps:$4 sm:$0xff]  }
 0x114   : > { %v4086_v36 = vpop.f32.mrf.mxu0  ;;  %v4198_v37 = vpop.f32.mrf.mxu1  ;;  %1581 = vmatmul.mubr.bf16.gmra.mxu0 %v4888_v23  ;;  %1998 = vmatmul.mubr.bf16.gmra.mxu1 %v4891_v24  ;;  %v4904_v23 = vld [vmem:[%s5088_s27 + $0x3f0] ss:$8 sps:$4 sm:$0xff]  }
 0x115   : > { %3806 = vmatprep.mubr.msk.bf16.mxu0 %vm589_vm1, %v4892_v27  ;;  %3854 = vmatprep.mubr.msk.bf16.mxu1 %vm589_vm1, %v4895_v28 }
 0x116   : > { %v4087_v41 = vpop.f32.mrf.mxu0  ;;  %v4199_v42 = vpop.f32.mrf.mxu1 }
 0x117   : > { %v5441_v43 = vadd.f32 %v4087_v41, %v4086_v36  ;;  %v5443_v45 = vadd.f32 %v4199_v42, %v4198_v37 }
 0x118   : > { %v4089_v46 = vpop.f32.mrf.mxu0  ;;  %v4201_v47 = vpop.f32.mrf.mxu1 }
 0x11a   : > { %v4090_v58 = vpop.f32.mrf.mxu0  ;;  %v4202_v59 = vpop.f32.mrf.mxu1 }
 0x11b   : > { %v5451_v60 = vadd.f32 %v4090_v58, %v4089_v46  ;;  %v5453_v61 = vadd.f32 %v4202_v59, %v4201_v47 }
 0x11c   : > { %v4092_v63 = vpop.f32.mrf.mxu0  ;;  %v4204_v0 = vpop.f32.mrf.mxu1  ;;  %1589 = vmatmul.mubr.bf16.gmra.mxu0 %v4894_v48  ;;  %2006 = vmatmul.mubr.bf16.gmra.mxu1 %v4897_v51 }
 0x11d   : > { %3807 = vmatprep.mubr.msk.bf16.mxu0 %vm589_vm1, %v4899_v54  ;;  %3855 = vmatprep.mubr.msk.bf16.mxu1 %vm589_vm1, %v4902_v55 }
 0x11e   : > { %v4093_v4 = vpop.f32.mrf.mxu0  ;;  %v4205_v9 = vpop.f32.mrf.mxu1 }
 0x11f   : > { %v5459_v10 = vadd.f32 %v4093_v4, %v4092_v63  ;;  %v5461_v12 = vadd.f32 %v4205_v9, %v4204_v0 }
 0x120   : > { %v4095_v15 = vpop.f32.mrf.mxu0  ;;  %v4207_v19 = vpop.f32.mrf.mxu1 }
 0x122   : > { %v4096_v27 = vpop.f32.mrf.mxu0  ;;  %v4208_v28 = vpop.f32.mrf.mxu1 }
 0x123   : > { %v5467_v29 = vadd.f32 %v4096_v27, %v4095_v15  ;;  %v5469_v30 = vadd.f32 %v4208_v28, %v4207_v19 }
 0x124   : > { %v4098_v36 = vpop.f32.mrf.mxu0  ;;  %v4210_v37 = vpop.f32.mrf.mxu1  ;;  %1597 = vmatmul.mubr.bf16.gmra.mxu0 %v4901_v22  ;;  %2014 = vmatmul.mubr.bf16.gmra.mxu1 %v4904_v23 }
 0x125   : > { %4545 = vmatprep.mubr.msk.bf16.mxu1 %vm4973_vm3, %v6002_v6  ;;  %4561 = vmatprep.mubr.msk.bf16.mxu0 %vm4973_vm3, %v6002_v6 }
 0x126   : > { %v4099_v42 = vpop.f32.mrf.mxu0  ;;  %v4211_v46 = vpop.f32.mrf.mxu1 }
 0x127   : > { %v5477_v47 = vadd.f32 %v4099_v42, %v4098_v36  ;;  %v5479_v48 = vadd.f32 %v4211_v46, %v4210_v37 }
 0x128   : > { %v4101_v51 = vpop.f32.mrf.mxu0  ;;  %v4213_v54 = vpop.f32.mrf.mxu1 }
 0x12a   : > { %v4102_v58 = vpop.f32.mrf.mxu0  ;;  %v4214_v59 = vpop.f32.mrf.mxu1 }
 0x12b   : > { %v5483_v63 = vadd.f32 %v4102_v58, %v4101_v51  ;;  %v5485_v0 = vadd.f32 %v4214_v59, %v4213_v54 }
 0x12c   : > { %v4104_v4 = vpop.f32.mrf.mxu0  ;;  %v4216_v9 = vpop.f32.mrf.mxu1 }
 0x12e   : > { %v4105_v19 = vpop.f32.mrf.mxu0  ;;  %v4217_v22 = vpop.f32.mrf.mxu1 }
 0x12f   : > { %v5489_v23 = vadd.f32 %v4105_v19, %v4104_v4  ;;  %v5491_v27 = vadd.f32 %v4217_v22, %v4216_v9 }
 0x130   : > { %v4107_v28 = vpop.f32.mrf.mxu0  ;;  %v4219_v36 = vpop.f32.mrf.mxu1 }
 0x132   : > { %v4108_v42 = vpop.f32.mrf.mxu0  ;;  %v4220_v46 = vpop.f32.mrf.mxu1 }
 0x133   : > { %v5495_v51 = vadd.f32 %v4108_v42, %v4107_v28  ;;  %v5497_v54 = vadd.f32 %v4220_v46, %v4219_v36 }
 0x134   : > { %v4110_v58 = vpop.f32.mrf.mxu0  ;;  %v4222_v59 = vpop.f32.mrf.mxu1 }
 0x136   : > { %v4111_v4 = vpop.f32.mrf.mxu0  ;;  %v4223_v19 = vpop.f32.mrf.mxu1 }
 0x137   : > { %v5501_v9 = vadd.f32 %v4111_v4, %v4110_v58  ;;  %v5503_v22 = vadd.f32 %v4223_v19, %v4222_v59 }
 0x138   : > { %v4113_v55 = vpop.f32.mrf.mxu0  ;;  %v4225_v41 = vpop.f32.mrf.mxu1 }
 0x13a   : > { %v4114_v28 = vpop.f32.mrf.mxu0  ;;  %v4226_v42 = vpop.f32.mrf.mxu1 }
 0x13b   : > { %v5507_v36 = vadd.f32 %v4114_v28, %v4113_v55  ;;  %v5509_v46 = vadd.f32 %v4226_v42, %v4225_v41 }
 0x13c   : > { %v4116_v24 = vpop.f32.mrf.mxu0  ;;  %v4228_v3 = vpop.f32.mrf.mxu1 }
 0x13e   : > { %v4117_v58 = vpop.f32.mrf.mxu0  ;;  %v4229_v4 = vpop.f32.mrf.mxu1 }
 0x13f   : > { %v5513_v59 = vadd.f32 %v4117_v58, %v4116_v24  ;;  %v5515_v19 = vadd.f32 %v4229_v4, %v4228_v3 }
 0x140   : > { %v4119_v52 = vpop.f32.mrf.mxu0  ;;  %v4231_v40 = vpop.f32.mrf.mxu1 }
 0x142   : > { %v4120_v55 = vpop.f32.mrf.mxu0  ;;  %v4232_v28 = vpop.f32.mrf.mxu1 }
 0x143   : > { %v5519_v41 = vadd.f32 %v4120_v55, %v4119_v52  ;;  %v5521_v42 = vadd.f32 %v4232_v28, %v4231_v40 }
 0x144   : > { %v4122_v25 = vpop.f32.mrf.mxu0  ;;  %v4234_v11 = vpop.f32.mrf.mxu1 }
 0x145   : > { %6025 = vst [vmem:[#allocation4_spill] sm:$0xff] %v5521_v42 }
 0x146   : > { %v4123_v24 = vpop.f32.mrf.mxu0  ;;  %v4235_v58 = vpop.f32.mrf.mxu1 }
 0x147   : > { %v5525_v3 = vadd.f32 %v4123_v24, %v4122_v25  ;;  %v5527_v4 = vadd.f32 %v4235_v58, %v4234_v11 }
 0x148   : > { %v4125_v62 = vpop.f32.mrf.mxu0  ;;  %v4237_v53 = vpop.f32.mrf.mxu1 }
 0x149   : > { %6026 = vst [vmem:[#allocation5_spill] sm:$0xff] %v5525_v3  ;;  %6027 = vst [vmem:[#allocation6_spill] sm:$0xff] %v5527_v4 }
 0x14a   : > { %v4126_v52 = vpop.f32.mrf.mxu0  ;;  %v4238_v55 = vpop.f32.mrf.mxu1 }
 0x14b   : > { %v5531_v40 = vadd.f32 %v4126_v52, %v4125_v62  ;;  %v5533_v28 = vadd.f32 %v4238_v55, %v4237_v53 }
 0x14c   : > { %v4128_v6 = vpop.f32.mrf.mxu0  ;;  %v4240_v44 = vpop.f32.mrf.mxu1 }
 0x14d   : > { %6028 = vst [vmem:[#allocation7_spill] sm:$0xff] %v5531_v40  ;;  %6029 = vst [vmem:[#allocation8_spill] sm:$0xff] %v5533_v28 }
 0x14e   : > { %v4129_v25 = vpop.f32.mrf.mxu0  ;;  %v4241_v24 = vpop.f32.mrf.mxu1 }
 0x14f   : > { %v5537_v11 = vadd.f32 %v4129_v25, %v4128_v6  ;;  %v5539_v58 = vadd.f32 %v4241_v24, %v4240_v44 }
 0x150   : > { %v4131_v35 = vpop.f32.mrf.mxu0  ;;  %v4243_v26 = vpop.f32.mrf.mxu1 }
 0x151   : > { %6030 = vst [vmem:[#allocation9_spill] sm:$0xff] %v5537_v11  ;;  %6031 = vst [vmem:[#allocation10_spill] sm:$0xff] %v5539_v58 }
 0x152   : > { %v4132_v62 = vpop.f32.mrf.mxu0  ;;  %v4244_v52 = vpop.f32.mrf.mxu1 }
 0x153   : > { %v5543_v53 = vadd.f32 %v4132_v62, %v4131_v35  ;;  %v5545_v55 = vadd.f32 %v4244_v52, %v4243_v26 }
 0x154   : > { %v4134_v17 = vpop.f32.mrf.mxu0  ;;  %v4246_v8 = vpop.f32.mrf.mxu1 }
 0x155   : > { %6032 = vst [vmem:[#allocation11_spill] sm:$0xff] %v5543_v53  ;;  %6033 = vst [vmem:[#allocation12_spill] sm:$0xff] %v5545_v55 }
 0x156   : > { %v4135_v6 = vpop.f32.mrf.mxu0  ;;  %v4247_v25 = vpop.f32.mrf.mxu1 }
 0x157   : > { %v5549_v44 = vadd.f32 %v4135_v6, %v4134_v17  ;;  %v5551_v24 = vadd.f32 %v4247_v25, %v4246_v8 }
 0x158   : > { %v4137_v28 = vpop.f32.mrf.mxu0  ;;  %v4249_v40 = vpop.f32.mrf.mxu1 }
 0x159   : > { %6034 = vst [vmem:[#allocation13_spill] sm:$0xff] %v5549_v44  ;;  %6035 = vst [vmem:[#allocation14_spill] sm:$0xff] %v5551_v24 }
 0x15a   : > { %v4138_v35 = vpop.f32.mrf.mxu0  ;;  %v4250_v62 = vpop.f32.mrf.mxu1 }
 0x15b   : > { %v5555_v26 = vadd.f32 %v4138_v35, %v4137_v28  ;;  %v5557_v52 = vadd.f32 %v4250_v62, %v4249_v40 }
 0x15c   : > { %v4140_v58 = vpop.f32.mrf.mxu0  ;;  %v4252_v11 = vpop.f32.mrf.mxu1 }
 0x15d   : > { %6036 = vst [vmem:[#allocation15_spill] sm:$0xff] %v5555_v26  ;;  %6037 = vst [vmem:[#allocation16_spill] sm:$0xff] %v5557_v52 }
 0x15e   : > { %v4141_v17 = vpop.f32.mrf.mxu0  ;;  %v4253_v6 = vpop.f32.mrf.mxu1 }
 0x15f   : > { %v5561_v8 = vadd.f32 %v4141_v17, %v4140_v58  ;;  %v5563_v25 = vadd.f32 %v4253_v6, %v4252_v11 }
 0x160   : > { %v4143_v55 = vpop.f32.mrf.mxu0  ;;  %v4255_v53 = vpop.f32.mrf.mxu1 }
 0x161   : > { %6038 = vst [vmem:[#allocation17_spill] sm:$0xff] %v5561_v8  ;;  %6039 = vst [vmem:[#allocation18_spill] sm:$0xff] %v5563_v25 }
 0x162   : > { %v4144_v28 = vpop.f32.mrf.mxu0  ;;  %v4256_v35 = vpop.f32.mrf.mxu1 }
 0x163   : > { %v5567_v40 = vadd.f32 %v4144_v28, %v4143_v55  ;;  %v5569_v62 = vadd.f32 %v4256_v35, %v4255_v53 }
 0x164   : > { %v4146_v24 = vpop.f32.mrf.mxu0  ;;  %v4258_v44 = vpop.f32.mrf.mxu1 }
 0x165   : > { %6040 = vst [vmem:[#allocation19_spill] sm:$0xff] %v5567_v40  ;;  %6041 = vst [vmem:[#allocation20_spill] sm:$0xff] %v5569_v62  ;;  %v6046_v40 = vmax.f32 %v5351_v1, %v5353_v2 }
 0x166   : > { %v4147_v58 = vpop.f32.mrf.mxu0  ;;  %v4259_v17 = vpop.f32.mrf.mxu1 }
 0x167   : > { %v5573_v11 = vadd.f32 %v4147_v58, %v4146_v24  ;;  %v5575_v6 = vadd.f32 %v4259_v17, %v4258_v44 }
 0x168   : > { %v4149_v52 = vpop.f32.mrf.mxu0  ;;  %v4261_v26 = vpop.f32.mrf.mxu1 }
 0x169   : > { %6042 = vst [vmem:[#allocation21_spill] sm:$0xff] %v5573_v11  ;;  %6043 = vst [vmem:[#allocation22_spill] sm:$0xff] %v5575_v6 }
 0x16a   : > { %v4150_v55 = vpop.f32.mrf.mxu0  ;;  %v4262_v28 = vpop.f32.mrf.mxu1 }
 0x16b   : > { %v5579_v53 = vadd.f32 %v4150_v55, %v4149_v52  ;;  %v5581_v35 = vadd.f32 %v4262_v28, %v4261_v26  ;;  %v5591_v26 = vld [vmem:[%s5996_s2] ss:$0 sm:$0xff] }
 0x16c   : > { %v4280_v25 = vpop.f32.mrf.mxu0  ;;  %v4392_v8 = vpop.f32.mrf.mxu1 }
 0x16d   : > { %6044 = vst [vmem:[#allocation23_spill] sm:$0xff] %v5579_v53  ;;  %6045 = vst [vmem:[#allocation24_spill] sm:$0xff] %v5581_v35 }
 0x16e   : > { %v4281_v24 = vpop.f32.mrf.mxu0  ;;  %v4393_v58 = vpop.f32.mrf.mxu1 }
 0x16f   : > { %v4282_v44 = vadd.f32 %v4281_v24, %v4280_v25  ;;  %v4394_v6 = vadd.f32 %v4393_v58, %v4392_v8  ;;  %v6047_v24 = vmax.f32 %v5361_v13, %v5363_v14 }
 0x170   : > { %v4283_v17 = vpop.f32.mrf.mxu0  ;;  %v4395_v62 = vpop.f32.mrf.mxu1 }
 0x171   : > { %v1605_v37 = vmax.f32 %v6046_v40, %v4282_v44 }
 0x172   : > { %v4284_v52 = vpop.f32.mrf.mxu0  ;;  %v4396_v55 = vpop.f32.mrf.mxu1 }
 0x173   : > { %v2022_v28 = vmax.f32 %v1605_v37, %v4394_v6  ;;  %v4285_v11 = vadd.f32 %v4284_v52, %v4283_v17  ;;  %v4397_v1 = vadd.f32 %v4396_v55, %v4395_v62  ;;  %v6048_v17 = vmax.f32 %v5369_v20, %v5371_v21 }
 0x174   : > { %v4286_v15 = vpop.f32.mrf.mxu0  ;;  %v4398_v35 = vpop.f32.mrf.mxu1 }
 0x175   : > { %v2061_v25 = vadd.f32 %v5591_v26, %v2022_v28  ;;  %v1606_v53 = vmax.f32 %v6047_v24, %v4285_v11 }
 0x176   : > { %v4287_v2 = vpop.f32.mrf.mxu0  ;;  %v4399_v8 = vpop.f32.mrf.mxu1 }
 0x177   : > { %v2093_v40 = vmax.f32 %v2061_v25, 0.0  ;;  %v2023_v58 = vmax.f32 %v1606_v53, %v4397_v1  ;;  %v4288_v44 = vadd.f32 %v4287_v2, %v4286_v15  ;;  %v4400_v4 = vadd.f32 %v4399_v8, %v4398_v35 }
 0x178   : > { %v4289_v3 = vpop.f32.mrf.mxu0  ;;  %v4401_v42 = vpop.f32.mrf.mxu1  ;;  %v6049_v25 = vmax.f32 %v5379_v31, %v5381_v32  ;;  %v6051_v32 = vmov 0.0  }
 0x179   : > { %v4008_v37 = vpack.c.bf16 %v2093_v40, %v2093_v40  ;;  %v2062_v6 = vadd.f32 %v5591_v26, %v2023_v58  ;;  %v1607_v52 = vmax.f32 %v6048_v17, %v4288_v44  ;;  %2287 = vst.msk [vmem:[#allocation3] sm:$0xff] %vm2286_vm5, %v6051_v32  ;;  %2288 = vst.msk [vmem:[#allocation3 + $0x8] sm:$0xff] %vm2286_vm5, %v6051_v32 }
 0x17a   : > { %v4290_v28 = vpop.f32.mrf.mxu0  ;;  %v4402_v13 = vpop.f32.mrf.mxu1 }
 0x17b   : > { %2254 = vst.msk [vmem:[#allocation2] sm:$0xf] %vm2253_vm4, %v4008_v37  ;;  %v2094_v14 = vmax.f32 %v2062_v6, 0.0  ;;  %v2024_v62 = vmax.f32 %v1607_v52, %v4400_v4  ;;  %v4291_v11 = vadd.f32 %v4290_v28, %v4289_v3  ;;  %v4403_v1 = vadd.f32 %v4402_v13, %v4401_v42  ;;  %v4908_v52 = vld [vmem:[%s5997_s3 + $0x14] ss:$0 sps:$4 sm:$0x33]  }
 0x17c   : > { %v4292_v53 = vpop.f32.mrf.mxu0  ;;  %v4404_v15 = vpop.f32.mrf.mxu1  ;;  %v6050_v6 = vmax.f32 %v5387_v38, %v5389_v39 }
 0x17d   : > { %v4009_v35 = vpack.c.bf16 %v2094_v14, %v2094_v14  ;;  %v2063_v55 = vadd.f32 %v5591_v26, %v2024_v62  ;;  %v1608_v24 = vmax.f32 %v6049_v25, %v4291_v11 }
 0x17e   : > { %v4293_v2 = vpop.f32.mrf.mxu0  ;;  %v4405_v20 = vpop.f32.mrf.mxu1 }
 0x17f   : > { %2255 = vst.msk [vmem:[#allocation2 + $0x4] sm:$0xf] %vm2253_vm4, %v4009_v35  ;;  %v2095_v21 = vmax.f32 %v2063_v55, 0.0  ;;  %v2025_v8 = vmax.f32 %v1608_v24, %v4403_v1  ;;  %v4294_v40 = vadd.f32 %v4293_v2, %v4292_v53  ;;  %v4406_v58 = vadd.f32 %v4405_v20, %v4404_v15 }
 0x180   : > { %v4295_v4 = vpop.f32.mrf.mxu0  ;;  %v4407_v3 = vpop.f32.mrf.mxu1  ;;  %v6052_v53 = vmax.f32 %v5397_v49, %v5399_v50  ;;  %v2389_v1 = vsel %vm2314_vm2, %v4908_v52, 0  ;;  %v6053_v50 = vmax.f32 %v5405_v56, %v5407_v57 }
 0x181   : > { %v4010_v44 = vpack.c.bf16 %v2095_v21, %v2095_v21  ;;  %v2064_v37 = vadd.f32 %v5591_v26, %v2025_v8  ;;  %v1609_v31 = vmax.f32 %v6050_v6, %v4294_v40 }
 0x182   : > { %v4296_v42 = vpop.f32.mrf.mxu0  ;;  %v4408_v17 = vpop.f32.mrf.mxu1 }
 0x183   : > { %2256 = vst.msk [vmem:[#allocation2 + $0x8] sm:$0xf] %vm2253_vm4, %v4010_v44  ;;  %v2096_v28 = vmax.f32 %v2064_v37, 0.0  ;;  %v2026_v13 = vmax.f32 %v1609_v31, %v4406_v58  ;;  %v4297_v14 = vadd.f32 %v4296_v42, %v4295_v4  ;;  %v4409_v35 = vadd.f32 %v4408_v17, %v4407_v3  ;;  %v4909_v44 = vld [vmem:[%s5997_s3 + $0xc] sm:$0xff]  }
 0x184   : > { %v4298_v62 = vpop.f32.mrf.mxu0  ;;  %v4410_v38 = vpop.f32.mrf.mxu1  ;;  %v4912_v31 = vld [vmem:[%s5997_s3 + $0x2c] ss:$0 sps:$4 sm:$0x33]  }
 0x185   : > { %v4011_v39 = vpack.c.bf16 %v2096_v28, %v2096_v28  ;;  %v2065_v11 = vadd.f32 %v5591_v26, %v2026_v13  ;;  %v1610_v15 = vmax.f32 %v6052_v53, %v4297_v14 }
 0x186   : > { %v4299_v55 = vpop.f32.mrf.mxu0  ;;  %v4411_v25 = vpop.f32.mrf.mxu1  ;;  %v4907_v24 = vld [vmem:[#allocation2] sm:$0xff]  }
 0x187   : > { %2257 = vst.msk [vmem:[#allocation2 + $0xc] sm:$0xf] %vm2253_vm4, %v4011_v39  ;;  %v2097_v2 = vmax.f32 %v2065_v11, 0.0  ;;  %v2027_v20 = vmax.f32 %v1610_v15, %v4409_v35  ;;  %v4300_v21 = vadd.f32 %v4299_v55, %v4298_v62  ;;  %v4412_v8 = vadd.f32 %v4411_v25, %v4410_v38  ;;  %4546 = vmatmul.mubr.msk.bf16.vlgmr.msra.gmra.mxu1 %vm2310_vm6, %v4907_v24 }
 0x188   : > { %v4301_v40 = vpop.f32.mrf.mxu0  ;;  %v4413_v58 = vpop.f32.mrf.mxu1  ;;  %4550 = vmatpush3.bf16.msra.mxu1 %v2389_v1  ;;  %4553 = vmatprep.mubr.msk.bf16.mxu1 %vm4973_vm3, %v6051_v32  ;;  %v6054_v62 = vmax.f32 %v5415_v5, %v5417_v7  ;;  %v2535_v15 = vsel %vm2314_vm2, %v4912_v31, 0  ;;  %v6056_v31 = vmax.f32 %v5433_v33, %v5435_v34 }
 0x189   : > { %v4012_v4 = vpack.c.bf16 %v2097_v2, %v2097_v2  ;;  %v2066_v49 = vadd.f32 %v5591_v26, %v2027_v20  ;;  %v1611_v3 = vmax.f32 %v6053_v50, %v4300_v21  ;;  %4551 = vmatprep.subr.bf16.mxu1 %v6051_v32  ;;  %v6055_v20 = vmax.f32 %v5423_v16, %v5425_v18 }
 0x18a   : > { %v4302_v37 = vpop.f32.mrf.mxu0  ;;  %v4414_v6 = vpop.f32.mrf.mxu1 }
 0x18b   : > { %2258 = vst.msk [vmem:[#allocation2 + $0x10] sm:$0xf] %vm2253_vm4, %v4012_v4  ;;  %v2098_v56 = vmax.f32 %v2066_v49, 0.0  ;;  %v2028_v57 = vmax.f32 %v1611_v3, %v4412_v8  ;;  %v4303_v42 = vadd.f32 %v4302_v37, %v4301_v40  ;;  %v4415_v17 = vadd.f32 %v4414_v6, %v4413_v58  ;;  %v4913_v8 = vld [vmem:[%s5997_s3 + $0x24] sm:$0xff]  }
 0x18c   : > { %v4304_v52 = vpop.f32.mrf.mxu0  ;;  %v4416_v28 = vpop.f32.mrf.mxu1  ;;  %4552 = vmatpush3.bf16.msra.mxu1 %v4909_v44  ;;  %v4915_v4 = vld [vmem:[%s5997_s3 + $0x38] ss:$0 sps:$4 sm:$0x33]  }
 0x18d   : > { %v4013_v13 = vpack.c.bf16 %v2098_v56, %v2098_v56  ;;  %v2067_v14 = vadd.f32 %v5591_v26, %v2028_v57  ;;  %v1612_v38 = vmax.f32 %v6054_v62, %v4303_v42  ;;  %4565 = vmatprep.subr.bf16.mxu1 %v6051_v32 }
 0x18e   : > { %v4305_v39 = vpop.f32.mrf.mxu0  ;;  %v4417_v11 = vpop.f32.mrf.mxu1  ;;  %v4910_v53 = vld [vmem:[#allocation2 + $0x8] sm:$0xff]  }
 0x18f   : > { %2259 = vst.msk [vmem:[#allocation2 + $0x14] sm:$0xf] %vm2253_vm4, %v4013_v13  ;;  %v2099_v35 = vmax.f32 %v2067_v14, 0.0  ;;  %v2029_v55 = vmax.f32 %v1612_v38, %v4415_v17  ;;  %v4306_v25 = vadd.f32 %v4305_v39, %v4304_v52  ;;  %v4418_v24 = vadd.f32 %v4417_v11, %v4416_v28  ;;  %4554 = vmatmul.mubr.msk.bf16.vlgmr.msra.gmra.mxu1 %vm2310_vm6, %v4910_v53 }
 0x190   : > { %v4307_v1 = vpop.f32.mrf.mxu0  ;;  %v4419_v2 = vpop.f32.mrf.mxu1  ;;  %4566 = vmatpush3.bf16.msra.mxu1 %v2535_v15  ;;  %4569 = vmatprep.mubr.msk.bf16.mxu1 %vm4973_vm3, %v6051_v32  ;;  %v2608_v52 = vsel %vm2314_vm2, %v4915_v4, 0  ;;  %v6057_v11 = vmax.f32 %v5441_v43, %v5443_v45  ;;  %v4916_v15 = vld [vmem:[%s5997_s3 + $0x30] sm:$0xff]  }
 0x191   : > { %v4014_v5 = vpack.c.bf16 %v2099_v35, %v2099_v35  ;;  %v2068_v7 = vadd.f32 %v5591_v26, %v2029_v55  ;;  %v1613_v21 = vmax.f32 %v6055_v20, %v4306_v25  ;;  %4567 = vmatprep.subr.bf16.mxu1 %v6051_v32  ;;  %v4918_v25 = vld [vmem:[%s5997_s3 + $0x44] ss:$0 sps:$4 sm:$0x33]  }
 0x192   : > { %v4308_v40 = vpop.f32.mrf.mxu0  ;;  %v4420_v58 = vpop.f32.mrf.mxu1 }
 0x193   : > { %2260 = vst.msk [vmem:[#allocation2 + $0x18] sm:$0xf] %vm2253_vm4, %v4014_v5  ;;  %v2100_v16 = vmax.f32 %v2068_v7, 0.0  ;;  %v2030_v18 = vmax.f32 %v1613_v21, %v4418_v24  ;;  %v4309_v49 = vadd.f32 %v4308_v40, %v4307_v1  ;;  %v4421_v50 = vadd.f32 %v4420_v58, %v4419_v2 }
 0x194   : > { %v4310_v3 = vpop.f32.mrf.mxu0  ;;  %v4422_v44 = vpop.f32.mrf.mxu1  ;;  %4568 = vmatpush3.bf16.msra.mxu1 %v4913_v8  ;;  %v6058_v21 = vmax.f32 %v5451_v60, %v5453_v61 }
 0x195   : > { %v4015_v37 = vpack.c.bf16 %v2100_v16, %v2100_v16  ;;  %v2069_v6 = vadd.f32 %v5591_v26, %v2030_v18  ;;  %v1614_v56 = vmax.f32 %v6056_v31, %v4309_v49  ;;  %4581 = vmatprep.subr.bf16.mxu1 %v6051_v32  ;;  %v2681_v16 = vsel %vm2314_vm2, %v4918_v25, 0 }
 0x196   : > { %v4311_v57 = vpop.f32.mrf.mxu0  ;;  %v4423_v42 = vpop.f32.mrf.mxu1  ;;  %v4911_v17 = vld [vmem:[#allocation2 + $0x10] sm:$0xff]  }
 0x197   : > { %2261 = vst.msk [vmem:[#allocation2 + $0x1c] sm:$0xf] %vm2253_vm4, %v4015_v37  ;;  %v2101_v28 = vmax.f32 %v2069_v6, 0.0  ;;  %v2031_v13 = vmax.f32 %v1614_v56, %v4421_v50  ;;  %v4312_v14 = vadd.f32 %v4311_v57, %v4310_v3  ;;  %v4424_v62 = vadd.f32 %v4423_v42, %v4422_v44  ;;  %4562 = vmatmul.mubr.msk.bf16.vlgmr.msra.gmra.mxu0 %vm2310_vm6, %v4911_v17  ;;  %v4919_v56 = vld [vmem:[%s5997_s3 + $0x3c] sm:$0xff]  }
 0x198   : > { %v4313_v38 = vpop.f32.mrf.mxu0  ;;  %v4425_v39 = vpop.f32.mrf.mxu1  ;;  %4574 = vmatpush3.bf16.msra.mxu0 %v2608_v52  ;;  %4577 = vmatprep.mubr.msk.bf16.mxu0 %vm4973_vm3, %v6051_v32  ;;  %v6059_v6 = vmax.f32 %v5459_v10, %v5461_v12  ;;  %v4921_v17 = vld [vmem:[%s5997_s3 + $0x50] ss:$0 sps:$4 sm:$0x33]  }
 0x199   : > { %v4016_v33 = vpack.c.bf16 %v2101_v28, %v2101_v28  ;;  %v2070_v34 = vadd.f32 %v5591_v26, %v2031_v13  ;;  %v1615_v53 = vmax.f32 %v6057_v11, %v4312_v14  ;;  %4575 = vmatprep.subr.bf16.mxu0 %v6051_v32 }
 0x19a   : > { %v4314_v35 = vpop.f32.mrf.mxu0  ;;  %v4426_v55 = vpop.f32.mrf.mxu1 }
 0x19b   : > { %2262 = vst.msk [vmem:[#allocation2 + $0x20] sm:$0xf] %vm2253_vm4, %v4016_v33  ;;  %v2102_v43 = vmax.f32 %v2070_v34, 0.0  ;;  %v2032_v45 = vmax.f32 %v1615_v53, %v4424_v62  ;;  %v4315_v24 = vadd.f32 %v4314_v35, %v4313_v38  ;;  %v4427_v1 = vadd.f32 %v4426_v55, %v4425_v39 }
 0x19c   : > { %v4316_v2 = vpop.f32.mrf.mxu0  ;;  %v4428_v5 = vpop.f32.mrf.mxu1  ;;  %4576 = vmatpush3.bf16.msra.mxu0 %v4916_v15  ;;  %v6060_v39 = vmax.f32 %v5467_v29, %v5469_v30  ;;  %v2754_v15 = vsel %vm2314_vm2, %v4921_v17, 0  ;;  %v6063_v17 = vmax.f32 %v5489_v23, %v5491_v27 }
 0x19d   : > { %v4017_v7 = vpack.c.bf16 %v2102_v43, %v2102_v43  ;;  %v2071_v20 = vadd.f32 %v5591_v26, %v2032_v45  ;;  %v1616_v8 = vmax.f32 %v6058_v21, %v4315_v24  ;;  %4589 = vmatprep.subr.bf16.mxu0 %v6051_v32  ;;  %v4924_v21 = vld [vmem:[%s5997_s3 + $0x5c] ss:$0 sps:$4 sm:$0x33]  }
 0x19e   : > { %v4317_v40 = vpop.f32.mrf.mxu0  ;;  %v4429_v58 = vpop.f32.mrf.mxu1  ;;  %v4914_v4 = vld [vmem:[#allocation2 + $0x18] sm:$0xff]  }
 0x19f   : > { %2263 = vst.msk [vmem:[#allocation2 + $0x24] sm:$0xf] %vm2253_vm4, %v4017_v7  ;;  %v2103_v18 = vmax.f32 %v2071_v20, 0.0  ;;  %v2033_v49 = vmax.f32 %v1616_v8, %v4427_v1  ;;  %v4318_v50 = vadd.f32 %v4317_v40, %v4316_v2  ;;  %v4430_v3 = vadd.f32 %v4429_v58, %v4428_v5  ;;  %4570 = vmatmul.mubr.msk.bf16.vlgmr.msra.gmra.mxu1 %vm2310_vm6, %v4914_v4  ;;  %v4922_v5 = vld [vmem:[%s5997_s3 + $0x48] sm:$0xff]  }
 0x1a0   : > { %v4319_v44 = vpop.f32.mrf.mxu0  ;;  %v4431_v37 = vpop.f32.mrf.mxu1  ;;  %4582 = vmatpush3.bf16.msra.mxu1 %v2681_v16  ;;  %4585 = vmatprep.mubr.msk.bf16.mxu1 %vm4973_vm3, %v6051_v32  ;;  %v6061_v1 = vmax.f32 %v5477_v47, %v5479_v48 }
 0x1a1   : > { %v4018_v60 = vpack.c.bf16 %v2103_v18, %v2103_v18  ;;  %v2072_v61 = vadd.f32 %v5591_v26, %v2033_v49  ;;  %v1617_v31 = vmax.f32 %v6059_v6, %v4318_v50  ;;  %4583 = vmatprep.subr.bf16.mxu1 %v6051_v32  ;;  %v6062_v49 = vmax.f32 %v5483_v63, %v5485_v0 }
 0x1a2   : > { %v4320_v57 = vpop.f32.mrf.mxu0  ;;  %v4432_v42 = vpop.f32.mrf.mxu1 }
 0x1a3   : > { %2264 = vst.msk [vmem:[#allocation2 + $0x28] sm:$0xf] %vm2253_vm4, %v4018_v60  ;;  %v2104_v10 = vmax.f32 %v2072_v61, 0.0  ;;  %v2034_v12 = vmax.f32 %v1617_v31, %v4430_v3  ;;  %v4321_v52 = vadd.f32 %v4320_v57, %v4319_v44  ;;  %v4433_v28 = vadd.f32 %v4432_v42, %v4431_v37 }
 0x1a4   : > { %v4322_v13 = vpop.f32.mrf.mxu0  ;;  %v4434_v14 = vpop.f32.mrf.mxu1  ;;  %4584 = vmatpush3.bf16.msra.mxu1 %v4919_v56  ;;  %v2827_v60 = vsel %vm2314_vm2, %v4924_v21, 0 }
 0x1a5   : > { %v4019_v62 = vpack.c.bf16 %v2104_v10, %v2104_v10  ;;  %v2073_v38 = vadd.f32 %v5591_v26, %v2034_v12  ;;  %v1618_v33 = vmax.f32 %v6060_v39, %v4321_v52  ;;  %4597 = vmatprep.subr.bf16.mxu1 %v6051_v32  ;;  %v4925_v12 = vld [vmem:[%s5997_s3 + $0x54] sm:$0xff]  }
 0x1a6   : > { %v4323_v34 = vpop.f32.mrf.mxu0  ;;  %v4435_v11 = vpop.f32.mrf.mxu1  ;;  %v4917_v53 = vld [vmem:[#allocation2 + $0x20] sm:$0xff]  }
 0x1a7   : > { %2265 = vst.msk [vmem:[#allocation2 + $0x2c] sm:$0xf] %vm2253_vm4, %v4019_v62  ;;  %v2105_v35 = vmax.f32 %v2073_v38, 0.0  ;;  %v2035_v55 = vmax.f32 %v1618_v33, %v4433_v28  ;;  %v4324_v25 = vadd.f32 %v4323_v34, %v4322_v13  ;;  %v4436_v43 = vadd.f32 %v4435_v11, %v4434_v14  ;;  %4578 = vmatmul.mubr.msk.bf16.vlgmr.msra.gmra.mxu0 %vm2310_vm6, %v4917_v53  ;;  %v4927_v13 = vld [vmem:[%s5997_s3 + $0x68] ss:$0 sps:$4 sm:$0x33]  }
 0x1a8   : > { %v4325_v45 = vpop.f32.mrf.mxu0  ;;  %v4437_v24 = vpop.f32.mrf.mxu1  ;;  %4590 = vmatpush3.bf16.msra.mxu0 %v2754_v15  ;;  %4593 = vmatprep.mubr.msk.bf16.mxu0 %vm4973_vm3, %v6051_v32  ;;  %v6064_v11 = vmax.f32 %v5495_v51, %v5497_v54 }
 0x1a9   : > { %v4020_v29 = vpack.c.bf16 %v2105_v35, %v2105_v35  ;;  %v2074_v30 = vadd.f32 %v5591_v26, %v2035_v55  ;;  %v1619_v2 = vmax.f32 %v6061_v1, %v4324_v25  ;;  %4591 = vmatprep.subr.bf16.mxu0 %v6051_v32  ;;  %v2900_v25 = vsel %vm2314_vm2, %v4927_v13, 0 }
 0x1aa   : > { %v4326_v7 = vpop.f32.mrf.mxu0  ;;  %v4438_v20 = vpop.f32.mrf.mxu1 }
 0x1ab   : > { %2266 = vst.msk [vmem:[#allocation2 + $0x30] sm:$0xf] %vm2253_vm4, %v4020_v29  ;;  %v2106_v47 = vmax.f32 %v2074_v30, 0.0  ;;  %v2036_v48 = vmax.f32 %v1619_v2, %v4436_v43  ;;  %v4327_v8 = vadd.f32 %v4326_v7, %v4325_v45  ;;  %v4439_v40 = vadd.f32 %v4438_v20, %v4437_v24  ;;  %v4928_v7 = vld [vmem:[%s5997_s3 + $0x60] sm:$0xff]  }
 0x1ac   : > { %v4328_v58 = vpop.f32.mrf.mxu0  ;;  %v4440_v4 = vpop.f32.mrf.mxu1  ;;  %4592 = vmatpush3.bf16.msra.mxu0 %v4922_v5  ;;  %v6065_v2 = vmax.f32 %v5501_v9, %v5503_v22 }
 0x1ad   : > { %v4021_v16 = vpack.c.bf16 %v2106_v47, %v2106_v47  ;;  %v2075_v18 = vadd.f32 %v5591_v26, %v2036_v48  ;;  %v1620_v50 = vmax.f32 %v6062_v49, %v4327_v8  ;;  %4605 = vmatprep.subr.bf16.mxu0 %v6051_v32  ;;  %v4930_v47 = vld [vmem:[%s5997_s3 + $0x74] ss:$0 sps:$4 sm:$0x33]  }
 0x1ae   : > { %v4329_v3 = vpop.f32.mrf.mxu0  ;;  %v4441_v44 = vpop.f32.mrf.mxu1  ;;  %v4920_v37 = vld [vmem:[#allocation2 + $0x28] sm:$0xff]  }
 0x1af   : > { %2267 = vst.msk [vmem:[#allocation2 + $0x34] sm:$0xf] %vm2253_vm4, %v4021_v16  ;;  %v2107_v61 = vmax.f32 %v2075_v18, 0.0  ;;  %v2037_v6 = vmax.f32 %v1620_v50, %v4439_v40  ;;  %v4330_v31 = vadd.f32 %v4329_v3, %v4328_v58  ;;  %v4442_v56 = vadd.f32 %v4441_v44, %v4440_v4  ;;  %4586 = vmatmul.mubr.msk.bf16.vlgmr.msra.gmra.mxu1 %vm2310_vm6, %v4920_v37 }
 0x1b0   : > { %v4331_v57 = vpop.f32.mrf.mxu0  ;;  %v4443_v42 = vpop.f32.mrf.mxu1  ;;  %4598 = vmatpush3.bf16.msra.mxu1 %v2827_v60  ;;  %4601 = vmatprep.mubr.msk.bf16.mxu1 %vm4973_vm3, %v6051_v32  ;;  %v6066_v18 = vmax.f32 %v5507_v36, %v5509_v46  ;;  %v2973_v37 = vsel %vm2314_vm2, %v4930_v47, 0 }
 0x1b1   : > { %v4022_v63 = vpack.c.bf16 %v2107_v61, %v2107_v61  ;;  %v2076_v0 = vadd.f32 %v5591_v26, %v2037_v6  ;;  %v1621_v10 = vmax.f32 %v6063_v17, %v4330_v31  ;;  %4599 = vmatprep.subr.bf16.mxu1 %v6051_v32 }
 0x1b2   : > { %v4332_v52 = vpop.f32.mrf.mxu0  ;;  %v4444_v28 = vpop.f32.mrf.mxu1 }
 0x1b3   : > { %2268 = vst.msk [vmem:[#allocation2 + $0x38] sm:$0xf] %vm2253_vm4, %v4022_v63  ;;  %v2108_v23 = vmax.f32 %v2076_v0, 0.0  ;;  %v2038_v27 = vmax.f32 %v1621_v10, %v4442_v56  ;;  %v4333_v14 = vadd.f32 %v4332_v52, %v4331_v57  ;;  %v4445_v62 = vadd.f32 %v4444_v28, %v4443_v42  ;;  %v4931_v0 = vld [vmem:[%s5997_s3 + $0x6c] sm:$0xff]  }
 0x1b4   : > { %v4334_v38 = vpop.f32.mrf.mxu0  ;;  %v4446_v39 = vpop.f32.mrf.mxu1  ;;  %4600 = vmatpush3.bf16.msra.mxu1 %v4925_v12  ;;  %v6067_v42 = vmax.f32 %v5513_v59, %v5515_v19  ;;  %v4933_v12 = vld [vmem:[%s5997_s3 + $0x80] ss:$0 sps:$4 sm:$0x33]  }
 0x1b5   : > { %v4023_v33 = vpack.c.bf16 %v2108_v23, %v2108_v23  ;;  %v2077_v34 = vadd.f32 %v5591_v26, %v2038_v27  ;;  %v1622_v53 = vmax.f32 %v6064_v11, %v4333_v14  ;;  %4613 = vmatprep.subr.bf16.mxu1 %v6051_v32 }
 0x1b6   : > { %v4335_v15 = vpop.f32.mrf.mxu0  ;;  %v4447_v35 = vpop.f32.mrf.mxu1  ;;  %v4923_v55 = vld [vmem:[#allocation2 + $0x30] sm:$0xff]  }
 0x1b7   : > { %2269 = vst.msk [vmem:[#allocation2 + $0x3c] sm:$0xf] %vm2253_vm4, %v4023_v33  ;;  %v2109_v43 = vmax.f32 %v2077_v34, 0.0  ;;  %v2039_v45 = vmax.f32 %v1622_v53, %v4445_v62  ;;  %v4336_v24 = vadd.f32 %v4335_v15, %v4334_v38  ;;  %v4448_v29 = vadd.f32 %v4447_v35, %v4446_v39  ;;  %4594 = vmatmul.mubr.msk.bf16.vlgmr.msra.gmra.mxu0 %vm2310_vm6, %v4923_v55  ;;  %v6068_v62 = vld [vmem:[#allocation4_spill] sm:$0xff] }
 0x1b8   : > { %v4337_v30 = vpop.f32.mrf.mxu0  ;;  %v4449_v1 = vpop.f32.mrf.mxu1  ;;  %4606 = vmatpush3.bf16.msra.mxu0 %v2900_v25  ;;  %4609 = vmatprep.mubr.msk.bf16.mxu0 %vm4973_vm3, %v6051_v32  ;;  %v6069_v38 = vmax.f32 %v5519_v41, %v6068_v62  ;;  %v3046_v53 = vsel %vm2314_vm2, %v4933_v12, 0 }
 0x1b9   : > { %v4024_v51 = vpack.c.bf16 %v2109_v43, %v2109_v43  ;;  %v2078_v54 = vadd.f32 %v5591_v26, %v2039_v45  ;;  %v1623_v5 = vmax.f32 %v6065_v2, %v4336_v24  ;;  %4607 = vmatprep.subr.bf16.mxu0 %v6051_v32 }
 0x1ba   : > { %v4338_v20 = vpop.f32.mrf.mxu0  ;;  %v4450_v21 = vpop.f32.mrf.mxu1 }
 0x1bb   : > { %2270 = vst.msk [vmem:[#allocation2 + $0x40] sm:$0xf] %vm2253_vm4, %v4024_v51  ;;  %v2110_v9 = vmax.f32 %v2078_v54, 0.0  ;;  %v2040_v22 = vmax.f32 %v1623_v5, %v4448_v29  ;;  %v4339_v48 = vadd.f32 %v4338_v20, %v4337_v30  ;;  %v4451_v8 = vadd.f32 %v4450_v21, %v4449_v1  ;;  %v6070_v29 = vld [vmem:[#allocation5_spill] sm:$0xff]  ;;  %v6071_v30 = vld [vmem:[#allocation6_spill] sm:$0xff]  ;;  %v4934_v54 = vld [vmem:[%s5997_s3 + $0x78] sm:$0xff]  }
 0x1bc   : > { %v4340_v40 = vpop.f32.mrf.mxu0  ;;  %v4452_v58 = vpop.f32.mrf.mxu1  ;;  %4608 = vmatpush3.bf16.msra.mxu0 %v4928_v7  ;;  %v6072_v1 = vmax.f32 %v6070_v29, %v6071_v30  ;;  %v4936_v7 = vld [vmem:[%s5997_s3 + $0x8c] ss:$0 sps:$4 sm:$0x33]  }
 0x1bd   : > { %v4025_v4 = vpack.c.bf16 %v2110_v9, %v2110_v9  ;;  %v2079_v16 = vadd.f32 %v5591_v26, %v2040_v22  ;;  %v1624_v49 = vmax.f32 %v6066_v18, %v4339_v48  ;;  %4621 = vmatprep.subr.bf16.mxu0 %v6051_v32 }
 0x1be   : > { %v4341_v50 = vpop.f32.mrf.mxu0  ;;  %v4453_v3 = vpop.f32.mrf.mxu1  ;;  %v4926_v44 = vld [vmem:[#allocation2 + $0x38] sm:$0xff]  }
 0x1bf   : > { %2271 = vst.msk [vmem:[#allocation2 + $0x44] sm:$0xf] %vm2253_vm4, %v4025_v4  ;;  %v2111_v60 = vmax.f32 %v2079_v16, 0.0  ;;  %v2041_v61 = vmax.f32 %v1624_v49, %v4451_v8  ;;  %v4342_v6 = vadd.f32 %v4341_v50, %v4340_v40  ;;  %v4454_v31 = vadd.f32 %v4453_v3, %v4452_v58  ;;  %4602 = vmatmul.mubr.msk.bf16.vlgmr.msra.gmra.mxu1 %vm2310_vm6, %v4926_v44  ;;  %v6073_v58 = vld [vmem:[#allocation7_spill] sm:$0xff]  ;;  %v6074_v4 = vld [vmem:[#allocation8_spill] sm:$0xff] }
 0x1c0   : > { %v4343_v56 = vpop.f32.mrf.mxu0  ;;  %v4455_v57 = vpop.f32.mrf.mxu1  ;;  %4614 = vmatpush3.bf16.msra.mxu1 %v2973_v37  ;;  %4617 = vmatprep.mubr.msk.bf16.mxu1 %vm4973_vm3, %v6051_v32  ;;  %v6075_v16 = vmax.f32 %v6073_v58, %v6074_v4  ;;  %v3119_v44 = vsel %vm2314_vm2, %v4936_v7, 0 }
 0x1c1   : > { %v4026_v36 = vpack.c.bf16 %v2111_v60, %v2111_v60  ;;  %v2080_v46 = vadd.f32 %v5591_v26, %v2041_v61  ;;  %v1625_v63 = vmax.f32 %v6067_v42, %v4342_v6  ;;  %4615 = vmatprep.subr.bf16.mxu1 %v6051_v32  ;;  %v6077_v42 = vld [vmem:[#allocation10_spill] sm:$0xff] }
 0x1c2   : > { %v4344_v17 = vpop.f32.mrf.mxu0  ;;  %v4456_v10 = vpop.f32.mrf.mxu1 }
 0x1c3   : > { %2272 = vst.msk [vmem:[#allocation2 + $0x48] sm:$0xf] %vm2253_vm4, %v4026_v36  ;;  %v2112_v59 = vmax.f32 %v2080_v46, 0.0  ;;  %v2042_v19 = vmax.f32 %v1625_v63, %v4454_v31  ;;  %v4345_v52 = vadd.f32 %v4344_v17, %v4343_v56  ;;  %v4457_v28 = vadd.f32 %v4456_v10, %v4455_v57  ;;  %v6076_v46 = vld [vmem:[#allocation9_spill] sm:$0xff] }
 0x1c4   : > { %v4346_v13 = vpop.f32.mrf.mxu0  ;;  %v4458_v23 = vpop.f32.mrf.mxu1  ;;  %4616 = vmatpush3.bf16.msra.mxu1 %v4931_v0  ;;  %v6078_v63 = vmax.f32 %v6076_v46, %v6077_v42  ;;  %v4937_v17 = vld [vmem:[%s5997_s3 + $0x84] sm:$0xff]  }
 0x1c5   : > { %v4027_v27 = vpack.c.bf16 %v2112_v59, %v2112_v59  ;;  %v2081_v14 = vadd.f32 %v5591_v26, %v2042_v19  ;;  %v1626_v39 = vmax.f32 %v6069_v38, %v4345_v52  ;;  %4629 = vmatprep.subr.bf16.mxu1 %v6051_v32  ;;  %v4939_v59 = vld [vmem:[%s5997_s3 + $0x98] ss:$0 sps:$4 sm:$0x33]   ;;  %v6079_v38 = vld [vmem:[#allocation11_spill] sm:$0xff] }
 0x1c6   : > { %v4347_v33 = vpop.f32.mrf.mxu0  ;;  %v4459_v34 = vpop.f32.mrf.mxu1  ;;  %v4929_v11 = vld [vmem:[#allocation2 + $0x40] sm:$0xff]  }
 0x1c7   : > { %2273 = vst.msk [vmem:[#allocation2 + $0x4c] sm:$0xf] %vm2253_vm4, %v4027_v27  ;;  %v2113_v15 = vmax.f32 %v2081_v14, 0.0  ;;  %v2043_v35 = vmax.f32 %v1626_v39, %v4457_v28  ;;  %v4348_v55 = vadd.f32 %v4347_v33, %v4346_v13  ;;  %v4460_v25 = vadd.f32 %v4459_v34, %v4458_v23  ;;  %4610 = vmatmul.mubr.msk.bf16.vlgmr.msra.gmra.mxu0 %vm2310_vm6, %v4929_v11  ;;  %v6080_v39 = vld [vmem:[#allocation12_spill] sm:$0xff] }
 0x1c8   : > { %v4349_v43 = vpop.f32.mrf.mxu0  ;;  %v4461_v45 = vpop.f32.mrf.mxu1  ;;  %4622 = vmatpush3.bf16.msra.mxu0 %v3046_v53  ;;  %4625 = vmatprep.mubr.msk.bf16.mxu0 %vm4973_vm3, %v6051_v32  ;;  %v6081_v33 = vmax.f32 %v6079_v38, %v6080_v39 }
 0x1c9   : > { %v4028_v41 = vpack.c.bf16 %v2113_v15, %v2113_v15  ;;  %v2082_v24 = vadd.f32 %v5591_v26, %v2043_v35  ;;  %v1627_v51 = vmax.f32 %v6072_v1, %v4348_v55  ;;  %4623 = vmatprep.subr.bf16.mxu0 %v6051_v32  ;;  %v3192_v35 = vsel %vm2314_vm2, %v4939_v59, 0  ;;  %v6082_v1 = vld [vmem:[#allocation13_spill] sm:$0xff] }
 0x1ca   : > { %v4350_v2 = vpop.f32.mrf.mxu0  ;;  %v4462_v5 = vpop.f32.mrf.mxu1 }
 0x1cb   : > { %2274 = vst.msk [vmem:[#allocation2 + $0x50] sm:$0xf] %vm2253_vm4, %v4028_v41  ;;  %v2114_v20 = vmax.f32 %v2082_v24, 0.0  ;;  %v2044_v21 = vmax.f32 %v1627_v51, %v4460_v25  ;;  %v4351_v47 = vadd.f32 %v4350_v2, %v4349_v43  ;;  %v4463_v9 = vadd.f32 %v4462_v5, %v4461_v45  ;;  %v6083_v51 = vld [vmem:[#allocation14_spill] sm:$0xff]  ;;  %v4940_v5 = vld [vmem:[%s5997_s3 + $0x90] sm:$0xff]  }
 0x1cc   : > { %v4352_v22 = vpop.f32.mrf.mxu0  ;;  %v4464_v48 = vpop.f32.mrf.mxu1  ;;  %4624 = vmatpush3.bf16.msra.mxu0 %v4934_v54  ;;  %v6084_v54 = vmax.f32 %v6082_v1, %v6083_v51 }
 0x1cd   : > { %v4029_v8 = vpack.c.bf16 %v2114_v20, %v2114_v20  ;;  %v2083_v40 = vadd.f32 %v5591_v26, %v2044_v21  ;;  %v1628_v18 = vmax.f32 %v6075_v16, %v4351_v47  ;;  %4637 = vmatprep.subr.bf16.mxu0 %v6051_v32  ;;  %v4942_v21 = vld [vmem:[%s5997_s3 + $0xa4] ss:$0 sps:$4 sm:$0x33]   ;;  %v6085_v16 = vld [vmem:[#allocation15_spill] sm:$0xff] }
 0x1ce   : > { %v4353_v49 = vpop.f32.mrf.mxu0  ;;  %v4465_v50 = vpop.f32.mrf.mxu1  ;;  %v4932_v3 = vld [vmem:[#allocation2 + $0x48] sm:$0xff]  }
 0x1cf   : > { %2275 = vst.msk [vmem:[#allocation2 + $0x54] sm:$0xf] %vm2253_vm4, %v4029_v8  ;;  %v2115_v37 = vmax.f32 %v2083_v40, 0.0  ;;  %v2045_v60 = vmax.f32 %v1628_v18, %v4463_v9  ;;  %v4354_v61 = vadd.f32 %v4353_v49, %v4352_v22  ;;  %v4466_v6 = vadd.f32 %v4465_v50, %v4464_v48  ;;  %4618 = vmatmul.mubr.msk.bf16.vlgmr.msra.gmra.mxu1 %vm2310_vm6, %v4932_v3  ;;  %v6086_v18 = vld [vmem:[#allocation16_spill] sm:$0xff] }
 0x1d0   : > { %v4355_v31 = vpop.f32.mrf.mxu0  ;;  %v4467_v56 = vpop.f32.mrf.mxu1  ;;  %4630 = vmatpush3.bf16.msra.mxu1 %v3119_v44  ;;  %4633 = vmatprep.mubr.msk.bf16.mxu1 %vm4973_vm3, %v6051_v32  ;;  %v6087_v49 = vmax.f32 %v6085_v16, %v6086_v18  ;;  %v6097_v16 = vld [vmem:[#allocation23_spill] sm:$0xff]  ;;  %v6098_v18 = vld [vmem:[#allocation24_spill] sm:$0xff] }
 0x1d1   : > { %v4030_v57 = vpack.c.bf16 %v2115_v37, %v2115_v37  ;;  %v2084_v36 = vadd.f32 %v5591_v26, %v2045_v60  ;;  %v1629_v0 = vmax.f32 %v6078_v63, %v4354_v61  ;;  %4631 = vmatprep.subr.bf16.mxu1 %v6051_v32  ;;  %v3265_v60 = vsel %vm2314_vm2, %v4942_v21, 0  ;;  %v6088_v63 = vld [vmem:[#allocation17_spill] sm:$0xff] }
 0x1d2   : > { %v4356_v10 = vpop.f32.mrf.mxu0  ;;  %v4468_v12 = vpop.f32.mrf.mxu1 }
 0x1d3   : > { %2276 = vst.msk [vmem:[#allocation2 + $0x58] sm:$0xf] %vm2253_vm4, %v4030_v57  ;;  %v2116_v19 = vmax.f32 %v2084_v36, 0.0  ;;  %v2046_v52 = vmax.f32 %v1629_v0, %v4466_v6  ;;  %v4357_v28 = vadd.f32 %v4356_v10, %v4355_v31  ;;  %v4469_v13 = vadd.f32 %v4468_v12, %v4467_v56  ;;  %v6089_v0 = vld [vmem:[#allocation18_spill] sm:$0xff]  ;;  %v4943_v12 = vld [vmem:[%s5997_s3 + $0x9c] sm:$0xff]  }
 0x1d4   : > { %v4358_v23 = vpop.f32.mrf.mxu0  ;;  %v4470_v27 = vpop.f32.mrf.mxu1  ;;  %4632 = vmatpush3.bf16.msra.mxu1 %v4937_v17  ;;  %v6090_v17 = vmax.f32 %v6088_v63, %v6089_v0 }
 0x1d5   : > { %v4031_v14 = vpack.c.bf16 %v2116_v19, %v2116_v19  ;;  %v2085_v62 = vadd.f32 %v5591_v26, %v2046_v52  ;;  %v1630_v34 = vmax.f32 %v6081_v33, %v4357_v28  ;;  %4645 = vmatprep.subr.bf16.mxu1 %v6051_v32  ;;  %v4945_v52 = vld [vmem:[%s5997_s3 + $0xb0] ss:$0 sps:$4 sm:$0x33]  }
 0x1d6   : > { %v4359_v11 = vpop.f32.mrf.mxu0  ;;  %v4471_v53 = vpop.f32.mrf.mxu1  ;;  %v4935_v15 = vld [vmem:[#allocation2 + $0x50] sm:$0xff]   ;;  %v6091_v33 = vld [vmem:[#allocation19_spill] sm:$0xff] }
 0x1d7   : > { %2277 = vst.msk [vmem:[#allocation2 + $0x5c] sm:$0xf] %vm2253_vm4, %v4031_v14  ;;  %v2117_v55 = vmax.f32 %v2085_v62, 0.0  ;;  %v2047_v25 = vmax.f32 %v1630_v34, %v4469_v13  ;;  %v4360_v43 = vadd.f32 %v4359_v11, %v4358_v23  ;;  %v4472_v45 = vadd.f32 %v4471_v53, %v4470_v27  ;;  %4626 = vmatmul.mubr.msk.bf16.vlgmr.msra.gmra.mxu0 %vm2310_vm6, %v4935_v15  ;;  %v6092_v34 = vld [vmem:[#allocation20_spill] sm:$0xff] }
 0x1d8   : > { %v4361_v41 = vpop.f32.mrf.mxu0  ;;  %v4473_v24 = vpop.f32.mrf.mxu1  ;;  %4638 = vmatpush3.bf16.msra.mxu0 %v3192_v35  ;;  %4641 = vmatprep.mubr.msk.bf16.mxu0 %vm4973_vm3, %v6051_v32  ;;  %v6093_v11 = vmax.f32 %v6091_v33, %v6092_v34 }
 0x1d9   : > { %v4032_v29 = vpack.c.bf16 %v2117_v55, %v2117_v55  ;;  %v2086_v30 = vadd.f32 %v5591_v26, %v2047_v25  ;;  %v1631_v2 = vmax.f32 %v6084_v54, %v4360_v43  ;;  %4639 = vmatprep.subr.bf16.mxu0 %v6051_v32  ;;  %v3338_v25 = vsel %vm2314_vm2, %v4945_v52, 0  ;;  %v6094_v54 = vld [vmem:[#allocation21_spill] sm:$0xff] }
 0x1da   : > { %v4362_v7 = vpop.f32.mrf.mxu0  ;;  %v4474_v20 = vpop.f32.mrf.mxu1 }
 0x1db   : > { %2278 = vst.msk [vmem:[#allocation2 + $0x60] sm:$0xf] %vm2253_vm4, %v4032_v29  ;;  %v2118_v47 = vmax.f32 %v2086_v30, 0.0  ;;  %v2048_v9 = vmax.f32 %v1631_v2, %v4472_v45  ;;  %v4363_v22 = vadd.f32 %v4362_v7, %v4361_v41  ;;  %v4475_v48 = vadd.f32 %v4474_v20, %v4473_v24  ;;  %v6095_v2 = vld [vmem:[#allocation22_spill] sm:$0xff] }
 0x1dc   : > { %v4364_v8 = vpop.f32.mrf.mxu0  ;;  %v4476_v40 = vpop.f32.mrf.mxu1  ;;  %4640 = vmatpush3.bf16.msra.mxu0 %v4940_v5  ;;  %v6096_v5 = vmax.f32 %v6094_v54, %v6095_v2  ;;  %v4946_v20 = vld [vmem:[%s5997_s3 + $0xa8] sm:$0xff]  }
 0x1dd   : > { %v4033_v58 = vpack.c.bf16 %v2118_v47, %v2118_v47  ;;  %v2087_v4 = vadd.f32 %v5591_v26, %v2048_v9  ;;  %v1632_v50 = vmax.f32 %v6087_v49, %v4363_v22  ;;  %4653 = vmatprep.subr.bf16.mxu0 %v6051_v32  ;;  %v6099_v49 = vmax.f32 %v6097_v16, %v6098_v18  ;;  %v4953_v2 = vld [vmem:[%s5999_s5 + $0x8] sm:$0xff]  }
 0x1de   : > { %v4365_v3 = vpop.f32.mrf.mxu0  ;;  %v4477_v44 = vpop.f32.mrf.mxu1  ;;  %v4938_v37 = vld [vmem:[#allocation2 + $0x58] sm:$0xff]  }
 0x1df   : > { %2279 = vst.msk [vmem:[#allocation2 + $0x64] sm:$0xf] %vm2253_vm4, %v4033_v58  ;;  %v2119_v61 = vmax.f32 %v2087_v4, 0.0  ;;  %v2049_v6 = vmax.f32 %v1632_v50, %v4475_v48  ;;  %v4366_v31 = vadd.f32 %v4365_v3, %v4364_v8  ;;  %v4478_v56 = vadd.f32 %v4477_v44, %v4476_v40  ;;  %4634 = vmatmul.mubr.msk.bf16.vlgmr.msra.gmra.mxu1 %vm2310_vm6, %v4938_v37  ;;  %v4963_v58 = vld [vmem:[%s5996_s2] ss:$0 sm:$0xff] }
 0x1e0   : > { %v4367_v57 = vpop.f32.mrf.mxu0  ;;  %v4479_v36 = vpop.f32.mrf.mxu1  ;;  %4646 = vmatpush3.bf16.msra.mxu1 %v3265_v60  ;;  %4649 = vmatprep.mubr.msk.bf16.mxu1 %vm4973_vm3, %v6051_v32 }
 0x1e1   : > { %v4034_v46 = vpack.c.bf16 %v2119_v61, %v2119_v61  ;;  %v2088_v42 = vadd.f32 %v5591_v26, %v2049_v6  ;;  %v1633_v10 = vmax.f32 %v6090_v17, %v4366_v31  ;;  %4647 = vmatprep.subr.bf16.mxu1 %v6051_v32  ;;  %v4949_v31 = vld [vmem:[%s5997_s3 + $0xb4] sm:$0xff]  }
 0x1e2   : > { %v4368_v59 = vpop.f32.mrf.mxu0  ;;  %v4480_v19 = vpop.f32.mrf.mxu1 }
 0x1e3   : > { %2280 = vst.msk [vmem:[#allocation2 + $0x68] sm:$0xf] %vm2253_vm4, %v4034_v46  ;;  %v2120_v28 = vmax.f32 %v2088_v42, 0.0  ;;  %v2050_v13 = vmax.f32 %v1633_v10, %v4478_v56  ;;  %v4369_v23 = vadd.f32 %v4368_v59, %v4367_v57  ;;  %v4481_v27 = vadd.f32 %v4480_v19, %v4479_v36  ;;  %v2289_v42 = vld [vmem:[#allocation3] sm:$0xff]  ;;  %v2290_v10 = vld [vmem:[#allocation3 + $0x8] sm:$0xff] }
 0x1e4   : > { %v4370_v14 = vpop.f32.mrf.mxu0  ;;  %v4482_v62 = vpop.f32.mrf.mxu1  ;;  %4648 = vmatpush3.bf16.msra.mxu1 %v4943_v12 }
 0x1e5   : > { %v4035_v38 = vpack.c.bf16 %v2120_v28, %v2120_v28  ;;  %v2089_v39 = vadd.f32 %v5591_v26, %v2050_v13  ;;  %v1634_v53 = vmax.f32 %v6093_v11, %v4369_v23  ;;  %4661 = vmatprep.subr.bf16.mxu1 %v6051_v32 }
 0x1e6   : > { %v4371_v15 = vpop.f32.mrf.mxu0  ;;  %v4483_v35 = vpop.f32.mrf.mxu1  ;;  %v4941_v55 = vld [vmem:[#allocation2 + $0x60] sm:$0xff]  }
 0x1e7   : > { %2281 = vst.msk [vmem:[#allocation2 + $0x6c] sm:$0xf] %vm2253_vm4, %v4035_v38  ;;  %v2121_v43 = vmax.f32 %v2089_v39, 0.0  ;;  %v2051_v45 = vmax.f32 %v1634_v53, %v4481_v27  ;;  %v4372_v41 = vadd.f32 %v4371_v15, %v4370_v14  ;;  %v4484_v24 = vadd.f32 %v4483_v35, %v4482_v62  ;;  %4642 = vmatmul.mubr.msk.bf16.vlgmr.msra.gmra.mxu0 %vm2310_vm6, %v4941_v55 }
 0x1e8   : > { %v4373_v29 = vpop.f32.mrf.mxu0  ;;  %v4485_v30 = vpop.f32.mrf.mxu1  ;;  %4654 = vmatpush3.bf16.msra.mxu0 %v3338_v25  ;;  %4657 = vmatprep.mubr.msk.bf16.mxu0 %vm4973_vm3, %v6051_v32 }
 0x1e9   : > { %v4036_v1 = vpack.c.bf16 %v2121_v43, %v2121_v43  ;;  %v2090_v51 = vadd.f32 %v5591_v26, %v2051_v45  ;;  %v1635_v7 = vmax.f32 %v6096_v5, %v4372_v41  ;;  %4655 = vmatprep.subr.bf16.mxu0 %v6051_v32  ;;  %v4948_v26 = vld [vmem:[%s5997_s3 + $0xbc] ss:$0 sps:$4 sm:$0x33]   ;;  %v4951_v43 = vld [vmem:[%s5999_s5 + $0x18] ss:$0 sps:$4 sm:$0x11]  }
 0x1ea   : > { %v4374_v21 = vpop.f32.mrf.mxu0  ;;  %v4486_v47 = vpop.f32.mrf.mxu1  ;;  %v3411_v44 = vsel %vm2314_vm2, %v4948_v26, 0  ;;  %v3512_v41 = vsel %vm3510_vm7, %v4951_v43, 0 }
 0x1eb   : > { %2282 = vst.msk [vmem:[#allocation2 + $0x70] sm:$0xf] %vm2253_vm4, %v4036_v1  ;;  %v2122_v9 = vmax.f32 %v2090_v51, 0.0  ;;  %v2052_v22 = vmax.f32 %v1635_v7, %v4484_v24  ;;  %v4375_v48 = vadd.f32 %v4374_v21, %v4373_v29  ;;  %v4487_v8 = vadd.f32 %v4486_v47, %v4485_v30  ;;  %v4952_v29 = vld [vmem:[%s5999_s5 + $0x10] sm:$0xff]   ;;  %v4954_v47 = vld [vmem:[%s5999_s5] sm:$0xff]  }
 0x1ec   : > { %4656 = vmatpush3.bf16.msra.mxu0 %v4946_v20 }
 0x1ed   : > { %v4037_v40 = vpack.c.bf16 %v2122_v9, %v2122_v9  ;;  %v2091_v4 = vadd.f32 %v4963_v58, %v2052_v22  ;;  %v1636_v50 = vmax.f32 %v6099_v49, %v4375_v48  ;;  %4669 = vmatprep.subr.bf16.mxu0 %v6051_v32 }
 0x1ee   : > { %v4944_v3 = vld [vmem:[#allocation2 + $0x68] sm:$0xff]  }
 0x1ef   : > { %2283 = vst.msk [vmem:[#allocation2 + $0x74] sm:$0xf] %vm2253_vm4, %v4037_v40  ;;  %v2123_v37 = vmax.f32 %v2091_v4, 0.0  ;;  %v2053_v60 = vmax.f32 %v1636_v50, %v4487_v8  ;;  %4650 = vmatmul.mubr.msk.bf16.vlgmr.msra.gmra.mxu1 %vm2310_vm6, %v4944_v3 }
 0x1f0   : > { %4662 = vmatpush3.bf16.msra.mxu1 %v3411_v44  ;;  %4665 = vmatprep.mubr.msk.bf16.mxu1 %vm4973_vm3, %v6051_v32 }
 0x1f1   : > { %v4038_v61 = vpack.c.bf16 %v2123_v37, %v2123_v37  ;;  %v2092_v6 = vadd.f32 %v4963_v58, %v2053_v60  ;;  %4663 = vmatprep.subr.bf16.mxu1 %v6051_v32 }
 0x1f3   : > { %2284 = vst.msk [vmem:[#allocation2 + $0x78] sm:$0xf] %vm2253_vm4, %v4038_v61  ;;  %v2124_v56 = vmax.f32 %v2092_v6, 0.0 }
 0x1f4   : > { %4664 = vmatpush3.bf16.msra.mxu1 %v4949_v31 }
 0x1f5   : > { %v4039_v57 = vpack.c.bf16 %v2124_v56, %v2124_v56 }
 0x1f6   : > { %v4947_v36 = vld [vmem:[#allocation2 + $0x70] sm:$0xff]  }
 0x1f7   : > { %2285 = vst.msk [vmem:[#allocation2 + $0x7c] sm:$0xf] %vm2253_vm4, %v4039_v57  ;;  %4658 = vmatmul.mubr.msk.bf16.vlgmr.msra.gmra.mxu0 %vm2310_vm6, %v4947_v36 }
 0x1f8   : > { %4677 = vmatprep.mubr.msk.bf16.mxu0 %vm4973_vm3, %v6051_v32  ;;  %4670 = vmatpush3.bf16.msra.mxu0 %v3512_v41 }
 0x1f9   : > { %4671 = vmatprep.subr.bf16.mxu0 %v6051_v32 }
 0x1fc   : > { %4672 = vmatpush3.bf16.msra.mxu0 %v4952_v29 }
 0x1fd   : > { %4673 = vmatprep.subr.bf16.mxu0 %v6051_v32 }
 0x1fe   : > { %v4950_v46 = vld [vmem:[#allocation2 + $0x78] sm:$0xff]  }
 0x1ff   : > { %4666 = vmatmul.mubr.msk.bf16.vlgmr.msra.gmra.mxu1 %vm2310_vm6, %v4950_v46 }
 0x200   : > { %4674 = vmatpush3.bf16.msra.mxu0 %v4953_v2 }
 0x201   : > { %4675 = vmatprep.subr.bf16.mxu0 %v6051_v32 }
 0x204   : > { %4676 = vmatpush3.bf16.msra.mxu0 %v4954_v47 }
 0x247   : > { %v2352_v63 = vpop.f32.mrf.mxu1 }
 0x248   : > { %v2359_v0 = vadd.f32 %v2352_v63, %v2289_v42 }
 0x249   : > { %v4547_v17 = vpop.f32.mrf.mxu1 }
 0x24a   : > { %2361 = vst.msk [vmem:[#allocation3] sm:$0xff] %vm2286_vm5, %v2359_v0 }
 0x24b   : > { %v2355_v12 = vpop.f32.mrf.mxu1 }
 0x24c   : > { %v2360_v59 = vadd.f32 %v2355_v12, %v2290_v10 }
 0x24d   : > { %v4548_v19 = vpop.f32.mrf.mxu1 }
 0x24e   : > { %2362 = vst.msk [vmem:[#allocation3 + $0x8] sm:$0xff] %vm2286_vm5, %v2360_v59 }
 0x24f   : > { %v2425_v52 = vpop.f32.mrf.mxu1 }
 0x251   : > { %v2363_v28 = vld [vmem:[#allocation3] sm:$0xff]  ;;  %v4555_v13 = vpop.f32.mrf.mxu1 }
 0x252   : > { %v2432_v23 = vadd.f32 %v2425_v52, %v2363_v28 }
 0x253   : > { %v2428_v27 = vpop.f32.mrf.mxu1 }
 0x254   : > { %2434 = vst.msk [vmem:[#allocation3] sm:$0xff] %vm2286_vm5, %v2432_v23 }
 0x255   : > { %v2364_v14 = vld [vmem:[#allocation3 + $0x8] sm:$0xff]  ;;  %v4556_v62 = vpop.f32.mrf.mxu1 }
 0x256   : > { %v2433_v38 = vadd.f32 %v2428_v27, %v2364_v14 }
 0x257   : > { %v2498_v39 = vpop.f32.mrf.mxu0 }
 0x258   : > { %2435 = vst.msk [vmem:[#allocation3 + $0x8] sm:$0xff] %vm2286_vm5, %v2433_v38 }
 0x259   : > { %v4563_v33 = vpop.f32.mrf.mxu0 }
 0x25b   : > { %v2436_v34 = vld [vmem:[#allocation3] sm:$0xff]  ;;  %v2501_v11 = vpop.f32.mrf.mxu0 }
 0x25c   : > { %v2505_v53 = vadd.f32 %v2498_v39, %v2436_v34 }
 0x25d   : > { %v4564_v15 = vpop.f32.mrf.mxu0 }
 0x25e   : > { %2507 = vst.msk [vmem:[#allocation3] sm:$0xff] %vm2286_vm5, %v2505_v53 }
 0x25f   : > { %v2437_v35 = vld [vmem:[#allocation3 + $0x8] sm:$0xff]  ;;  %v2571_v55 = vpop.f32.mrf.mxu1 }
 0x260   : > { %v2506_v25 = vadd.f32 %v2501_v11, %v2437_v35 }
 0x261   : > { %v4571_v45 = vpop.f32.mrf.mxu1 }
 0x262   : > { %2508 = vst.msk [vmem:[#allocation3 + $0x8] sm:$0xff] %vm2286_vm5, %v2506_v25 }
 0x263   : > { %v2574_v24 = vpop.f32.mrf.mxu1 }
 0x265   : > { %v2509_v30 = vld [vmem:[#allocation3] sm:$0xff]  ;;  %v4572_v1 = vpop.f32.mrf.mxu1 }
 0x266   : > { %v2578_v51 = vadd.f32 %v2571_v55, %v2509_v30 }
 0x267   : > { %v2644_v54 = vpop.f32.mrf.mxu0 }
 0x268   : > { %2580 = vst.msk [vmem:[#allocation3] sm:$0xff] %vm2286_vm5, %v2578_v51 }
 0x269   : > { %v2510_v5 = vld [vmem:[#allocation3 + $0x8] sm:$0xff]  ;;  %v4579_v7 = vpop.f32.mrf.mxu0 }
 0x26a   : > { %v2579_v20 = vadd.f32 %v2574_v24, %v2510_v5 }
 0x26b   : > { %v2647_v21 = vpop.f32.mrf.mxu0 }
 0x26c   : > { %2581 = vst.msk [vmem:[#allocation3 + $0x8] sm:$0xff] %vm2286_vm5, %v2579_v20 }
 0x26d   : > { %v4580_v26 = vpop.f32.mrf.mxu0 }
 0x26f   : > { %v2582_v9 = vld [vmem:[#allocation3] sm:$0xff]  ;;  %v2717_v22 = vpop.f32.mrf.mxu1 }
 0x270   : > { %v2651_v48 = vadd.f32 %v2644_v54, %v2582_v9 }
 0x271   : > { %v4587_v8 = vpop.f32.mrf.mxu1 }
 0x272   : > { %2653 = vst.msk [vmem:[#allocation3] sm:$0xff] %vm2286_vm5, %v2651_v48 }
 0x273   : > { %v2583_v40 = vld [vmem:[#allocation3 + $0x8] sm:$0xff]  ;;  %v2720_v58 = vpop.f32.mrf.mxu1 }
 0x274   : > { %v2652_v4 = vadd.f32 %v2647_v21, %v2583_v40 }
 0x275   : > { %v4588_v16 = vpop.f32.mrf.mxu1 }
 0x276   : > { %2654 = vst.msk [vmem:[#allocation3 + $0x8] sm:$0xff] %vm2286_vm5, %v2652_v4 }
 0x277   : > { %v2790_v18 = vpop.f32.mrf.mxu0 }
 0x279   : > { %v2655_v49 = vld [vmem:[#allocation3] sm:$0xff]  ;;  %v4595_v50 = vpop.f32.mrf.mxu0 }
 0x27a   : > { %v2724_v3 = vadd.f32 %v2717_v22, %v2655_v49 }
 0x27b   : > { %v2793_v44 = vpop.f32.mrf.mxu0 }
 0x27c   : > { %2726 = vst.msk [vmem:[#allocation3] sm:$0xff] %vm2286_vm5, %v2724_v3 }
 0x27d   : > { %v2656_v32 = vld [vmem:[#allocation3 + $0x8] sm:$0xff]  ;;  %v4596_v37 = vpop.f32.mrf.mxu0 }
 0x27e   : > { %v2725_v60 = vadd.f32 %v2720_v58, %v2656_v32 }
 0x27f   : > { %v2863_v61 = vpop.f32.mrf.mxu1 }
 0x280   : > { %2727 = vst.msk [vmem:[#allocation3 + $0x8] sm:$0xff] %vm2286_vm5, %v2725_v60 }
 0x281   : > { %v4603_v6 = vpop.f32.mrf.mxu1 }
 0x283   : > { %v2728_v31 = vld [vmem:[#allocation3] sm:$0xff]  ;;  %v2866_v56 = vpop.f32.mrf.mxu1 }
 0x284   : > { %v2797_v57 = vadd.f32 %v2790_v18, %v2728_v31 }
 0x285   : > { %v4604_v36 = vpop.f32.mrf.mxu1 }
 0x286   : > { %2799 = vst.msk [vmem:[#allocation3] sm:$0xff] %vm2286_vm5, %v2797_v57 }
 0x287   : > { %v2729_v46 = vld [vmem:[#allocation3 + $0x8] sm:$0xff]  ;;  %v2936_v42 = vpop.f32.mrf.mxu0 }
 0x288   : > { %v2798_v63 = vadd.f32 %v2793_v44, %v2729_v46 }
 0x289   : > { %v4611_v0 = vpop.f32.mrf.mxu0 }
 0x28a   : > { %2800 = vst.msk [vmem:[#allocation3 + $0x8] sm:$0xff] %vm2286_vm5, %v2798_v63 }
 0x28b   : > { %v2939_v17 = vpop.f32.mrf.mxu0 }
 0x28d   : > { %v2801_v10 = vld [vmem:[#allocation3] sm:$0xff]  ;;  %v4612_v12 = vpop.f32.mrf.mxu0 }
 0x28e   : > { %v2870_v59 = vadd.f32 %v2863_v61, %v2801_v10 }
 0x28f   : > { %v3009_v19 = vpop.f32.mrf.mxu1 }
 0x290   : > { %2872 = vst.msk [vmem:[#allocation3] sm:$0xff] %vm2286_vm5, %v2870_v59  ;;  %v3998_v59 = vld [vmem:[%s5998_s4] ss:$0 sm:$0xff] }
 0x291   : > { %v2802_v52 = vld [vmem:[#allocation3 + $0x8] sm:$0xff]  ;;  %v4619_v28 = vpop.f32.mrf.mxu1 }
 0x292   : > { %v2871_v13 = vadd.f32 %v2866_v56, %v2802_v52 }
 0x293   : > { %v3012_v23 = vpop.f32.mrf.mxu1 }
 0x294   : > { %2873 = vst.msk [vmem:[#allocation3 + $0x8] sm:$0xff] %vm2286_vm5, %v2871_v13 }
 0x295   : > { %v4620_v27 = vpop.f32.mrf.mxu1 }
 0x297   : > { %v2874_v14 = vld [vmem:[#allocation3] sm:$0xff]  ;;  %v3082_v62 = vpop.f32.mrf.mxu0 }
 0x298   : > { %v2943_v38 = vadd.f32 %v2936_v42, %v2874_v14  ;;  %v3999_v14 = vld [vmem:[%s6000_s6] ss:$0 sm:$0xff] }
 0x299   : > { %v4627_v39 = vpop.f32.mrf.mxu0 }
 0x29a   : > { %2945 = vst.msk [vmem:[#allocation3] sm:$0xff] %vm2286_vm5, %v2943_v38 }
 0x29b   : > { %v2875_v33 = vld [vmem:[#allocation3 + $0x8] sm:$0xff]  ;;  %v3085_v34 = vpop.f32.mrf.mxu0 }
 0x29c   : > { %v2944_v11 = vadd.f32 %v2939_v17, %v2875_v33 }
 0x29d   : > { %v4628_v53 = vpop.f32.mrf.mxu0 }
 0x29e   : > { %2946 = vst.msk [vmem:[#allocation3 + $0x8] sm:$0xff] %vm2286_vm5, %v2944_v11 }
 0x29f   : > { %v3155_v15 = vpop.f32.mrf.mxu1 }
 0x2a1   : > { %v2947_v35 = vld [vmem:[#allocation3] sm:$0xff]  ;;  %v4635_v55 = vpop.f32.mrf.mxu1 }
 0x2a2   : > { %v3016_v25 = vadd.f32 %v3009_v19, %v2947_v35 }
 0x2a3   : > { %v3158_v43 = vpop.f32.mrf.mxu1 }
 0x2a4   : > { %3018 = vst.msk [vmem:[#allocation3] sm:$0xff] %vm2286_vm5, %v3016_v25 }
 0x2a5   : > { %v2948_v45 = vld [vmem:[#allocation3 + $0x8] sm:$0xff]  ;;  %v4636_v41 = vpop.f32.mrf.mxu1 }
 0x2a6   : > { %v3017_v24 = vadd.f32 %v3012_v23, %v2948_v45 }
 0x2a7   : > { %v3228_v29 = vpop.f32.mrf.mxu0 }
 0x2a8   : > { %3019 = vst.msk [vmem:[#allocation3 + $0x8] sm:$0xff] %vm2286_vm5, %v3017_v24 }
 0x2a9   : > { %v4643_v30 = vpop.f32.mrf.mxu0 }
 0x2ab   : > { %v3020_v1 = vld [vmem:[#allocation3] sm:$0xff]  ;;  %v3231_v51 = vpop.f32.mrf.mxu0 }
 0x2ac   : > { %v3089_v54 = vadd.f32 %v3082_v62, %v3020_v1 }
 0x2ad   : > { %v4644_v2 = vpop.f32.mrf.mxu0 }
 0x2ae   : > { %3091 = vst.msk [vmem:[#allocation3] sm:$0xff] %vm2286_vm5, %v3089_v54 }
 0x2af   : > { %v3021_v5 = vld [vmem:[#allocation3 + $0x8] sm:$0xff]  ;;  %v3301_v7 = vpop.f32.mrf.mxu1 }
 0x2b0   : > { %v3090_v20 = vadd.f32 %v3085_v34, %v3021_v5 }
 0x2b1   : > { %v4651_v21 = vpop.f32.mrf.mxu1 }
 0x2b2   : > { %3092 = vst.msk [vmem:[#allocation3 + $0x8] sm:$0xff] %vm2286_vm5, %v3090_v20 }
 0x2b3   : > { %v3304_v47 = vpop.f32.mrf.mxu1 }
 0x2b5   : > { %v3093_v26 = vld [vmem:[#allocation3] sm:$0xff]  ;;  %v4652_v9 = vpop.f32.mrf.mxu1 }
 0x2b6   : > { %v3162_v22 = vadd.f32 %v3155_v15, %v3093_v26 }
 0x2b7   : > { %v3374_v48 = vpop.f32.mrf.mxu0 }
 0x2b8   : > { %3164 = vst.msk [vmem:[#allocation3] sm:$0xff] %vm2286_vm5, %v3162_v22 }
 0x2b9   : > { %v3094_v8 = vld [vmem:[#allocation3 + $0x8] sm:$0xff]  ;;  %v4659_v40 = vpop.f32.mrf.mxu0 }
 0x2ba   : > { %v3163_v58 = vadd.f32 %v3158_v43, %v3094_v8 }
 0x2bb   : > { %v3377_v4 = vpop.f32.mrf.mxu0 }
 0x2bc   : > { %3165 = vst.msk [vmem:[#allocation3 + $0x8] sm:$0xff] %vm2286_vm5, %v3163_v58 }
 0x2bd   : > { %v4660_v16 = vpop.f32.mrf.mxu0 }
 0x2bf   : > { %v3166_v18 = vld [vmem:[#allocation3] sm:$0xff]  ;;  %v3447_v49 = vpop.f32.mrf.mxu1 }
 0x2c0   : > { %v3235_v50 = vadd.f32 %v3228_v29, %v3166_v18 }
 0x2c1   : > { %v4667_v3 = vpop.f32.mrf.mxu1 }
 0x2c2   : > { %3237 = vst.msk [vmem:[#allocation3] sm:$0xff] %vm2286_vm5, %v3235_v50 }
 0x2c3   : > { %v3167_v44 = vld [vmem:[#allocation3 + $0x8] sm:$0xff]  ;;  %v3450_v32 = vpop.f32.mrf.mxu1 }
 0x2c4   : > { %v3236_v37 = vadd.f32 %v3231_v51, %v3167_v44 }
 0x2c5   : > { %v4668_v60 = vpop.f32.mrf.mxu1 }
 0x2c6   : > { %3238 = vst.msk [vmem:[#allocation3 + $0x8] sm:$0xff] %vm2286_vm5, %v3236_v37 }
 0x2c9   : > { %v3239_v61 = vld [vmem:[#allocation3] sm:$0xff] }
 0x2ca   : > { %v3308_v6 = vadd.f32 %v3301_v7, %v3239_v61 }
 0x2cc   : > { %3310 = vst.msk [vmem:[#allocation3] sm:$0xff] %vm2286_vm5, %v3308_v6 }
 0x2cd   : > { %v3240_v31 = vld [vmem:[#allocation3 + $0x8] sm:$0xff] }
 0x2ce   : > { %v3309_v56 = vadd.f32 %v3304_v47, %v3240_v31 }
 0x2d0   : > { %3311 = vst.msk [vmem:[#allocation3 + $0x8] sm:$0xff] %vm2286_vm5, %v3309_v56 }
 0x2d3   : > { %v3312_v57 = vld [vmem:[#allocation3] sm:$0xff] }
 0x2d4   : > { %v3381_v36 = vadd.f32 %v3374_v48, %v3312_v57 }
 0x2d6   : > { %3383 = vst.msk [vmem:[#allocation3] sm:$0xff] %vm2286_vm5, %v3381_v36 }
 0x2d7   : > { %v3313_v46 = vld [vmem:[#allocation3 + $0x8] sm:$0xff] }
 0x2d8   : > { %v3382_v42 = vadd.f32 %v3377_v4, %v3313_v46 }
 0x2da   : > { %3384 = vst.msk [vmem:[#allocation3 + $0x8] sm:$0xff] %vm2286_vm5, %v3382_v42 }
 0x2dd   : > { %v3385_v63 = vld [vmem:[#allocation3] sm:$0xff] }
 0x2de   : > { %v3454_v0 = vadd.f32 %v3447_v49, %v3385_v63 }
 0x2e0   : > { %3456 = vst.msk [vmem:[#allocation3] sm:$0xff] %vm2286_vm5, %v3454_v0 }
 0x2e1   : > { %v3386_v17 = vld [vmem:[#allocation3 + $0x8] sm:$0xff] }
 0x2e2   : > { %v3455_v10 = vadd.f32 %v3450_v32, %v3386_v17 }
 0x2e4   : > { %3457 = vst.msk [vmem:[#allocation3 + $0x8] sm:$0xff] %vm2286_vm5, %v3455_v10 }
 0x2e7   : > { %v3458_v12 = vld [vmem:[#allocation3] sm:$0xff] }
 0x2e8   : > { %v3467_v19 = vadd.f32 %v3998_v59, %v3458_v12 }
 0x2ea   : > { %v3469_v13 = vmax.f32 %v3467_v19, 0.0 }
 0x2eb   : > { %v3459_v52 = vld [vmem:[#allocation3 + $0x8] sm:$0xff] }
 0x2ec   : > { %v3468_v28 = vadd.f32 %v3998_v59, %v3459_v52 }
 0x2ee   : > { %v3470_v23 = vmax.f32 %v3468_v28, 0.0 }
 0x2f0   : > { %v3471_v27 = vpack.c.bf16 %v3470_v23, %v3469_v13 }
 0x2f2   : > { %4678 = vmatmul.mubr.msk.bf16.vlgmr.msra.gmra.mxu0 %vm2286_vm5, %v3471_v27 }
 0x3b2   : > { %v3548_v62 = vpop.f32.mrf.mxu0 }
 0x3b3   : > { %v3549_v38 = vadd.f32 %v3999_v14, %v3548_v62 }
 0x3b4   : > { %v4679_v39 = vpop.f32.mrf.mxu0 }
 0x3b5   : > { %v3556_v33 = vsel %vm3555_vm8, %v3549_v38, -inf }
 0x3b6   : > { %3557 = vmax.xlane.f32.xlu0 %v3556_v33  ;;  %v3551_v34 = vpop.f32.mrf.mxu0 }
 0x3b7   : > { %v3552_v11 = vadd.f32 %v3999_v14, %v3551_v34 }
 0x3b8   : > { %v4680_v53 = vpop.f32.mrf.mxu0 }
 0x3b9   : > { %v3559_v15 = vsel %vm3555_vm8, %v3552_v11, -inf }
 0x3ba   : > { %3560 = vmax.xlane.f32.xlu0 %v3559_v15 }
 0x43f   : > { %v3558_v35 = vpop.xlane.xlu0 %3557 }
 0x440   : > { %v3562_v55 = vsub.f32 %v3549_v38, %v3558_v35 }
 0x442   : > { %v3564_v25 = vmul.f32 1.442695, %v3562_v55 }
 0x443   : > { %v3561_v43 = vpop.xlane.xlu0 %3560 }
 0x444   : > { %4955 = vpow2.f32 %v3564_v25  ;;  %v3563_v45 = vsub.f32 %v3552_v11, %v3561_v43 }
 0x446   : > { %v3566_v41 = vmul.f32 1.442695, %v3563_v45 }
 0x448   : > { %4957 = vpow2.f32 %v3566_v41 }
 0x451   : > { %v4956_v24 = vpop.eup %4955 }
 0x452   : > { %v3568_v29 = vsel %vm3555_vm8, %v4956_v24, 0.0 }
 0x453   : > { %3569 = vadd.xlane.f32.xlu1 %v3568_v29 }
 0x455   : > { %v4958_v30 = vpop.eup %4957 }
 0x456   : > { %v3571_v1 = vsel %vm3555_vm8, %v4958_v30, 0.0 }
 0x457   : > { %3572 = vadd.xlane.f32.xlu1 %v3571_v1 }
 0x4dc   : > { %v3570_v51 = vpop.xlane.xlu1 %3569 }
 0x4dd   : > { %4959 = vlog2.f32 %v3570_v51 }
 0x4e0   : > { %v3573_v54 = vpop.xlane.xlu1 %3572 }
 0x4e1   : > { %4961 = vlog2.f32 %v3573_v54 }
 0x4ea   : > { %v4960_v2 = vpop.eup %4959 }
 0x4eb   : > { %v3575_v5 = vmul.f32 0.6931472, %v4960_v2 }
 0x4ed   : > { %v3578_v7 = vsub.f32 %v3562_v55, %v3575_v5 }
 0x4ee   : > { %v4962_v20 = vpop.eup %4961 }
 0x4ef   : > { %3580 = vst.msk [vmem:[%s283_s19] sm:$0xff] %vm3555_vm8, %v3578_v7  ;;  %v3577_v21 = vmul.f32 0.6931472, %v4962_v20 }
 0x4f1   : > { %v3579_v47 = vsub.f32 %v3563_v45, %v3577_v21 }
 0x4f3   : > { %3581 = vst.msk [vmem:[%s283_s19 + $0x8] sm:$0xff] %vm3555_vm8, %v3579_v47 }
 0x4f4 PF: > { %s17_s24 = sadd.s32 1, %s4970_s24  }
 0x4f5   : > { %p14_p5 = scmp.ge.s32.totalorder %s17_s24, 4  }
 0x4f7   :  { %16 = sbr.rel (!%p14_p5) target bundleno = 1 (0x1), region = 93 }

</bundles_post_ra>
